<compile_context>
chip_gen: v7x
topology: tpu7x:2x2x1
jax: 0.10.0
libtpu: 0.0.40
codegen_flags: <defaults>
</compile_context>

<pallas_src>
import functools
import math

import jax
import jax.numpy as jnp
from jax import lax
from jax.experimental import pallas as pl
from jax.experimental.pallas import tpu as pltpu

LSTM_UNITS = 128
DENSE_HIDDEN_UNITS = 4 * LSTM_UNITS   # 512
EMB_DIM = 300
EMB_PAD = 384                          # 3 x 128: clean MXU K tiles / unmasked loads
NUM_CLASSES = 6
OUT_PAD = 128                          # lane-dense padded output width


def toxic_kernel(x_ref,
                 g_wih_f_ref, g_wih_b_ref, g_bias_f_ref, g_bias_b_ref,
                 g_whh_bd_ref, g_bhn_f_ref, g_bhn_b_ref,
                 r_wih_ref, r_bias_ref, r_whh_bd_ref,
                 w1_ref, b1_ref, w2_ref, b2_ref, w3_ref, b3_ref,
                 out_ref,
                 gi_f_scr, gi_b_scr, ri_scr, out_scr, max_acc, sum_acc,
                 *, p_true, p_pad, unroll):
    j = pl.program_id(0)                     # P-tile index
    last = pl.num_programs(0) - 1
    R, Pt, Epad = x_ref.shape                # R = recurrence axis (dim 0), Pt = P-tile
    H = LSTM_UNITS
    H2, H3 = 2 * H, 3 * H

    def dot(a, b):
        return jnp.dot(a, b, preferred_element_type=jnp.float32)

    # ---------- Phase 1: GRU input projections (bf16 slabs, stored straight to scratch) ----
    x2d = x_ref[...].reshape(R * Pt, Epad)                            # bf16 (R*Pt, 384)
    gi_f_scr[...] = dot(x2d, g_wih_f_ref[...]) + g_bias_f_ref[...]    # (R*Pt, 3H) f32
    gi_b_scr[...] = dot(x2d, g_wih_b_ref[...]) + g_bias_b_ref[...]

    # ---------- Phase 2: fused BiGRU recurrence (ONE block-diag matmul per step) ----------
    g_whh_bd = g_whh_bd_ref[...]                                      # (2H, 6H), constant
    bhn_f = jnp.broadcast_to(g_bhn_f_ref[...], (Pt, H))               # hoisted broadcasts
    bhn_b = jnp.broadcast_to(g_bhn_b_ref[...], (Pt, H))

    def gru_body(i, h):                       # h = [hf | hb]  (Pt, 2H) f32
        fo = pl.multiple_of(i * Pt, Pt)
        tb = R - 1 - i
        bo = pl.multiple_of(tb * Pt, Pt)
        gif = gi_f_scr[pl.ds(fo, Pt), :]      # fwd gates at time i
        gib = gi_b_scr[pl.ds(bo, Pt), :]      # bwd gates at time R-1-i
        gh = dot(h, g_whh_bd)                 # (Pt, 6H): [f_r f_z f_n | b_r b_z b_n]
        rf = jax.nn.sigmoid(gif[:, 0:H] + gh[:, 0:H])
        zf = jax.nn.sigmoid(gif[:, H:H2] + gh[:, H:H2])
        nf = jnp.tanh(gif[:, H2:H3] + rf * (gh[:, H2:H3] + bhn_f))
        rb = jax.nn.sigmoid(gib[:, 0:H] + gh[:, H3:H3 + H])
        zb = jax.nn.sigmoid(gib[:, H:H2] + gh[:, H3 + H:H3 + H2])
        nb = jnp.tanh(gib[:, H2:H3] + rb * (gh[:, H3 + H2:2 * H3] + bhn_b))
        hf = (1.0 - zf) * nf + zf * h[:, 0:H]
        hb = (1.0 - zb) * nb + zb * h[:, H:H2]
        out_scr[pl.ds(fo, Pt), 0:H] = hf      # merged GRU output: [fwd | bwd] lanes
        out_scr[pl.ds(bo, Pt), H:H2] = hb
        return jnp.concatenate([hf, hb], axis=-1)

    h0 = jnp.zeros((Pt, H2), jnp.float32)
    lax.fori_loop(0, R, gru_body, h0, unroll=unroll)

    # ---------- Phase 3: BiRNN input projection — ONE (R*Pt,2H)@(2H,2H) matmul ------------
    ri_scr[...] = dot(out_scr[...].astype(jnp.bfloat16), r_wih_ref[...]) + r_bias_ref[...]

    # ---------- Phase 4: fused BiRNN (tanh) recurrence; reuse out_scr for RNN outputs -----
    r_whh_bd = r_whh_bd_ref[...]              # (2H, 2H) block-diag, one MXU tile

    def rnn_body(i, h):
        fo = pl.multiple_of(i * Pt, Pt)
        tb = R - 1 - i
        bo = pl.multiple_of(tb * Pt, Pt)
        gh = dot(h, r_whh_bd)                 # (Pt, 2H)
        hf = jnp.tanh(ri_scr[pl.ds(fo, Pt), 0:H] + gh[:, 0:H])
        hb = jnp.tanh(ri_scr[pl.ds(bo, Pt), H:H2] + gh[:, H:H2])
        out_scr[pl.ds(fo, Pt), 0:H] = hf      # GRU outputs no longer needed -> reuse
        out_scr[pl.ds(bo, Pt), H:H2] = hb
        return jnp.concatenate([hf, hb], axis=-1)

    lax.fori_loop(0, R, rnn_body, h0, unroll=unroll)

    # ---------- Phase 5: per-tile pooling partials into running accumulators --------------
    rnn_out = out_scr[...].reshape(R, Pt, H2)
    if p_pad != p_true:                       # static branch; masked only when P was padded
        pos = lax.broadcasted_iota(jnp.int32, (1, Pt, 1), 1) + j * Pt
        valid = pos < p_true
        tile_max = jnp.max(jnp.where(valid, rnn_out, -jnp.inf), axis=1)   # (R, 2H)
        tile_sum = jnp.sum(jnp.where(valid, rnn_out, 0.0), axis=1)
    else:
        tile_max = jnp.max(rnn_out, axis=1)
        tile_sum = jnp.sum(rnn_out, axis=1)

    @pl.when(j == 0)
    def _():
        max_acc[...] = jnp.full_like(max_acc, -jnp.inf)
        sum_acc[...] = jnp.zeros_like(sum_acc)

    max_acc[...] = jnp.maximum(max_acc[...], tile_max)
    sum_acc[...] = sum_acc[...] + tile_sum

    # ---------- Phase 6: dense head + lane-dense padded output, last tile only ------------
    @pl.when(j == last)
    def _():
        pooled = jnp.concatenate(
            [max_acc[...], sum_acc[...] * (1.0 / float(p_true))], axis=-1)   # (R, 4H)
        h1 = jax.nn.relu(dot(pooled.astype(jnp.bfloat16), w1_ref[...]) + b1_ref[...]) + pooled
        h2 = jax.nn.relu(dot(h1.astype(jnp.bfloat16), w2_ref[...]) + b2_ref[...]) + h1
        out_ref[...] = jax.nn.sigmoid(dot(h2.astype(jnp.bfloat16), w3_ref[...]) + b3_ref[...])


# Kernel-input order (after x).
KERNEL_PARAM_ORDER = (
    "g_wih_f", "g_wih_b", "g_bias_f", "g_bias_b",
    "g_whh_bd", "g_bhn_f", "g_bhn_b",
    "r_wih", "r_bias", "r_whh_bd",
    "w1", "b1", "w2", "b2", "w3", "b3",
)


def init_params(key):
    """Deterministic PyTorch-style init. Weights stored pre-transposed (in, out), f32."""
    H = LSTM_UNITS
    D = DENSE_HIDDEN_UNITS

    def u(k, shape, bound):
        return jax.random.uniform(k, shape, jnp.float32, -bound, bound)

    keys = iter(jax.random.split(key, 32))
    params = {}
    kg = 1.0 / math.sqrt(H)
    for d in ("f", "b"):
        params[f"g_wih_{d}"] = u(next(keys), (EMB_DIM, 3 * H), kg)
        params[f"g_whh_{d}"] = u(next(keys), (H, 3 * H), kg)
        params[f"g_bih_{d}"] = u(next(keys), (1, 3 * H), kg)
        params[f"g_bhh_{d}"] = u(next(keys), (1, 3 * H), kg)
        params[f"r_wih_{d}"] = u(next(keys), (2 * H, H), kg)
        params[f"r_whh_{d}"] = u(next(keys), (H, H), kg)
        params[f"r_bih_{d}"] = u(next(keys), (1, H), kg)
        params[f"r_bhh_{d}"] = u(next(keys), (1, H), kg)
    kl = 1.0 / math.sqrt(D)
    params["w1"] = u(next(keys), (D, D), kl)
    params["b1"] = u(next(keys), (1, D), kl)
    params["w2"] = u(next(keys), (D, D), kl)
    params["b2"] = u(next(keys), (1, D), kl)
    params["w3"] = u(next(keys), (D, NUM_CLASSES), kl)
    params["b3"] = u(next(keys), (1, NUM_CLASSES), kl)
    return params


def prepare_kernel_params(params):
    """Fold/concat/pad/cast the PyTorch-style params into the kernel layout."""
    H = LSTM_UNITS
    kp = {}

    def pad_rows(w):                          # (300, n) -> (384, n), zero rows (exact)
        return jnp.pad(w, ((0, EMB_PAD - EMB_DIM), (0, 0)))

    # GRU: per-direction W_ih (bf16, padded K); fold b_ih + b_hh for r,z gates only.
    for d in ("f", "b"):
        kp[f"g_wih_{d}"] = pad_rows(params[f"g_wih_{d}"]).astype(jnp.bfloat16)
        bih = params[f"g_bih_{d}"]
        bhh = params[f"g_bhh_{d}"]
        bhh_rz = jnp.concatenate([bhh[:, :2 * H], jnp.zeros((1, H), jnp.float32)], axis=1)
        kp[f"g_bias_{d}"] = bih + bhh_rz
        kp[f"g_bhn_{d}"] = bhh[:, 2 * H:]     # n-gate hidden bias stays inside r * (...)

    # Block-diagonal hidden->hidden weights (f32 on the serial recurrence path).
    z3 = jnp.zeros((H, 3 * H), jnp.float32)
    kp["g_whh_bd"] = jnp.concatenate(
        [jnp.concatenate([params["g_whh_f"], z3], axis=1),
         jnp.concatenate([z3, params["g_whh_b"]], axis=1)], axis=0)      # (2H, 6H)

    # RNN: W_ih for both directions fused along out axis (input is [gru_fwd|gru_bwd]);
    # biases b_ih + b_hh fully folded (exact for a vanilla tanh RNN).
    kp["r_wih"] = jnp.concatenate(
        [params["r_wih_f"], params["r_wih_b"]], axis=1).astype(jnp.bfloat16)   # (2H, 2H)
    kp["r_bias"] = jnp.concatenate(
        [params["r_bih_f"] + params["r_bhh_f"],
         params["r_bih_b"] + params["r_bhh_b"]], axis=1)                 # (1, 2H)
    z1 = jnp.zeros((H, H), jnp.float32)
    kp["r_whh_bd"] = jnp.concatenate(
        [jnp.concatenate([params["r_whh_f"], z1], axis=1),
         jnp.concatenate([z1, params["r_whh_b"]], axis=1)], axis=0)      # (2H, 2H)

    # Dense head: bf16 weights, f32 biases; lane-dense final projection (6 -> 128 cols).
    kp["w1"] = params["w1"].astype(jnp.bfloat16)
    kp["b1"] = params["b1"]
    kp["w2"] = params["w2"].astype(jnp.bfloat16)
    kp["b2"] = params["b2"]
    kp["w3"] = jnp.pad(params["w3"], ((0, 0), (0, OUT_PAD - NUM_CLASSES))).astype(jnp.bfloat16)
    kp["b3"] = jnp.pad(params["b3"], ((0, 0), (0, OUT_PAD - NUM_CLASSES)))
    return kp


def toxic_classifier_forward(x, params, *, p_tile=8):
    # F.dropout2d(p=0.2) is identity in eval mode (training=False) -> no-op here.
    R, P, E = x.shape
    assert E == EMB_DIM
    assert p_tile % 8 == 0 and p_tile > 0
    H = LSTM_UNITS
    H2 = 2 * H

    p_pad = ((P + p_tile - 1) // p_tile) * p_tile
    n_tiles = p_pad // p_tile

    # Pad E 300->384 (clean MXU K-tiles), pad P up to the tile size, cast slab operand to bf16.
    xp = jnp.pad(x, ((0, 0), (0, p_pad - P), (0, EMB_PAD - E))).astype(jnp.bfloat16)

    kp = prepare_kernel_params(params)
    flat_inputs = [xp] + [kp[name] for name in KERNEL_PARAM_ORDER]

    vmem = pl.BlockSpec(memory_space=pltpu.MemorySpace.VMEM)      # weights fully VMEM-resident
    in_specs = ([pl.BlockSpec((R, p_tile, EMB_PAD), lambda j: (0, j, 0))]
                + [vmem] * (len(flat_inputs) - 1))
    out_spec = pl.BlockSpec((R, OUT_PAD), lambda j: (0, 0))       # same block every tile

    scratch_shapes = [
        pltpu.VMEM((R * p_tile, 3 * H), jnp.float32),   # gi_f (precomputed GRU fwd gates)
        pltpu.VMEM((R * p_tile, 3 * H), jnp.float32),   # gi_b
        pltpu.VMEM((R * p_tile, H2), jnp.float32),      # ri   (precomputed RNN input proj)
        pltpu.VMEM((R * p_tile, H2), jnp.float32),      # out  (GRU out, reused for RNN out)
        pltpu.VMEM((R, H2), jnp.float32),               # running max pooling accumulator
        pltpu.VMEM((R, H2), jnp.float32),               # running sum pooling accumulator
    ]

    # Unroll the short serial recurrences so the LLO scheduler can interleave EUP/VPU/MXU.
    unroll = True if R <= 16 else (4 if R % 4 == 0 else (2 if R % 2 == 0 else 1))
    kernel = functools.partial(toxic_kernel, p_true=P, p_pad=p_pad, unroll=unroll)

    # Computed VMEM budget (weights + scratch + double-buffered x/out tiles) with margin.
    # TODO(synk): raise the cap toward ~100 MiB when targeting v5e/v6e (128 MiB physical);
    #             56 MiB keeps headroom on v7x (64 MiB physical).
    weight_bytes = sum(int(a.size) * a.dtype.itemsize for a in flat_inputs[1:])
    scratch_bytes = 4 * (R * p_tile * 10 * H + 2 * R * H2)
    pipeline_bytes = 2 * (R * p_tile * EMB_PAD * 2 + R * OUT_PAD * 4)
    total_bytes = weight_bytes + scratch_bytes + pipeline_bytes
    vmem_limit = int(min(max(1.5 * total_bytes + (4 << 20), 32 << 20), 56 << 20))

    # Advisory cost estimate so XLA schedules around the custom call sensibly.
    flops = 2 * R * p_pad * (EMB_PAD * 6 * H       # GRU input projections (both dirs)
                             + H2 * 6 * H          # GRU block-diag recurrence matmuls
                             + H2 * H2             # RNN input projection
                             + H2 * H2)            # RNN block-diag recurrence matmuls
    flops += 2 * R * (2 * DENSE_HIDDEN_UNITS * DENSE_HIDDEN_UNITS
                      + DENSE_HIDDEN_UNITS * OUT_PAD)
    transcendentals = 8 * R * p_pad * H + R * OUT_PAD
    bytes_accessed = sum(int(a.size) * a.dtype.itemsize for a in flat_inputs) + R * OUT_PAD * 4

    out_padded = pl.pallas_call(
        kernel,
        out_shape=jax.ShapeDtypeStruct((R, OUT_PAD), jnp.float32),
        grid=(n_tiles,),
        in_specs=in_specs,
        out_specs=out_spec,
        scratch_shapes=scratch_shapes,
        compiler_params=pltpu.CompilerParams(
            dimension_semantics=("arbitrary",),    # pooling accumulators carry across tiles
            vmem_limit_bytes=vmem_limit),
        cost_estimate=pl.CostEstimate(flops=int(flops),
                                      transcendentals=int(transcendentals),
                                      bytes_accessed=int(bytes_accessed)),
    )(*flat_inputs)
    return out_padded[:, :NUM_CLASSES]


if __name__ == "__main__":
    key = jax.random.PRNGKey(0)
    k_x, k_p = jax.random.split(key)

    B, S = 2, 16                                     # small shapes: batch=2, seq=16 (2 P-tiles)
    x = jax.random.normal(k_x, (B, S, EMB_DIM), jnp.float32)
    params = init_params(k_p)

    out = toxic_classifier_forward(x, params)
    out = jax.block_until_ready(out)

    assert out.shape == (B, NUM_CLASSES)
    assert bool(jnp.all(jnp.isfinite(out)))
    assert bool(jnp.all((out >= 0.0) & (out <= 1.0)))   # sigmoid output
    print("KERNEL_OK")
</pallas_src>

<mosaic_0001>
module attributes {stable_mosaic.version = 11 : i64} {
  func.func @toxic_kernel(%arg0: i32, %arg1: memref<2x8x384xbf16, #tpu.memory_space<vmem>>, %arg2: memref<384x384xbf16, #tpu.memory_space<vmem>>, %arg3: memref<384x384xbf16, #tpu.memory_space<vmem>>, %arg4: memref<1x384xf32, #tpu.memory_space<vmem>>, %arg5: memref<1x384xf32, #tpu.memory_space<vmem>>, %arg6: memref<256x768xf32, #tpu.memory_space<vmem>>, %arg7: memref<1x128xf32, #tpu.memory_space<vmem>>, %arg8: memref<1x128xf32, #tpu.memory_space<vmem>>, %arg9: memref<256x256xbf16, #tpu.memory_space<vmem>>, %arg10: memref<1x256xf32, #tpu.memory_space<vmem>>, %arg11: memref<256x256xf32, #tpu.memory_space<vmem>>, %arg12: memref<512x512xbf16, #tpu.memory_space<vmem>>, %arg13: memref<1x512xf32, #tpu.memory_space<vmem>>, %arg14: memref<512x512xbf16, #tpu.memory_space<vmem>>, %arg15: memref<1x512xf32, #tpu.memory_space<vmem>>, %arg16: memref<512x128xbf16, #tpu.memory_space<vmem>>, %arg17: memref<1x128xf32, #tpu.memory_space<vmem>>, %arg18: memref<2x128xf32, #tpu.memory_space<vmem>>, %arg19: memref<16x384xf32, #tpu.memory_space<vmem>>, %arg20: memref<16x384xf32, #tpu.memory_space<vmem>>, %arg21: memref<16x256xf32, #tpu.memory_space<vmem>>, %arg22: memref<16x256xf32, #tpu.memory_space<vmem>>, %arg23: memref<2x256xf32, #tpu.memory_space<vmem>>, %arg24: memref<2x256xf32, #tpu.memory_space<vmem>>) attributes {dimension_semantics = [#tpu.dimension_semantics<arbitrary>], iteration_bounds = array<i64: 2>, scalar_prefetch = 0 : i64, scratch_operands = 6 : i64, tpu.core_type = #tpu.core_type<tc>, window_params = [{transform_indices = @transform_0, window_bounds = array<i64: 2, 8, 384>}, {pipeline_mode = #tpu.pipeline_mode<synchronous>, transform_indices = @transform_1, window_bounds = array<i64: 384, 384>}, {pipeline_mode = #tpu.pipeline_mode<synchronous>, transform_indices = @transform_2, window_bounds = array<i64: 384, 384>}, {pipeline_mode = #tpu.pipeline_mode<synchronous>, transform_indices = @transform_3, window_bounds = array<i64: 1, 384>}, {pipeline_mode = #tpu.pipeline_mode<synchronous>, transform_indices = @transform_4, window_bounds = array<i64: 1, 384>}, {pipeline_mode = #tpu.pipeline_mode<synchronous>, transform_indices = @transform_5, window_bounds = array<i64: 256, 768>}, {pipeline_mode = #tpu.pipeline_mode<synchronous>, transform_indices = @transform_6, window_bounds = array<i64: 1, 128>}, {pipeline_mode = #tpu.pipeline_mode<synchronous>, transform_indices = @transform_7, window_bounds = array<i64: 1, 128>}, {pipeline_mode = #tpu.pipeline_mode<synchronous>, transform_indices = @transform_8, window_bounds = array<i64: 256, 256>}, {pipeline_mode = #tpu.pipeline_mode<synchronous>, transform_indices = @transform_9, window_bounds = array<i64: 1, 256>}, {pipeline_mode = #tpu.pipeline_mode<synchronous>, transform_indices = @transform_10, window_bounds = array<i64: 256, 256>}, {pipeline_mode = #tpu.pipeline_mode<synchronous>, transform_indices = @transform_11, window_bounds = array<i64: 512, 512>}, {pipeline_mode = #tpu.pipeline_mode<synchronous>, transform_indices = @transform_12, window_bounds = array<i64: 1, 512>}, {pipeline_mode = #tpu.pipeline_mode<synchronous>, transform_indices = @transform_13, window_bounds = array<i64: 512, 512>}, {pipeline_mode = #tpu.pipeline_mode<synchronous>, transform_indices = @transform_14, window_bounds = array<i64: 1, 512>}, {pipeline_mode = #tpu.pipeline_mode<synchronous>, transform_indices = @transform_15, window_bounds = array<i64: 512, 128>}, {pipeline_mode = #tpu.pipeline_mode<synchronous>, transform_indices = @transform_16, window_bounds = array<i64: 1, 128>}, {pipeline_mode = #tpu.pipeline_mode<synchronous>, transform_indices = @transform_17, window_bounds = array<i64: 2, 128>}]} {
    %c0 = arith.constant 0 : index
    %c0_0 = arith.constant 0 : index
    %c0_1 = arith.constant 0 : index
    %0 = vector.load %arg1[%c0, %c0_0, %c0_1] : memref<2x8x384xbf16, #tpu.memory_space<vmem>>, vector<2x8x384xbf16>
    %1 = vector.shape_cast %0 : vector<2x8x384xbf16> to vector<16x384xbf16>
    %c0_2 = arith.constant 0 : index
    %c0_3 = arith.constant 0 : index
    %2 = vector.load %arg2[%c0_2, %c0_3] : memref<384x384xbf16, #tpu.memory_space<vmem>>, vector<384x384xbf16>
    %cst = arith.constant dense<0.000000e+00> : vector<16x384xf32>
    %3 = tpu.matmul %1, %2, %cst {dimension_numbers = #tpu.dot_dimension_numbers<[1], [0], [0], [1], [0, 0, 1, 1], [], []>} : vector<16x384xbf16>, vector<384x384xbf16>, vector<16x384xf32> -> vector<16x384xf32>
    %c0_4 = arith.constant 0 : index
    %c0_5 = arith.constant 0 : index
    %4 = vector.load %arg4[%c0_4, %c0_5] : memref<1x384xf32, #tpu.memory_space<vmem>>, vector<1x384xf32>
    %5 = vector.broadcast %4 : vector<1x384xf32> to vector<16x384xf32>
    %6 = arith.addf %3, %5 : vector<16x384xf32>
    %c0_6 = arith.constant 0 : index
    %c0_7 = arith.constant 0 : index
    %7 = vector.load %arg19[%c0_6, %c0_7] : memref<16x384xf32, #tpu.memory_space<vmem>>, vector<16x384xf32>
    tpu.vector_store %arg19[%c0_6, %c0_7], %6 {strides = array<i32>} : memref<16x384xf32, #tpu.memory_space<vmem>>, vector<16x384xf32>,
    %c0_8 = arith.constant 0 : index
    %c0_9 = arith.constant 0 : index
    %8 = vector.load %arg3[%c0_8, %c0_9] : memref<384x384xbf16, #tpu.memory_space<vmem>>, vector<384x384xbf16>
    %cst_10 = arith.constant dense<0.000000e+00> : vector<16x384xf32>
    %9 = tpu.matmul %1, %8, %cst_10 {dimension_numbers = #tpu.dot_dimension_numbers<[1], [0], [0], [1], [0, 0, 1, 1], [], []>} : vector<16x384xbf16>, vector<384x384xbf16>, vector<16x384xf32> -> vector<16x384xf32>
    %c0_11 = arith.constant 0 : index
    %c0_12 = arith.constant 0 : index
    %10 = vector.load %arg5[%c0_11, %c0_12] : memref<1x384xf32, #tpu.memory_space<vmem>>, vector<1x384xf32>
    %11 = vector.broadcast %10 : vector<1x384xf32> to vector<16x384xf32>
    %12 = arith.addf %9, %11 : vector<16x384xf32>
    %c0_13 = arith.constant 0 : index
    %c0_14 = arith.constant 0 : index
    %13 = vector.load %arg20[%c0_13, %c0_14] : memref<16x384xf32, #tpu.memory_space<vmem>>, vector<16x384xf32>
    tpu.vector_store %arg20[%c0_13, %c0_14], %12 {strides = array<i32>} : memref<16x384xf32, #tpu.memory_space<vmem>>, vector<16x384xf32>,
    %c0_15 = arith.constant 0 : index
    %c0_16 = arith.constant 0 : index
    %14 = vector.load %arg6[%c0_15, %c0_16] : memref<256x768xf32, #tpu.memory_space<vmem>>, vector<256x768xf32>
    %c0_17 = arith.constant 0 : index
    %c0_18 = arith.constant 0 : index
    %15 = vector.load %arg7[%c0_17, %c0_18] : memref<1x128xf32, #tpu.memory_space<vmem>>, vector<1x128xf32>
    %16 = vector.shape_cast %15 : vector<1x128xf32> to vector<1x128xf32>
    %17 = vector.broadcast %16 : vector<1x128xf32> to vector<8x128xf32>
    %c0_19 = arith.constant 0 : index
    %c0_20 = arith.constant 0 : index
    %18 = vector.load %arg8[%c0_19, %c0_20] : memref<1x128xf32, #tpu.memory_space<vmem>>, vector<1x128xf32>
    %19 = vector.shape_cast %18 : vector<1x128xf32> to vector<1x128xf32>
    %20 = vector.broadcast %19 : vector<1x128xf32> to vector<8x128xf32>
    %cst_21 = arith.constant 0.000000e+00 : f32
    %21 = vector.broadcast %cst_21 : f32 to vector<8x256xf32>
    %c0_i32 = arith.constant 0 : i32
    %c8_i32 = arith.constant 8 : i32
    %22 = arith.muli %c0_i32, %c8_i32 : i32
    %23 = tpu.assume_multiple %22, 8 : i32
    %c1_i32 = arith.constant 1 : i32
    %24 = arith.subi %c1_i32, %c0_i32 : i32
    %c8_i32_22 = arith.constant 8 : i32
    %25 = arith.muli %24, %c8_i32_22 : i32
    %26 = tpu.assume_multiple %25, 8 : i32
    %27 = arith.index_cast %23 : i32 to index
    %c0_23 = arith.constant 0 : index
    %28 = vector.load %arg19[%27, %c0_23] : memref<16x384xf32, #tpu.memory_space<vmem>>, vector<8x384xf32>
    %29 = arith.index_cast %26 : i32 to index
    %c0_24 = arith.constant 0 : index
    %30 = vector.load %arg20[%29, %c0_24] : memref<16x384xf32, #tpu.memory_space<vmem>>, vector<8x384xf32>
    %cst_25 = arith.constant dense<0.000000e+00> : vector<8x768xf32>
    %31 = tpu.matmul %21, %14, %cst_25 {dimension_numbers = #tpu.dot_dimension_numbers<[1], [0], [0], [1], [0, 0, 1, 1], [], []>} : vector<8x256xf32>, vector<256x768xf32>, vector<8x768xf32> -> vector<8x768xf32>
    %32 = vector.extract_strided_slice %28 {offsets = [0, 0], sizes = [8, 128], strides = [1, 1]} : vector<8x384xf32> to vector<8x128xf32>
    %33 = vector.extract_strided_slice %31 {offsets = [0, 0], sizes = [8, 128], strides = [1, 1]} : vector<8x768xf32> to vector<8x128xf32>
    %34 = arith.addf %32, %33 : vector<8x128xf32>
    %35 = arith.negf %34 : vector<8x128xf32>
    %36 = math.exp %35 : vector<8x128xf32>
    %cst_26 = arith.constant 1.000000e+00 : f32
    %37 = vector.broadcast %cst_26 : f32 to vector<8x128xf32>
    %38 = arith.addf %37, %36 : vector<8x128xf32>
    %39 = arith.divf %37, %38 : vector<8x128xf32>
    %40 = vector.extract_strided_slice %28 {offsets = [0, 128], sizes = [8, 128], strides = [1, 1]} : vector<8x384xf32> to vector<8x128xf32>
    %41 = vector.extract_strided_slice %31 {offsets = [0, 128], sizes = [8, 128], strides = [1, 1]} : vector<8x768xf32> to vector<8x128xf32>
    %42 = arith.addf %40, %41 : vector<8x128xf32>
    %43 = arith.negf %42 : vector<8x128xf32>
    %44 = math.exp %43 : vector<8x128xf32>
    %cst_27 = arith.constant 1.000000e+00 : f32
    %45 = vector.broadcast %cst_27 : f32 to vector<8x128xf32>
    %46 = arith.addf %45, %44 : vector<8x128xf32>
    %47 = arith.divf %45, %46 : vector<8x128xf32>
    %48 = vector.extract_strided_slice %28 {offsets = [0, 256], sizes = [8, 128], strides = [1, 1]} : vector<8x384xf32> to vector<8x128xf32>
    %49 = vector.extract_strided_slice %31 {offsets = [0, 256], sizes = [8, 128], strides = [1, 1]} : vector<8x768xf32> to vector<8x128xf32>
    %50 = arith.addf %49, %17 : vector<8x128xf32>
    %51 = arith.mulf %39, %50 : vector<8x128xf32>
    %52 = arith.addf %48, %51 : vector<8x128xf32>
    %53 = math.tanh %52 : vector<8x128xf32>
    %54 = vector.extract_strided_slice %30 {offsets = [0, 0], sizes = [8, 128], strides = [1, 1]} : vector<8x384xf32> to vector<8x128xf32>
    %55 = vector.extract_strided_slice %31 {offsets = [0, 384], sizes = [8, 128], strides = [1, 1]} : vector<8x768xf32> to vector<8x128xf32>
    %56 = arith.addf %54, %55 : vector<8x128xf32>
    %57 = arith.negf %56 : vector<8x128xf32>
    %58 = math.exp %57 : vector<8x128xf32>
    %cst_28 = arith.constant 1.000000e+00 : f32
    %59 = vector.broadcast %cst_28 : f32 to vector<8x128xf32>
    %60 = arith.addf %59, %58 : vector<8x128xf32>
    %61 = arith.divf %59, %60 : vector<8x128xf32>
    %62 = vector.extract_strided_slice %30 {offsets = [0, 128], sizes = [8, 128], strides = [1, 1]} : vector<8x384xf32> to vector<8x128xf32>
    %63 = vector.extract_strided_slice %31 {offsets = [0, 512], sizes = [8, 128], strides = [1, 1]} : vector<8x768xf32> to vector<8x128xf32>
    %64 = arith.addf %62, %63 : vector<8x128xf32>
    %65 = arith.negf %64 : vector<8x128xf32>
    %66 = math.exp %65 : vector<8x128xf32>
    %cst_29 = arith.constant 1.000000e+00 : f32
    %67 = vector.broadcast %cst_29 : f32 to vector<8x128xf32>
    %68 = arith.addf %67, %66 : vector<8x128xf32>
    %69 = arith.divf %67, %68 : vector<8x128xf32>
    %70 = vector.extract_strided_slice %30 {offsets = [0, 256], sizes = [8, 128], strides = [1, 1]} : vector<8x384xf32> to vector<8x128xf32>
    %71 = vector.extract_strided_slice %31 {offsets = [0, 640], sizes = [8, 128], strides = [1, 1]} : vector<8x768xf32> to vector<8x128xf32>
    %72 = arith.addf %71, %20 : vector<8x128xf32>
    %73 = arith.mulf %61, %72 : vector<8x128xf32>
    %74 = arith.addf %70, %73 : vector<8x128xf32>
    %75 = math.tanh %74 : vector<8x128xf32>
    %cst_30 = arith.constant 1.000000e+00 : f32
    %76 = vector.broadcast %cst_30 : f32 to vector<8x128xf32>
    %77 = arith.subf %76, %47 : vector<8x128xf32>
    %78 = arith.mulf %77, %53 : vector<8x128xf32>
    %79 = vector.extract_strided_slice %21 {offsets = [0, 0], sizes = [8, 128], strides = [1, 1]} : vector<8x256xf32> to vector<8x128xf32>
    %80 = arith.mulf %47, %79 : vector<8x128xf32>
    %81 = arith.addf %78, %80 : vector<8x128xf32>
    %cst_31 = arith.constant 1.000000e+00 : f32
    %82 = vector.broadcast %cst_31 : f32 to vector<8x128xf32>
    %83 = arith.subf %82, %69 : vector<8x128xf32>
    %84 = arith.mulf %83, %75 : vector<8x128xf32>
    %85 = vector.extract_strided_slice %21 {offsets = [0, 128], sizes = [8, 128], strides = [1, 1]} : vector<8x256xf32> to vector<8x128xf32>
    %86 = arith.mulf %69, %85 : vector<8x128xf32>
    %87 = arith.addf %84, %86 : vector<8x128xf32>
    %88 = arith.index_cast %23 : i32 to index
    %c0_32 = arith.constant 0 : index
    %89 = vector.load %arg22[%88, %c0_32] : memref<16x256xf32, #tpu.memory_space<vmem>>, vector<8x128xf32>
    tpu.vector_store %arg22[%88, %c0_32], %81 {strides = array<i32>} : memref<16x256xf32, #tpu.memory_space<vmem>>, vector<8x128xf32>,
    %90 = arith.index_cast %26 : i32 to index
    %c128 = arith.constant 128 : index
    %91 = vector.load %arg22[%90, %c128] : memref<16x256xf32, #tpu.memory_space<vmem>>, vector<8x128xf32>
    tpu.vector_store %arg22[%90, %c128], %87 {strides = array<i32>} : memref<16x256xf32, #tpu.memory_space<vmem>>, vector<8x128xf32>,
    %92 = tpu.concatenate %81, %87 in 1 : vector<8x128xf32>, vector<8x128xf32> -> vector<8x256xf32>
    %c1_i32_33 = arith.constant 1 : i32
    %c8_i32_34 = arith.constant 8 : i32
    %93 = arith.muli %c1_i32_33, %c8_i32_34 : i32
    %94 = tpu.assume_multiple %93, 8 : i32
    %c1_i32_35 = arith.constant 1 : i32
    %95 = arith.subi %c1_i32_35, %c1_i32_33 : i32
    %c8_i32_36 = arith.constant 8 : i32
    %96 = arith.muli %95, %c8_i32_36 : i32
    %97 = tpu.assume_multiple %96, 8 : i32
    %98 = arith.index_cast %94 : i32 to index
    %c0_37 = arith.constant 0 : index
    %99 = vector.load %arg19[%98, %c0_37] : memref<16x384xf32, #tpu.memory_space<vmem>>, vector<8x384xf32>
    %100 = arith.index_cast %97 : i32 to index
    %c0_38 = arith.constant 0 : index
    %101 = vector.load %arg20[%100, %c0_38] : memref<16x384xf32, #tpu.memory_space<vmem>>, vector<8x384xf32>
    %cst_39 = arith.constant dense<0.000000e+00> : vector<8x768xf32>
    %102 = tpu.matmul %92, %14, %cst_39 {dimension_numbers = #tpu.dot_dimension_numbers<[1], [0], [0], [1], [0, 0, 1, 1], [], []>} : vector<8x256xf32>, vector<256x768xf32>, vector<8x768xf32> -> vector<8x768xf32>
    %103 = vector.extract_strided_slice %99 {offsets = [0, 0], sizes = [8, 128], strides = [1, 1]} : vector<8x384xf32> to vector<8x128xf32>
    %104 = vector.extract_strided_slice %102 {offsets = [0, 0], sizes = [8, 128], strides = [1, 1]} : vector<8x768xf32> to vector<8x128xf32>
    %105 = arith.addf %103, %104 : vector<8x128xf32>
    %106 = arith.negf %105 : vector<8x128xf32>
    %107 = math.exp %106 : vector<8x128xf32>
    %cst_40 = arith.constant 1.000000e+00 : f32
    %108 = vector.broadcast %cst_40 : f32 to vector<8x128xf32>
    %109 = arith.addf %108, %107 : vector<8x128xf32>
    %110 = arith.divf %108, %109 : vector<8x128xf32>
    %111 = vector.extract_strided_slice %99 {offsets = [0, 128], sizes = [8, 128], strides = [1, 1]} : vector<8x384xf32> to vector<8x128xf32>
    %112 = vector.extract_strided_slice %102 {offsets = [0, 128], sizes = [8, 128], strides = [1, 1]} : vector<8x768xf32> to vector<8x128xf32>
    %113 = arith.addf %111, %112 : vector<8x128xf32>
    %114 = arith.negf %113 : vector<8x128xf32>
    %115 = math.exp %114 : vector<8x128xf32>
    %cst_41 = arith.constant 1.000000e+00 : f32
    %116 = vector.broadcast %cst_41 : f32 to vector<8x128xf32>
    %117 = arith.addf %116, %115 : vector<8x128xf32>
    %118 = arith.divf %116, %117 : vector<8x128xf32>
    %119 = vector.extract_strided_slice %99 {offsets = [0, 256], sizes = [8, 128], strides = [1, 1]} : vector<8x384xf32> to vector<8x128xf32>
    %120 = vector.extract_strided_slice %102 {offsets = [0, 256], sizes = [8, 128], strides = [1, 1]} : vector<8x768xf32> to vector<8x128xf32>
    %121 = arith.addf %120, %17 : vector<8x128xf32>
    %122 = arith.mulf %110, %121 : vector<8x128xf32>
    %123 = arith.addf %119, %122 : vector<8x128xf32>
    %124 = math.tanh %123 : vector<8x128xf32>
    %125 = vector.extract_strided_slice %101 {offsets = [0, 0], sizes = [8, 128], strides = [1, 1]} : vector<8x384xf32> to vector<8x128xf32>
    %126 = vector.extract_strided_slice %102 {offsets = [0, 384], sizes = [8, 128], strides = [1, 1]} : vector<8x768xf32> to vector<8x128xf32>
    %127 = arith.addf %125, %126 : vector<8x128xf32>
    %128 = arith.negf %127 : vector<8x128xf32>
    %129 = math.exp %128 : vector<8x128xf32>
    %cst_42 = arith.constant 1.000000e+00 : f32
    %130 = vector.broadcast %cst_42 : f32 to vector<8x128xf32>
    %131 = arith.addf %130, %129 : vector<8x128xf32>
    %132 = arith.divf %130, %131 : vector<8x128xf32>
    %133 = vector.extract_strided_slice %101 {offsets = [0, 128], sizes = [8, 128], strides = [1, 1]} : vector<8x384xf32> to vector<8x128xf32>
    %134 = vector.extract_strided_slice %102 {offsets = [0, 512], sizes = [8, 128], strides = [1, 1]} : vector<8x768xf32> to vector<8x128xf32>
    %135 = arith.addf %133, %134 : vector<8x128xf32>
    %136 = arith.negf %135 : vector<8x128xf32>
    %137 = math.exp %136 : vector<8x128xf32>
    %cst_43 = arith.constant 1.000000e+00 : f32
    %138 = vector.broadcast %cst_43 : f32 to vector<8x128xf32>
    %139 = arith.addf %138, %137 : vector<8x128xf32>
    %140 = arith.divf %138, %139 : vector<8x128xf32>
    %141 = vector.extract_strided_slice %101 {offsets = [0, 256], sizes = [8, 128], strides = [1, 1]} : vector<8x384xf32> to vector<8x128xf32>
    %142 = vector.extract_strided_slice %102 {offsets = [0, 640], sizes = [8, 128], strides = [1, 1]} : vector<8x768xf32> to vector<8x128xf32>
    %143 = arith.addf %142, %20 : vector<8x128xf32>
    %144 = arith.mulf %132, %143 : vector<8x128xf32>
    %145 = arith.addf %141, %144 : vector<8x128xf32>
    %146 = math.tanh %145 : vector<8x128xf32>
    %cst_44 = arith.constant 1.000000e+00 : f32
    %147 = vector.broadcast %cst_44 : f32 to vector<8x128xf32>
    %148 = arith.subf %147, %118 : vector<8x128xf32>
    %149 = arith.mulf %148, %124 : vector<8x128xf32>
    %150 = vector.extract_strided_slice %92 {offsets = [0, 0], sizes = [8, 128], strides = [1, 1]} : vector<8x256xf32> to vector<8x128xf32>
    %151 = arith.mulf %118, %150 : vector<8x128xf32>
    %152 = arith.addf %149, %151 : vector<8x128xf32>
    %cst_45 = arith.constant 1.000000e+00 : f32
    %153 = vector.broadcast %cst_45 : f32 to vector<8x128xf32>
    %154 = arith.subf %153, %140 : vector<8x128xf32>
    %155 = arith.mulf %154, %146 : vector<8x128xf32>
    %156 = vector.extract_strided_slice %92 {offsets = [0, 128], sizes = [8, 128], strides = [1, 1]} : vector<8x256xf32> to vector<8x128xf32>
    %157 = arith.mulf %140, %156 : vector<8x128xf32>
    %158 = arith.addf %155, %157 : vector<8x128xf32>
    %159 = arith.index_cast %94 : i32 to index
    %c0_46 = arith.constant 0 : index
    %160 = vector.load %arg22[%159, %c0_46] : memref<16x256xf32, #tpu.memory_space<vmem>>, vector<8x128xf32>
    tpu.vector_store %arg22[%159, %c0_46], %152 {strides = array<i32>} : memref<16x256xf32, #tpu.memory_space<vmem>>, vector<8x128xf32>,
    %161 = arith.index_cast %97 : i32 to index
    %c128_47 = arith.constant 128 : index
    %162 = vector.load %arg22[%161, %c128_47] : memref<16x256xf32, #tpu.memory_space<vmem>>, vector<8x128xf32>
    tpu.vector_store %arg22[%161, %c128_47], %158 {strides = array<i32>} : memref<16x256xf32, #tpu.memory_space<vmem>>, vector<8x128xf32>,
    %163 = tpu.concatenate %152, %158 in 1 : vector<8x128xf32>, vector<8x128xf32> -> vector<8x256xf32>
    %c2_i32 = arith.constant 2 : i32
    %c0_48 = arith.constant 0 : index
    %c0_49 = arith.constant 0 : index
    %164 = vector.load %arg22[%c0_48, %c0_49] : memref<16x256xf32, #tpu.memory_space<vmem>>, vector<16x256xf32>
    %165 = arith.truncf %164 : vector<16x256xf32> to vector<16x256xbf16>
    %c0_50 = arith.constant 0 : index
    %c0_51 = arith.constant 0 : index
    %166 = vector.load %arg9[%c0_50, %c0_51] : memref<256x256xbf16, #tpu.memory_space<vmem>>, vector<256x256xbf16>
    %cst_52 = arith.constant dense<0.000000e+00> : vector<16x256xf32>
    %167 = tpu.matmul %165, %166, %cst_52 {dimension_numbers = #tpu.dot_dimension_numbers<[1], [0], [0], [1], [0, 0, 1, 1], [], []>} : vector<16x256xbf16>, vector<256x256xbf16>, vector<16x256xf32> -> vector<16x256xf32>
    %c0_53 = arith.constant 0 : index
    %c0_54 = arith.constant 0 : index
    %168 = vector.load %arg10[%c0_53, %c0_54] : memref<1x256xf32, #tpu.memory_space<vmem>>, vector<1x256xf32>
    %169 = vector.broadcast %168 : vector<1x256xf32> to vector<16x256xf32>
    %170 = arith.addf %167, %169 : vector<16x256xf32>
    %c0_55 = arith.constant 0 : index
    %c0_56 = arith.constant 0 : index
    %171 = vector.load %arg21[%c0_55, %c0_56] : memref<16x256xf32, #tpu.memory_space<vmem>>, vector<16x256xf32>
    tpu.vector_store %arg21[%c0_55, %c0_56], %170 {strides = array<i32>} : memref<16x256xf32, #tpu.memory_space<vmem>>, vector<16x256xf32>,
    %c0_57 = arith.constant 0 : index
    %c0_58 = arith.constant 0 : index
    %172 = vector.load %arg11[%c0_57, %c0_58] : memref<256x256xf32, #tpu.memory_space<vmem>>, vector<256x256xf32>
    %c0_i32_59 = arith.constant 0 : i32
    %c8_i32_60 = arith.constant 8 : i32
    %173 = arith.muli %c0_i32_59, %c8_i32_60 : i32
    %174 = tpu.assume_multiple %173, 8 : i32
    %c1_i32_61 = arith.constant 1 : i32
    %175 = arith.subi %c1_i32_61, %c0_i32_59 : i32
    %c8_i32_62 = arith.constant 8 : i32
    %176 = arith.muli %175, %c8_i32_62 : i32
    %177 = tpu.assume_multiple %176, 8 : i32
    %cst_63 = arith.constant dense<0.000000e+00> : vector<8x256xf32>
    %178 = tpu.matmul %21, %172, %cst_63 {dimension_numbers = #tpu.dot_dimension_numbers<[1], [0], [0], [1], [0, 0, 1, 1], [], []>} : vector<8x256xf32>, vector<256x256xf32>, vector<8x256xf32> -> vector<8x256xf32>
    %179 = arith.index_cast %174 : i32 to index
    %c0_64 = arith.constant 0 : index
    %180 = vector.load %arg21[%179, %c0_64] : memref<16x256xf32, #tpu.memory_space<vmem>>, vector<8x128xf32>
    %181 = vector.extract_strided_slice %178 {offsets = [0, 0], sizes = [8, 128], strides = [1, 1]} : vector<8x256xf32> to vector<8x128xf32>
    %182 = arith.addf %180, %181 : vector<8x128xf32>
    %183 = math.tanh %182 : vector<8x128xf32>
    %184 = arith.index_cast %177 : i32 to index
    %c128_65 = arith.constant 128 : index
    %185 = vector.load %arg21[%184, %c128_65] : memref<16x256xf32, #tpu.memory_space<vmem>>, vector<8x128xf32>
    %186 = vector.extract_strided_slice %178 {offsets = [0, 128], sizes = [8, 128], strides = [1, 1]} : vector<8x256xf32> to vector<8x128xf32>
    %187 = arith.addf %185, %186 : vector<8x128xf32>
    %188 = math.tanh %187 : vector<8x128xf32>
    %189 = arith.index_cast %174 : i32 to index
    %c0_66 = arith.constant 0 : index
    %190 = vector.load %arg22[%189, %c0_66] : memref<16x256xf32, #tpu.memory_space<vmem>>, vector<8x128xf32>
    tpu.vector_store %arg22[%189, %c0_66], %183 {strides = array<i32>} : memref<16x256xf32, #tpu.memory_space<vmem>>, vector<8x128xf32>,
    %191 = arith.index_cast %177 : i32 to index
    %c128_67 = arith.constant 128 : index
    %192 = vector.load %arg22[%191, %c128_67] : memref<16x256xf32, #tpu.memory_space<vmem>>, vector<8x128xf32>
    tpu.vector_store %arg22[%191, %c128_67], %188 {strides = array<i32>} : memref<16x256xf32, #tpu.memory_space<vmem>>, vector<8x128xf32>,
    %193 = tpu.concatenate %183, %188 in 1 : vector<8x128xf32>, vector<8x128xf32> -> vector<8x256xf32>
    %c1_i32_68 = arith.constant 1 : i32
    %c8_i32_69 = arith.constant 8 : i32
    %194 = arith.muli %c1_i32_68, %c8_i32_69 : i32
    %195 = tpu.assume_multiple %194, 8 : i32
    %c1_i32_70 = arith.constant 1 : i32
    %196 = arith.subi %c1_i32_70, %c1_i32_68 : i32
    %c8_i32_71 = arith.constant 8 : i32
    %197 = arith.muli %196, %c8_i32_71 : i32
    %198 = tpu.assume_multiple %197, 8 : i32
    %cst_72 = arith.constant dense<0.000000e+00> : vector<8x256xf32>
    %199 = tpu.matmul %193, %172, %cst_72 {dimension_numbers = #tpu.dot_dimension_numbers<[1], [0], [0], [1], [0, 0, 1, 1], [], []>} : vector<8x256xf32>, vector<256x256xf32>, vector<8x256xf32> -> vector<8x256xf32>
    %200 = arith.index_cast %195 : i32 to index
    %c0_73 = arith.constant 0 : index
    %201 = vector.load %arg21[%200, %c0_73] : memref<16x256xf32, #tpu.memory_space<vmem>>, vector<8x128xf32>
    %202 = vector.extract_strided_slice %199 {offsets = [0, 0], sizes = [8, 128], strides = [1, 1]} : vector<8x256xf32> to vector<8x128xf32>
    %203 = arith.addf %201, %202 : vector<8x128xf32>
    %204 = math.tanh %203 : vector<8x128xf32>
    %205 = arith.index_cast %198 : i32 to index
    %c128_74 = arith.constant 128 : index
    %206 = vector.load %arg21[%205, %c128_74] : memref<16x256xf32, #tpu.memory_space<vmem>>, vector<8x128xf32>
    %207 = vector.extract_strided_slice %199 {offsets = [0, 128], sizes = [8, 128], strides = [1, 1]} : vector<8x256xf32> to vector<8x128xf32>
    %208 = arith.addf %206, %207 : vector<8x128xf32>
    %209 = math.tanh %208 : vector<8x128xf32>
    %210 = arith.index_cast %195 : i32 to index
    %c0_75 = arith.constant 0 : index
    %211 = vector.load %arg22[%210, %c0_75] : memref<16x256xf32, #tpu.memory_space<vmem>>, vector<8x128xf32>
    tpu.vector_store %arg22[%210, %c0_75], %204 {strides = array<i32>} : memref<16x256xf32, #tpu.memory_space<vmem>>, vector<8x128xf32>,
    %212 = arith.index_cast %198 : i32 to index
    %c128_76 = arith.constant 128 : index
    %213 = vector.load %arg22[%212, %c128_76] : memref<16x256xf32, #tpu.memory_space<vmem>>, vector<8x128xf32>
    tpu.vector_store %arg22[%212, %c128_76], %209 {strides = array<i32>} : memref<16x256xf32, #tpu.memory_space<vmem>>, vector<8x128xf32>,
    %214 = tpu.concatenate %204, %209 in 1 : vector<8x128xf32>, vector<8x128xf32> -> vector<8x256xf32>
    %c2_i32_77 = arith.constant 2 : i32
    %c0_78 = arith.constant 0 : index
    %c0_79 = arith.constant 0 : index
    %215 = vector.load %arg22[%c0_78, %c0_79] : memref<16x256xf32, #tpu.memory_space<vmem>>, vector<16x256xf32>
    %216 = vector.shape_cast %215 : vector<16x256xf32> to vector<2x8x256xf32>
    %cst_80 = arith.constant dense<0xFF800000> : vector<2x256xf32>
    %217 = vector.multi_reduction <maximumf>, %216, %cst_80 [1] : vector<2x8x256xf32> to vector<2x256xf32>
    %cst_81 = arith.constant dense<0.000000e+00> : vector<2x256xf32>
    %218 = vector.multi_reduction <add>, %216, %cst_81 [1] : vector<2x8x256xf32> to vector<2x256xf32>
    %c0_i32_82 = arith.constant 0 : i32
    %219 = arith.cmpi eq, %arg0, %c0_i32_82 : i32
    %220 = arith.extui %219 : i1 to i32
    %c0_i32_83 = arith.constant 0 : i32
    %221 = arith.cmpi ne, %220, %c0_i32_83 : i32
    scf.if %221 {
      %cst_94 = arith.constant 0xFF800000 : f32
      %231 = vector.broadcast %cst_94 : f32 to vector<2x256xf32>
      %c0_95 = arith.constant 0 : index
      %c0_96 = arith.constant 0 : index
      %232 = vector.load %arg23[%c0_95, %c0_96] : memref<2x256xf32, #tpu.memory_space<vmem>>, vector<2x256xf32>
      tpu.vector_store %arg23[%c0_95, %c0_96], %231 {strides = array<i32>} : memref<2x256xf32, #tpu.memory_space<vmem>>, vector<2x256xf32>,
      %cst_97 = arith.constant 0.000000e+00 : f32
      %233 = vector.broadcast %cst_97 : f32 to vector<2x256xf32>
      %c0_98 = arith.constant 0 : index
      %c0_99 = arith.constant 0 : index
      %234 = vector.load %arg24[%c0_98, %c0_99] : memref<2x256xf32, #tpu.memory_space<vmem>>, vector<2x256xf32>
      tpu.vector_store %arg24[%c0_98, %c0_99], %233 {strides = array<i32>} : memref<2x256xf32, #tpu.memory_space<vmem>>, vector<2x256xf32>,
    } else {
    }
    %c0_84 = arith.constant 0 : index
    %c0_85 = arith.constant 0 : index
    %222 = vector.load %arg23[%c0_84, %c0_85] : memref<2x256xf32, #tpu.memory_space<vmem>>, vector<2x256xf32>
    %223 = arith.maximumf %222, %217 : vector<2x256xf32>
    %c0_86 = arith.constant 0 : index
    %c0_87 = arith.constant 0 : index
    %224 = vector.load %arg23[%c0_86, %c0_87] : memref<2x256xf32, #tpu.memory_space<vmem>>, vector<2x256xf32>
    tpu.vector_store %arg23[%c0_86, %c0_87], %223 {strides = array<i32>} : memref<2x256xf32, #tpu.memory_space<vmem>>, vector<2x256xf32>,
    %c0_88 = arith.constant 0 : index
    %c0_89 = arith.constant 0 : index
    %225 = vector.load %arg24[%c0_88, %c0_89] : memref<2x256xf32, #tpu.memory_space<vmem>>, vector<2x256xf32>
    %226 = arith.addf %225, %218 : vector<2x256xf32>
    %c0_90 = arith.constant 0 : index
    %c0_91 = arith.constant 0 : index
    %227 = vector.load %arg24[%c0_90, %c0_91] : memref<2x256xf32, #tpu.memory_space<vmem>>, vector<2x256xf32>
    tpu.vector_store %arg24[%c0_90, %c0_91], %226 {strides = array<i32>} : memref<2x256xf32, #tpu.memory_space<vmem>>, vector<2x256xf32>,
    %c1_i32_92 = arith.constant 1 : i32
    %228 = arith.cmpi eq, %arg0, %c1_i32_92 : i32
    %229 = arith.extui %228 : i1 to i32
    %c0_i32_93 = arith.constant 0 : i32
    %230 = arith.cmpi ne, %229, %c0_i32_93 : i32
    scf.if %230 {
      %c0_94 = arith.constant 0 : index
      %c0_95 = arith.constant 0 : index
      %231 = vector.load %arg23[%c0_94, %c0_95] : memref<2x256xf32, #tpu.memory_space<vmem>>, vector<2x256xf32>
      %c0_96 = arith.constant 0 : index
      %c0_97 = arith.constant 0 : index
      %232 = vector.load %arg24[%c0_96, %c0_97] : memref<2x256xf32, #tpu.memory_space<vmem>>, vector<2x256xf32>
      %cst_98 = arith.constant 6.250000e-02 : f32
      %233 = vector.broadcast %cst_98 : f32 to vector<2x256xf32>
      %234 = arith.mulf %232, %233 : vector<2x256xf32>
      %235 = tpu.concatenate %231, %234 in 1 : vector<2x256xf32>, vector<2x256xf32> -> vector<2x512xf32>
      %236 = arith.truncf %235 : vector<2x512xf32> to vector<2x512xbf16>
      %c0_99 = arith.constant 0 : index
      %c0_100 = arith.constant 0 : index
      %237 = vector.load %arg12[%c0_99, %c0_100] : memref<512x512xbf16, #tpu.memory_space<vmem>>, vector<512x512xbf16>
      %cst_101 = arith.constant dense<0.000000e+00> : vector<2x512xf32>
      %238 = tpu.matmul %236, %237, %cst_101 {dimension_numbers = #tpu.dot_dimension_numbers<[1], [0], [0], [1], [0, 0, 1, 1], [], []>} : vector<2x512xbf16>, vector<512x512xbf16>, vector<2x512xf32> -> vector<2x512xf32>
      %c0_102 = arith.constant 0 : index
      %c0_103 = arith.constant 0 : index
      %239 = vector.load %arg13[%c0_102, %c0_103] : memref<1x512xf32, #tpu.memory_space<vmem>>, vector<1x512xf32>
      %240 = vector.broadcast %239 : vector<1x512xf32> to vector<2x512xf32>
      %241 = arith.addf %238, %240 : vector<2x512xf32>
      %cst_104 = arith.constant 0.000000e+00 : f32
      %242 = vector.broadcast %cst_104 : f32 to vector<2x512xf32>
      %243 = arith.maximumf %241, %242 : vector<2x512xf32>
      %244 = arith.addf %243, %235 : vector<2x512xf32>
      %245 = arith.truncf %244 : vector<2x512xf32> to vector<2x512xbf16>
      %c0_105 = arith.constant 0 : index
      %c0_106 = arith.constant 0 : index
      %246 = vector.load %arg14[%c0_105, %c0_106] : memref<512x512xbf16, #tpu.memory_space<vmem>>, vector<512x512xbf16>
      %cst_107 = arith.constant dense<0.000000e+00> : vector<2x512xf32>
      %247 = tpu.matmul %245, %246, %cst_107 {dimension_numbers = #tpu.dot_dimension_numbers<[1], [0], [0], [1], [0, 0, 1, 1], [], []>} : vector<2x512xbf16>, vector<512x512xbf16>, vector<2x512xf32> -> vector<2x512xf32>
      %c0_108 = arith.constant 0 : index
      %c0_109 = arith.constant 0 : index
      %248 = vector.load %arg15[%c0_108, %c0_109] : memref<1x512xf32, #tpu.memory_space<vmem>>, vector<1x512xf32>
      %249 = vector.broadcast %248 : vector<1x512xf32> to vector<2x512xf32>
      %250 = arith.addf %247, %249 : vector<2x512xf32>
      %cst_110 = arith.constant 0.000000e+00 : f32
      %251 = vector.broadcast %cst_110 : f32 to vector<2x512xf32>
      %252 = arith.maximumf %250, %251 : vector<2x512xf32>
      %253 = arith.addf %252, %244 : vector<2x512xf32>
      %254 = arith.truncf %253 : vector<2x512xf32> to vector<2x512xbf16>
      %c0_111 = arith.constant 0 : index
      %c0_112 = arith.constant 0 : index
      %255 = vector.load %arg16[%c0_111, %c0_112] : memref<512x128xbf16, #tpu.memory_space<vmem>>, vector<512x128xbf16>
      %cst_113 = arith.constant dense<0.000000e+00> : vector<2x128xf32>
      %256 = tpu.matmul %254, %255, %cst_113 {dimension_numbers = #tpu.dot_dimension_numbers<[1], [0], [0], [1], [0, 0, 1, 1], [], []>} : vector<2x512xbf16>, vector<512x128xbf16>, vector<2x128xf32> -> vector<2x128xf32>
      %c0_114 = arith.constant 0 : index
      %c0_115 = arith.constant 0 : index
      %257 = vector.load %arg17[%c0_114, %c0_115] : memref<1x128xf32, #tpu.memory_space<vmem>>, vector<1x128xf32>
      %258 = vector.broadcast %257 : vector<1x128xf32> to vector<2x128xf32>
      %259 = arith.addf %256, %258 : vector<2x128xf32>
      %260 = arith.negf %259 : vector<2x128xf32>
      %261 = math.exp %260 : vector<2x128xf32>
      %cst_116 = arith.constant 1.000000e+00 : f32
      %262 = vector.broadcast %cst_116 : f32 to vector<2x128xf32>
      %263 = arith.addf %262, %261 : vector<2x128xf32>
      %264 = arith.divf %262, %263 : vector<2x128xf32>
      %c0_117 = arith.constant 0 : index
      %c0_118 = arith.constant 0 : index
      %265 = vector.load %arg18[%c0_117, %c0_118] : memref<2x128xf32, #tpu.memory_space<vmem>>, vector<2x128xf32>
      tpu.vector_store %arg18[%c0_117, %c0_118], %264 {strides = array<i32>} : memref<2x128xf32, #tpu.memory_space<vmem>>, vector<2x128xf32>,
    } else {
    }
    return
  }
  func.func @transform_0(%arg0: i32) -> (i32, i32, i32) {
    %c0_i32 = arith.constant 0 : i32
    %c0_i32_0 = arith.constant 0 : i32
    %c0_i32_1 = arith.constant 0 : i32
    return %c0_i32, %arg0, %c0_i32_0 : i32, i32, i32
  }
  func.func @transform_1(%arg0: i32) -> (i32, i32) {
    %c0_i32 = arith.constant 0 : i32
    %c0_i32_0 = arith.constant 0 : i32
    %c0_i32_1 = arith.constant 0 : i32
    return %c0_i32, %c0_i32_0 : i32, i32
  }
  func.func @transform_2(%arg0: i32) -> (i32, i32) {
    %c0_i32 = arith.constant 0 : i32
    %c0_i32_0 = arith.constant 0 : i32
    %c0_i32_1 = arith.constant 0 : i32
    return %c0_i32, %c0_i32_0 : i32, i32
  }
  func.func @transform_3(%arg0: i32) -> (i32, i32) {
    %c0_i32 = arith.constant 0 : i32
    %c0_i32_0 = arith.constant 0 : i32
    %c0_i32_1 = arith.constant 0 : i32
    return %c0_i32, %c0_i32_0 : i32, i32
  }
  func.func @transform_4(%arg0: i32) -> (i32, i32) {
    %c0_i32 = arith.constant 0 : i32
    %c0_i32_0 = arith.constant 0 : i32
    %c0_i32_1 = arith.constant 0 : i32
    return %c0_i32, %c0_i32_0 : i32, i32
  }
  func.func @transform_5(%arg0: i32) -> (i32, i32) {
    %c0_i32 = arith.constant 0 : i32
    %c0_i32_0 = arith.constant 0 : i32
    %c0_i32_1 = arith.constant 0 : i32
    return %c0_i32, %c0_i32_0 : i32, i32
  }
  func.func @transform_6(%arg0: i32) -> (i32, i32) {
    %c0_i32 = arith.constant 0 : i32
    %c0_i32_0 = arith.constant 0 : i32
    %c0_i32_1 = arith.constant 0 : i32
    return %c0_i32, %c0_i32_0 : i32, i32
  }
  func.func @transform_7(%arg0: i32) -> (i32, i32) {
    %c0_i32 = arith.constant 0 : i32
    %c0_i32_0 = arith.constant 0 : i32
    %c0_i32_1 = arith.constant 0 : i32
    return %c0_i32, %c0_i32_0 : i32, i32
  }
  func.func @transform_8(%arg0: i32) -> (i32, i32) {
    %c0_i32 = arith.constant 0 : i32
    %c0_i32_0 = arith.constant 0 : i32
    %c0_i32_1 = arith.constant 0 : i32
    return %c0_i32, %c0_i32_0 : i32, i32
  }
  func.func @transform_9(%arg0: i32) -> (i32, i32) {
    %c0_i32 = arith.constant 0 : i32
    %c0_i32_0 = arith.constant 0 : i32
    %c0_i32_1 = arith.constant 0 : i32
    return %c0_i32, %c0_i32_0 : i32, i32
  }
  func.func @transform_10(%arg0: i32) -> (i32, i32) {
    %c0_i32 = arith.constant 0 : i32
    %c0_i32_0 = arith.constant 0 : i32
    %c0_i32_1 = arith.constant 0 : i32
    return %c0_i32, %c0_i32_0 : i32, i32
  }
  func.func @transform_11(%arg0: i32) -> (i32, i32) {
    %c0_i32 = arith.constant 0 : i32
    %c0_i32_0 = arith.constant 0 : i32
    %c0_i32_1 = arith.constant 0 : i32
    return %c0_i32, %c0_i32_0 : i32, i32
  }
  func.func @transform_12(%arg0: i32) -> (i32, i32) {
    %c0_i32 = arith.constant 0 : i32
    %c0_i32_0 = arith.constant 0 : i32
    %c0_i32_1 = arith.constant 0 : i32
    return %c0_i32, %c0_i32_0 : i32, i32
  }
  func.func @transform_13(%arg0: i32) -> (i32, i32) {
    %c0_i32 = arith.constant 0 : i32
    %c0_i32_0 = arith.constant 0 : i32
    %c0_i32_1 = arith.constant 0 : i32
    return %c0_i32, %c0_i32_0 : i32, i32
  }
  func.func @transform_14(%arg0: i32) -> (i32, i32) {
    %c0_i32 = arith.constant 0 : i32
    %c0_i32_0 = arith.constant 0 : i32
    %c0_i32_1 = arith.constant 0 : i32
    return %c0_i32, %c0_i32_0 : i32, i32
  }
  func.func @transform_15(%arg0: i32) -> (i32, i32) {
    %c0_i32 = arith.constant 0 : i32
    %c0_i32_0 = arith.constant 0 : i32
    %c0_i32_1 = arith.constant 0 : i32
    return %c0_i32, %c0_i32_0 : i32, i32
  }
  func.func @transform_16(%arg0: i32) -> (i32, i32) {
    %c0_i32 = arith.constant 0 : i32
    %c0_i32_0 = arith.constant 0 : i32
    %c0_i32_1 = arith.constant 0 : i32
    return %c0_i32, %c0_i32_0 : i32, i32
  }
  func.func @transform_17(%arg0: i32) -> (i32, i32) {
    %c0_i32 = arith.constant 0 : i32
    %c0_i32_0 = arith.constant 0 : i32
    %c0_i32_1 = arith.constant 0 : i32
    return %c0_i32, %c0_i32_0 : i32, i32
  }
}

</mosaic_0001>

<bundles_post_ra>
// kernel: tpu_custom_call.1
= control target key start
LH: loop header
LB: loop body
LE: loop exit
PB: predicated region body
PF: predicated region fallthrough
CT: control target
= control target key end

     0   :  { %s9454_s0 = inlined_call_operand.hbm [shape: bf16[2,16,384], index: 0, kind: input, shape index: {}]   ;;  %s9455_s1 = inlined_call_operand.hbm [shape: bf16[384,384], index: 1, kind: input, shape index: {}]   ;;  %s9456_s2 = inlined_call_operand.hbm [shape: bf16[384,384], index: 2, kind: input, shape index: {}]   ;;  %s9457_s3 = inlined_call_operand.vmem [shape: f32[1,384], index: 3, kind: input, shape index: {}]   ;;  %s9458_s4 = inlined_call_operand.vmem [shape: f32[1,384], index: 4, kind: input, shape index: {}]   ;;  %s9459_s5 = inlined_call_operand.hbm [shape: f32[256,768], index: 5, kind: input, shape index: {}]   ;;  %s9460_s6 = inlined_call_operand.vmem [shape: f32[1,128], index: 6, kind: input, shape index: {}]   ;;  %s9461_s7 = inlined_call_operand.vmem [shape: f32[1,128], index: 7, kind: input, shape index: {}]   ;;  %s9462_s8 = inlined_call_operand.hbm [shape: bf16[256,256], index: 8, kind: input, shape index: {}]   ;;  %s9463_s9 = inlined_call_operand.vmem [shape: f32[1,256], index: 9, kind: input, shape index: {}]   ;;  %s9464_s10 = inlined_call_operand.hbm [shape: f32[256,256], index: 10, kind: input, shape index: {}]   ;;  %s9465_s11 = inlined_call_operand.hbm [shape: bf16[512,512], index: 11, kind: input, shape index: {}]   ;;  %s9466_s12 = inlined_call_operand.vmem [shape: f32[1,512], index: 12, kind: input, shape index: {}]   ;;  %s9467_s13 = inlined_call_operand.hbm [shape: bf16[512,512], index: 13, kind: input, shape index: {}]   ;;  %s9468_s14 = inlined_call_operand.vmem [shape: f32[1,512], index: 14, kind: input, shape index: {}]   ;;  %s9469_s15 = inlined_call_operand.hbm [shape: bf16[512,128], index: 15, kind: input, shape index: {}]   ;;  %s9470_s16 = inlined_call_operand.vmem [shape: f32[1,128], index: 16, kind: input, shape index: {}]   ;;  %s9471_s17 = inlined_call_operand.hbm [shape: f32[2,128], index: 17, kind: output, shape index: {}]  }
   0x1   :  { %9532 = sst [smem:[#allocation76_spill]] %s9454_s0 }
   0x2   :  { %9533 = sst [smem:[#allocation77_spill]] %s9455_s1 }
   0x3   :  { %9534 = sst [smem:[#allocation78_spill]] %s9458_s4 }
   0x4   :  { %9535 = sst [smem:[#allocation79_spill]] %s9459_s5 }
   0x5   :  { %9536 = sst [smem:[#allocation80_spill]] %s9460_s6 }
   0x6   :  { %9537 = sst [smem:[#allocation81_spill]] %s9461_s7 }
   0x7   :  { %9538 = sst [smem:[#allocation82_spill]] %s9463_s9 }
   0x8   :  { %9539 = sst [smem:[#allocation83_spill]] %s9466_s12 }
   0x9   :  { %9540 = sst [smem:[#allocation84_spill]] %s9468_s14 }
   0xa   :  { %9541 = sst [smem:[#allocation85_spill]] %s9470_s16 }
   0xb   :  { %9542 = sst [smem:[#allocation86_spill]] %s9471_s17 }
   0xc   :  { %22 = vsyncpa [#allocation9], 0 }
   0xd   :  { %24 = vsyncpa [#allocation9 + $0x1], 0 }
   0xe   :  { %25 = vsyncpa [#allocation12], 0 }
   0xf   :  { %26 = vsyncpa [#allocation15], 0 }
  0x10   :  { %27 = vsyncpa [#allocation18], 0 }
  0x11   :  { %28 = vsyncpa [#allocation21], 0 }
  0x12   :  { %29 = vsyncpa [#allocation10], 0  ;;  %s8366_s24 = smov 0   ;;  %s8368_s25 = smov 0  }
  0x13   :  { %s8370_s26 = smov 0   ;;  %s8372_s27 = smov 0  }
  0x14 LB: > { %s8249_s28 = smov [#allocation11]   ;;  %s8387_s0 = sadd.s32 4294967295, %s8247_s27   ;;  %s8247_s27 = sphi %s8372_s27, %s9670_s27   ;;  %s8243_s26 = sphi %s8370_s26, %s9669_s26   ;;  %s8239_s25 = sphi %s8368_s25, %s9668_s25   ;;  %s8235_s24 = sphi %s8366_s24, %s9667_s24  }
  0x15   : > { %s435_s29 = sshll.u32 %s8249_s28, 4  ;;  %p5848_p0 = scmp.ge.s32.totalorder %s8247_s27, 1  ;;  %s8393_s29 = int_to_ptr.vmem [resolvable:$true] %s435_s29 }
  0x16   : > { %p9477_p1 = scmp.eq.s32.totalorder %s8387_s0, 0  ;;  %p423_p2 = scmp.lt.s32.totalorder %s8247_s27, 3 }
  0x17   : > { %s8250_s18 = smov [#allocation14]   ;;  %s8251_s20 = smov [#allocation17]  }
  0x18   : > { %p8395_p4 = pnand %p5848_p0, %p423_p2  ;;  %s467_s19 = sshll.u32 %s8250_s18, 4  ;;  %s8407_s19 = int_to_ptr.vmem [resolvable:$true] %s467_s19 }
  0x19   : > { %s8409_s21 = sshll.u32 %s8251_s20, 4  ;;  %s9545_s28 = sld [smem:[#allocation77_spill]]  ;;  %s503_s21 = int_to_ptr.vmem [resolvable:$true] %s8409_s21 }
  0x1a   : > { %s9543_s30 = scalar_select %p8395_p4, 1, 0 }
  0x1b   : > { %p7093_p5 = pneg %p8395_p4 }
  0x1d   : > { %p8403_p6 = pnand %p7093_p5, %p9477_p1 }
  0x1f   : > { %s7913_s17 = scalar_lea.hbm %s9545_s28, 9216  ;;  %p8419_p8 = pneg %p8403_p6 }
  0x20   : > { %p7914_p7 = scmp.ne.s32.totalorder %s9545_s28, %s7913_s17  ;;  %p7920_p11 = scmp.lt.u32.totalorder %s7913_s17, %s9545_s28 }
  0x22   : > { %p7916_p9 = pnand %p8419_p8, %p7914_p7 }
  0x24   : > { %p7917_p10 = pneg %p7916_p9 }
  0x26   : > { %p7922_p12 = pnand %p7920_p11, %p7917_p10 }
  0x28   : > { %7925 = shalt.err (!%p7922_p12)
}
  0x29   : > { %s7926_s14 = scalar_lea.vmem %s8393_s29, 9216  ;;  %p7934_p5 = scmp.lt.s32.totalorder %s8393_s29, %s8393_s29 }
  0x2a   : > { %p7927_p13 = scmp.ne.s32.totalorder %s8393_s29, %s7926_s14  ;;  %p7935_p3 = scmp.lt.s32.totalorder %s7926_s14, %s7926_s14 }
  0x2c   : > { %p7929_p0 = pnand %p7927_p13, %p8419_p8  ;;  %p7936_p7 = por %p7935_p3, %p7934_p5 }
  0x2e   : > { %p7930_p2 = pneg %p7929_p0 }
  0x30   : > { %p7937_p9 = pnand %p7936_p7, %p7930_p2 }
  0x32   : > { %7940 = shalt.err (!%p7937_p9)
}
  0x33   : > { %s9475_s16 = smov 192   ;;  %s9479_s12 = smov 12  }
  0x34   : > { %7096 = dma.hbm_to_vmem [thread:$0]  (!%p8403_p6), %s9545_s28, 9216, %s8393_s29, [#allocation12], %s9475_s16, %s9475_s16, %s9479_s12  }
  0x35   : > { %s9547_s5 = sld [smem:[#allocation79_spill]] }
  0x3b   : > { %s7941_s14 = scalar_lea.hbm %s9547_s5, 24576 }
  0x3c   : > { %p7942_p3 = scmp.ne.s32.totalorder %s9547_s5, %s7941_s14  ;;  %p7948_p12 = scmp.lt.u32.totalorder %s7941_s14, %s9547_s5 }
  0x3e   : > { %p7944_p10 = pnand %p7942_p3, %p8419_p8 }
  0x40   : > { %p7945_p11 = pneg %p7944_p10 }
  0x42   : > { %p7950_p13 = pnand %p7948_p12, %p7945_p11 }
  0x44   : > { %7953 = shalt.err (!%p7950_p13)
}
  0x45   : > { %s7954_s29 = scalar_lea.vmem %s8407_s19, 24576  ;;  %p7962_p7 = scmp.lt.s32.totalorder %s8407_s19, %s8407_s19 }
  0x46   : > { %p7955_p0 = scmp.ne.s32.totalorder %s8407_s19, %s7954_s29  ;;  %p7963_p9 = scmp.lt.s32.totalorder %s7954_s29, %s7954_s29 }
  0x48   : > { %p7957_p2 = pnand %p7955_p0, %p8419_p8  ;;  %p7964_p3 = por %p7963_p9, %p7962_p7 }
  0x4a   : > { %p7958_p5 = pneg %p7957_p2 }
  0x4c   : > { %p7965_p10 = pnand %p7964_p3, %p7958_p5 }
  0x4e   : > { %7968 = shalt.err (!%p7965_p10)
}
  0x4f   : > { %s8254_s7 = smov 768   ;;  %s8255_s4 = smov 48  }
  0x50   : > { %7102 = dma.hbm_to_vmem [thread:$0]  (!%p8403_p6), %s9547_s5, 24576, %s8407_s19, [#allocation15], %s8254_s7, %s8254_s7, %s8255_s4  }
  0x51   : > { %s7969_s23 = scalar_lea.hbm %s9464_s10, 8192 }
  0x52   : > { %p7970_p11 = scmp.ne.s32.totalorder %s9464_s10, %s7969_s23  ;;  %p7976_p0 = scmp.lt.u32.totalorder %s7969_s23, %s9464_s10 }
  0x54   : > { %p7972_p12 = pnand %p7970_p11, %p8419_p8 }
  0x56   : > { %p7973_p13 = pneg %p7972_p12 }
  0x58   : > { %p7978_p2 = pnand %p7976_p0, %p7973_p13 }
  0x5a   : > { %7981 = shalt.err (!%p7978_p2)
}
  0x5b   : > { %s7982_s6 = scalar_lea.vmem %s503_s21, 8192  ;;  %p7990_p3 = scmp.lt.s32.totalorder %s503_s21, %s503_s21 }
  0x5c   : > { %p7983_p5 = scmp.ne.s32.totalorder %s503_s21, %s7982_s6  ;;  %p7991_p10 = scmp.lt.s32.totalorder %s7982_s6, %s7982_s6 }
  0x5e   : > { %p7985_p7 = pnand %p7983_p5, %p8419_p8  ;;  %p7992_p1 = por %p7991_p10, %p7990_p3 }
  0x60   : > { %p7986_p9 = pneg %p7985_p7 }
  0x62   : > { %p7993_p4 = pnand %p7992_p1, %p7986_p9 }
  0x64   : > { %7996 = shalt.err (!%p7993_p4)
}
  0x65   : > { %s9482_s19 = smov 256   ;;  %s9483_s7 = smov 16  }
  0x66   : > { %7108 = dma.hbm_to_vmem [thread:$0]  (!%p8403_p6), %s9464_s10, 8192, %s503_s21, [#allocation18], %s9482_s19, %s9482_s19, %s9483_s7  }
  0x67   : > { %s8258_s9 = smov [#allocation20]   ;;  %s8259_s22 = smov [#allocation13]  }
  0x68   : > { %s531_s17 = sshll.u32 %s8258_s9, 4  ;;  %s448_s23 = sshll.u32 %s8259_s22, 4  ;;  %s532_s17 = int_to_ptr.vmem [resolvable:$true] %s531_s17  ;;  %s449_s23 = int_to_ptr.vmem [resolvable:$true] %s448_s23 }
  0x69   : > { %s7997_s29 = scalar_lea.hbm %s9467_s13, 16384 }
  0x6a   : > { %p7998_p1 = scmp.ne.s32.totalorder %s9467_s13, %s7997_s29  ;;  %p8004_p12 = scmp.lt.u32.totalorder %s7997_s29, %s9467_s13 }
  0x6c   : > { %p8000_p4 = pnand %p7998_p1, %p8419_p8 }
  0x6e   : > { %p8001_p11 = pneg %p8000_p4 }
  0x70   : > { %p8006_p13 = pnand %p8004_p12, %p8001_p11 }
  0x72   : > { %8009 = shalt.err (!%p8006_p13)
}
  0x73   : > { %s8010_s21 = scalar_lea.vmem %s532_s17, 16384  ;;  %p8018_p7 = scmp.lt.s32.totalorder %s532_s17, %s532_s17 }
  0x74   : > { %p8011_p0 = scmp.ne.s32.totalorder %s532_s17, %s8010_s21  ;;  %p8019_p9 = scmp.lt.s32.totalorder %s8010_s21, %s8010_s21 }
  0x76   : > { %p8013_p2 = pnand %p8011_p0, %p8419_p8  ;;  %p8020_p3 = por %p8019_p9, %p8018_p7 }
  0x78   : > { %p8014_p5 = pneg %p8013_p2 }
  0x7a   : > { %p8021_p10 = pnand %p8020_p3, %p8014_p5 }
  0x7c   : > { %8024 = shalt.err (!%p8021_p10)
}
  0x7d   : > { %7114 = dma.hbm_to_vmem [thread:$0]  (!%p8403_p6), %s9467_s13, 16384, %s532_s17, [#allocation21], %s9482_s19, %s9482_s19, %s9483_s7  }
  0x7e   : > { %s8025_s4 = scalar_lea.hbm %s9456_s2, 9216 }
  0x7f   : > { %p8026_p1 = scmp.ne.s32.totalorder %s9456_s2, %s8025_s4  ;;  %p8032_p12 = scmp.lt.u32.totalorder %s8025_s4, %s9456_s2 }
  0x81   : > { %p8028_p4 = pnand %p8026_p1, %p8419_p8 }
  0x83   : > { %p8029_p11 = pneg %p8028_p4 }
  0x85   : > { %p8034_p13 = pnand %p8032_p12, %p8029_p11 }
  0x87   : > { %8037 = shalt.err (!%p8034_p13)
}
  0x88   : > { %s8038_s29 = scalar_lea.vmem %s449_s23, 9216  ;;  %p8046_p7 = scmp.lt.s32.totalorder %s449_s23, %s449_s23 }
  0x89   : > { %p8039_p0 = scmp.ne.s32.totalorder %s449_s23, %s8038_s29  ;;  %p8047_p9 = scmp.lt.s32.totalorder %s8038_s29, %s8038_s29 }
  0x8b   : > { %p8041_p2 = pnand %p8039_p0, %p8419_p8  ;;  %p8048_p3 = por %p8047_p9, %p8046_p7 }
  0x8d   : > { %p8042_p5 = pneg %p8041_p2 }
  0x8f   : > { %p8049_p10 = pnand %p8048_p3, %p8042_p5 }
  0x91   : > { %8052 = shalt.err (!%p8049_p10)
}
  0x92   : > { %s9548_s17 = smov 12   ;;  %s9549_s6 = smov 192  }
  0x93   : > { %7099 = dma.hbm_to_vmem [thread:$0]  (!%p8403_p6), %s9456_s2, 9216, %s449_s23, [#allocation12], %s9549_s6, %s9549_s6, %s9548_s17  }
  0x94   : > { %s8260_s28 = smov [#allocation16]   ;;  %s8053_s9 = scalar_lea.hbm %s9462_s8, 4096 }
  0x95   : > { %s486_s12 = sshll.u32 %s8260_s28, 4  ;;  %p8054_p1 = scmp.ne.s32.totalorder %s9462_s8, %s8053_s9  ;;  %s487_s12 = int_to_ptr.vmem [resolvable:$true] %s486_s12 }
  0x96   : > { %p8060_p12 = scmp.lt.u32.totalorder %s8053_s9, %s9462_s8 }
  0x97   : > { %p8056_p4 = pnand %p8054_p1, %p8419_p8 }
  0x99   : > { %p8057_p11 = pneg %p8056_p4 }
  0x9b   : > { %p8062_p13 = pnand %p8060_p12, %p8057_p11 }
  0x9d   : > { %8065 = shalt.err (!%p8062_p13)
}
  0x9e   : > { %s8066_s23 = scalar_lea.vmem %s487_s12, 4096  ;;  %p8074_p7 = scmp.lt.s32.totalorder %s487_s12, %s487_s12 }
  0x9f   : > { %p8067_p0 = scmp.ne.s32.totalorder %s487_s12, %s8066_s23  ;;  %p8075_p9 = scmp.lt.s32.totalorder %s8066_s23, %s8066_s23 }
  0xa1   : > { %p8069_p2 = pnand %p8067_p0, %p8419_p8  ;;  %p8076_p3 = por %p8075_p9, %p8074_p7 }
  0xa3   : > { %p8070_p5 = pneg %p8069_p2 }
  0xa5   : > { %p8077_p10 = pnand %p8076_p3, %p8070_p5 }
  0xa7   : > { %8080 = shalt.err (!%p8077_p10)
}
  0xa8   : > { %s8261_s21 = smov 128   ;;  %s8262_s5 = smov 8  }
  0xa9   : > { %7105 = dma.hbm_to_vmem [thread:$0]  (!%p8403_p6), %s9462_s8, 4096, %s487_s12, [#allocation15], %s8261_s21, %s8261_s21, %s8262_s5  }
  0xaa   : > { %s8263_s4 = smov [#allocation19]   ;;  %s8264_s22 = smov [#allocation22]  }
  0xab   : > { %s515_s9 = sshll.u32 %s8263_s4, 4  ;;  %s547_s20 = sshll.u32 %s8264_s22, 4  ;;  %s516_s9 = int_to_ptr.vmem [resolvable:$true] %s515_s9  ;;  %s8548_s20 = int_to_ptr.vmem [resolvable:$true] %s547_s20 }
  0xac   : > { %s8081_s23 = scalar_lea.hbm %s9465_s11, 16384 }
  0xad   : > { %p8082_p1 = scmp.ne.s32.totalorder %s9465_s11, %s8081_s23  ;;  %p8088_p12 = scmp.lt.u32.totalorder %s8081_s23, %s9465_s11 }
  0xaf   : > { %p8084_p4 = pnand %p8082_p1, %p8419_p8 }
  0xb1   : > { %p8085_p11 = pneg %p8084_p4 }
  0xb3   : > { %p8090_p13 = pnand %p8088_p12, %p8085_p11 }
  0xb5   : > { %8093 = shalt.err (!%p8090_p13)
}
  0xb6   : > { %s8094_s21 = scalar_lea.vmem %s516_s9, 16384  ;;  %p8102_p7 = scmp.lt.s32.totalorder %s516_s9, %s516_s9 }
  0xb7   : > { %p8095_p0 = scmp.ne.s32.totalorder %s516_s9, %s8094_s21  ;;  %p8103_p9 = scmp.lt.s32.totalorder %s8094_s21, %s8094_s21 }
  0xb9   : > { %p8097_p2 = pnand %p8095_p0, %p8419_p8  ;;  %p8104_p3 = por %p8103_p9, %p8102_p7 }
  0xbb   : > { %p8098_p5 = pneg %p8097_p2 }
  0xbd   : > { %p8105_p10 = pnand %p8104_p3, %p8098_p5 }
  0xbf   : > { %8108 = shalt.err (!%p8105_p10)
}
  0xc0   : > { %s9550_s19 = smov 16   ;;  %s9551_s7 = smov 256  }
  0xc1   : > { %7111 = dma.hbm_to_vmem [thread:$0]  (!%p8403_p6), %s9465_s11, 16384, %s516_s9, [#allocation18], %s9551_s7, %s9551_s7, %s9550_s19  }
  0xc2   : > { %s8109_s14 = scalar_lea.hbm %s9469_s15, 4096 }
  0xc3   : > { %p8110_p1 = scmp.ne.s32.totalorder %s9469_s15, %s8109_s14  ;;  %p8116_p12 = scmp.lt.u32.totalorder %s8109_s14, %s9469_s15 }
  0xc5   : > { %p8112_p4 = pnand %p8110_p1, %p8419_p8 }
  0xc7   : > { %p8113_p11 = pneg %p8112_p4 }
  0xc9   : > { %p8118_p13 = pnand %p8116_p12, %p8113_p11 }
  0xcb   : > { %8121 = shalt.err (!%p8118_p13)
}
  0xcc   : > { %s8122_s9 = scalar_lea.vmem %s8548_s20, 4096  ;;  %p8130_p7 = scmp.lt.s32.totalorder %s8548_s20, %s8548_s20 }
  0xcd   : > { %p8123_p0 = scmp.ne.s32.totalorder %s8548_s20, %s8122_s9  ;;  %p8131_p9 = scmp.lt.s32.totalorder %s8122_s9, %s8122_s9 }
  0xcf   : > { %p8125_p2 = pnand %p8123_p0, %p8419_p8  ;;  %p8132_p3 = por %p8131_p9, %p8130_p7 }
  0xd1   : > { %p8126_p5 = pneg %p8125_p2 }
  0xd3   : > { %p8133_p10 = pnand %p8132_p3, %p8126_p5 }
  0xd5   : > { %8136 = shalt.err (!%p8133_p10)
}
  0xd6   : > { %s8265_s21 = smov 64   ;;  %s8266_s18 = smov 4  }
  0xd7   : > { %7117 = dma.hbm_to_vmem [thread:$0]  (!%p8403_p6), %s9469_s15, 4096, %s8548_s20, [#allocation21], %s8265_s21, %s8265_s21, %s8266_s18  }
  0xd8   : > { %s8595_s5 = sadd.s32 1, %s8247_s27   ;;  %s42_s16 = sadd.s32 1, %s8243_s26 }
  0xd9   : > { %s39_s4 = ssub.s32 %s8247_s27, %s8595_s5  ;;  %p49_p8 = scmp.ne.s32.totalorder %s8243_s26, %s8239_s25 }
  0xda   : > { %p40_p1 = scmp.eq.s32.totalorder %s39_s4, 0  ;;  %p50_p4 = scmp.eq.s32.totalorder %s8247_s27, 0 }
  0xdb   : > { %p55_p11 = scmp.ne.s32.totalorder %s8239_s25, %s8235_s24  ;;  %p7130_p12 = scmp.lt.s32.totalorder %s8247_s27, 2 }
  0xdc   : > { %s8607_s22 = scalar_select %p40_p1, %s8243_s26, %s42_s16  }
  0xdd   : > { %p51_p13 = por %p50_p4, %p49_p8  ;;  %p9552_p0 = scmp.eq.s32.totalorder %s8387_s0, 0 }
  0xde   : > { %s564_s14 = sand.u32 1, %s8243_s26   ;;  %s7053_s20 = smul.u32 192, %s8247_s27 }
  0xdf   : > { %p8611_p2 = por %p9552_p0, %p55_p11  ;;  %s7052_s29 = smul.u32 24, %s564_s14 }
  0xe0   : > { %s9554_s12 = sld [smem:[#allocation76_spill]]  ;;  %p8622_p6 = pnand %p7130_p12, %p51_p13 }
  0xe1   : > { %s568_s21 = scalar_lea.vmem [#allocation8], %s7052_s29  ;;  %s8628_s27 = scalar_lea.sflag [#allocation9], %s564_s14 }
  0xe2   : > { %s575_s18 = sshll.u32 %s568_s21, 4  ;;  %p8139_p7 = pneg %p8622_p6  ;;  %s8626_s18 = int_to_ptr.vmem [resolvable:$true] %s575_s18 }
  0xe6   : > { %s8620_s9 = scalar_lea.hbm %s9554_s12, %s7053_s20  ;;  %s8142_s4 = scalar_lea.hbm %s9554_s12, 768 }
  0xe7   : > { %s8137_s19 = scalar_lea.hbm %s8620_s9, 384  ;;  %p8143_p10 = scmp.lt.u32.totalorder %s8620_s9, %s9554_s12 }
  0xe8   : > { %p8138_p5 = scmp.ne.s32.totalorder %s8620_s9, %s8137_s19  ;;  %p8144_p8 = scmp.lt.u32.totalorder %s8142_s4, %s8137_s19 }
  0xe9   : > { %p8146_p4 = scmp.lt.u32.totalorder %s8137_s19, %s8620_s9 }
  0xea   : > { %p8140_p9 = pnand %p8139_p7, %p8138_p5  ;;  %p8145_p1 = por %p8144_p8, %p8143_p10 }
  0xec   : > { %p8141_p3 = pneg %p8140_p9  ;;  %p8147_p11 = por %p8146_p4, %p8145_p1 }
  0xee   : > { %p8148_p12 = pnand %p8147_p11, %p8141_p3 }
  0xf0   : > { %8151 = shalt.err (!%p8148_p12)
}
  0xf1   : > { %s8152_s14 = scalar_lea.vmem %s8626_s18, 384  ;;  %s8267_s29 = smov [#allocation8]  }
  0xf2   : > { %p8153_p13 = scmp.ne.s32.totalorder %s8626_s18, %s8152_s14  ;;  %s8157_s28 = sshll.u32 %s8267_s29, 4  ;;  %s8158_s28 = int_to_ptr.vmem [resolvable:$false] %s8157_s28 }
  0xf3   : > { %s8159_s21 = scalar_lea.vmem %s8158_s28, 768  ;;  %p8160_p9 = scmp.lt.s32.totalorder %s8626_s18, %s8158_s28 }
  0xf4   : > { %p8155_p0 = pnand %p8153_p13, %p8139_p7  ;;  %p8161_p10 = scmp.lt.s32.totalorder %s8159_s21, %s8152_s14 }
  0xf6   : > { %p8156_p5 = pneg %p8155_p0  ;;  %p8162_p8 = por %p8161_p10, %p8160_p9 }
  0xf8   : > { %p8163_p1 = pnand %p8162_p8, %p8156_p5 }
  0xfa   : > { %8166 = shalt.err (!%p8163_p1)
}
  0xfb   : > { %s8268_s19 = smov 384   ;;  %p9556_p7 = scmp.ne.s32.totalorder %s9543_s30, 0 }
  0xfc   : > { %7121 = dma.hbm_to_vmem [thread:$0]  (!%p8622_p6), %s8620_s9, 384, %s8626_s18, %s8628_s27, %s8268_s19, %s9549_s6, %s9548_s17  }
  0xfd   : > { %587 = sbr.rel (%p9556_p7) target bundleno = 2492 (0x9bc), region = 88 }
 0x104   : > { %s589_s7 = sand.u32 1, %s8239_s25  }
 0x105   : > { %s7054_s16 = smul.u32 24, %s589_s7  ;;  %s590_s4 = scalar_lea.sflag [#allocation9], %s589_s7 }
 0x107   : > { %s8661_s20 = scalar_lea.vmem [#allocation8], %s7054_s16 }
 0x108   : > { %8210 = dma.done.wait (%p8611_p2), %s590_s4, 384  }
 0x109   : > { %8212 = vsyncadd (%p8611_p2), %s590_s4, 4294966912  ;;  %p9557_p3 = scmp.eq.s32.totalorder %s8387_s0, 0 }
 0x10b   : > { %8214 = dma.done.wait (%p9557_p3), [#allocation12], 18432   ;;  %p9558_p6 = pmov %p9557_p3 }
 0x10c   : > { %p9559_p4 = pmov %p9557_p3 }
 0x10d   : > { %8216 = vsyncadd (%p9558_p6), [#allocation12], 4294948864 }
 0x10e   : > { %8218 = dma.done.wait (%p9559_p4), [#allocation15], 28672   ;;  %p9560_p11 = pmov %p9557_p3 }
 0x10f   : > { %p9561_p12 = pmov %p9557_p3 }
 0x110   : > { %8220 = vsyncadd (%p9560_p11), [#allocation15], 4294938624 }
 0x111   : > { %8222 = dma.done.wait (%p9561_p12), [#allocation18], 24576   ;;  %p9562_p13 = pmov %p9557_p3 }
 0x112   : > { %p9563_p2 = pmov %p9557_p3 }
 0x113   : > { %8224 = vsyncadd (%p9562_p13), [#allocation18], 4294942720 }
 0x114   : > { %8226 = dma.done.wait (%p9563_p2), [#allocation21], 20480   ;;  %p9564_p0 = pmov %p9563_p2 }
 0x115   : > { %v8269_v0 = vmov 0   ;;  %v7199_v1 = vld [vmem:[#allocation11 + $0x4] ss:$12 sps:$4 sm:$0xff]   ;;  %v7203_v3 = vld [vmem:[#allocation11] ss:$12 sps:$4 sm:$0xff]   ;;  %vm8271_vm0 = vmmov 0  }
 0x116   : > { %8228 = vsyncadd (%p9564_p0), [#allocation21], 4294946816  ;;  %1264 = vmatprep.mubr.bf16.mxu1 %v8269_v0  ;;  %v7201_v2 = vld [vmem:[#allocation11 + $0x184] ss:$12 sps:$4 sm:$0xff]   ;;  %1189 = vmatprep.subr.bf16.mxu0 %v7199_v1  ;;  %v7204_v4 = vld [vmem:[#allocation11 + $0x180] ss:$12 sps:$4 sm:$0xff]  }
 0x117   : > { %1232 = vmatprep.subr.bf16.mxu1 %v7201_v2  ;;  %v7205_v5 = vld [vmem:[#allocation11 + $0x1c] ss:$12 sps:$4 sm:$0xff]   ;;  %1190 = vmatpush1.bf16.msra.mxu0 %v7203_v3  ;;  %v7209_v7 = vld [vmem:[#allocation11 + $0x18] ss:$12 sps:$4 sm:$0xff]   ;;  %v7211_v9 = vld [vmem:[#allocation11 + $0x34] ss:$12 sps:$4 sm:$0xff]  }
 0x118   : > { %1233 = vmatpush1.bf16.msra.mxu1 %v7204_v4  ;;  %v7207_v6 = vld [vmem:[#allocation11 + $0x19c] ss:$12 sps:$4 sm:$0xff]   ;;  %1191 = vmatprep.subr.bf16.mxu0 %v7205_v5  ;;  %v7210_v8 = vld [vmem:[#allocation11 + $0x198] ss:$12 sps:$4 sm:$0xff]   ;;  %v7213_v10 = vld [vmem:[#allocation11 + $0x1b4] ss:$12 sps:$4 sm:$0xff]  }
 0x119   : > { %1234 = vmatprep.subr.bf16.mxu1 %v7207_v6  ;;  %v7215_v11 = vld [vmem:[#allocation11 + $0x30] ss:$12 sps:$4 sm:$0xff]   ;;  %v7217_v13 = vld [vmem:[#allocation11 + $0x4c] ss:$12 sps:$4 sm:$0xff]   ;;  %v7221_v15 = vld [vmem:[#allocation11 + $0x48] ss:$12 sps:$4 sm:$0xff]  }
 0x11a   : > { %v7216_v12 = vld [vmem:[#allocation11 + $0x1b0] ss:$12 sps:$4 sm:$0xff]   ;;  %v7219_v14 = vld [vmem:[#allocation11 + $0x1cc] ss:$12 sps:$4 sm:$0xff]   ;;  %v7222_v16 = vld [vmem:[#allocation11 + $0x1c8] ss:$12 sps:$4 sm:$0xff]  }
 0x11b   : > { %1192 = vmatpush1.bf16.msra.mxu0 %v7209_v7  ;;  %v7223_v17 = vld [vmem:[#allocation11 + $0x64] ss:$12 sps:$4 sm:$0xff]   ;;  %v7227_v19 = vld [vmem:[#allocation11 + $0x60] ss:$12 sps:$4 sm:$0xff]   ;;  %v7229_v21 = vld [vmem:[#allocation11 + $0x7c] ss:$12 sps:$4 sm:$0xff]  }
 0x11c   : > { %1235 = vmatpush1.bf16.msra.mxu1 %v7210_v8  ;;  %1193 = vmatprep.subr.bf16.mxu0 %v7211_v9  ;;  %v7225_v18 = vld [vmem:[#allocation11 + $0x1e4] ss:$12 sps:$4 sm:$0xff]   ;;  %v7228_v20 = vld [vmem:[#allocation11 + $0x1e0] ss:$12 sps:$4 sm:$0xff]   ;;  %v7231_v22 = vld [vmem:[#allocation11 + $0x1fc] ss:$12 sps:$4 sm:$0xff]  }
 0x11d   : > { %1236 = vmatprep.subr.bf16.mxu1 %v7213_v10  ;;  %v7233_v23 = vld [vmem:[#allocation11 + $0x78] ss:$12 sps:$4 sm:$0xff]   ;;  %v7235_v25 = vld [vmem:[#allocation11 + $0x94] ss:$12 sps:$4 sm:$0xff]   ;;  %v7239_v27 = vld [vmem:[#allocation11 + $0x90] ss:$12 sps:$4 sm:$0xff]  }
 0x11e   : > { %v7234_v24 = vld [vmem:[#allocation11 + $0x1f8] ss:$12 sps:$4 sm:$0xff]   ;;  %v7237_v26 = vld [vmem:[#allocation11 + $0x214] ss:$12 sps:$4 sm:$0xff]   ;;  %v7240_v28 = vld [vmem:[#allocation11 + $0x210] ss:$12 sps:$4 sm:$0xff]  }
 0x11f   : > { %1194 = vmatpush1.bf16.msra.mxu0 %v7215_v11  ;;  %v7241_v29 = vld [vmem:[#allocation11 + $0xac] ss:$12 sps:$4 sm:$0xff]   ;;  %v7245_v31 = vld [vmem:[#allocation11 + $0xa8] ss:$12 sps:$4 sm:$0xff]   ;;  %v7247_v33 = vld [vmem:[#allocation11 + $0xc4] ss:$12 sps:$4 sm:$0xff]  }
 0x120   : > { %1237 = vmatpush1.bf16.msra.mxu1 %v7216_v12  ;;  %1195 = vmatprep.subr.bf16.mxu0 %v7217_v13  ;;  %v7243_v30 = vld [vmem:[#allocation11 + $0x22c] ss:$12 sps:$4 sm:$0xff]   ;;  %v7246_v32 = vld [vmem:[#allocation11 + $0x228] ss:$12 sps:$4 sm:$0xff]   ;;  %v7261_v44 = vld [vmem:[#allocation11 + $0xf0] ss:$12 sps:$4 sm:$0xff]  }
 0x121   : > { %1238 = vmatprep.subr.bf16.mxu1 %v7219_v14  ;;  %v8685_v34 = vld [vmem:[%s8661_s20 + $0x8] ss:$12 sps:$4 sm:$0xff]   ;;  %v7250_v35 = vld [vmem:[#allocation11 + $0xc8] ss:$12 sps:$4 sm:$0xff]   ;;  %v7251_v36 = vld [vmem:[#allocation11 + $0xc0] ss:$12 sps:$4 sm:$0xff]  }
 0x122   : > { %v7252_v37 = vld [vmem:[#allocation11 + $0x8] ss:$12 sps:$4 sm:$0xff]   ;;  %v7255_v39 = vld [vmem:[#allocation11 + $0xe0] ss:$12 sps:$4 sm:$0xff]   ;;  %v7256_v40 = vld [vmem:[#allocation11 + $0xd8] ss:$12 sps:$4 sm:$0xff]  }
 0x123   : > { %1196 = vmatpush1.bf16.msra.mxu0 %v7221_v15  ;;  %v7253_v38 = vld [vmem:[#allocation11 + $0xdc] ss:$12 sps:$4 sm:$0xff]   ;;  %v7257_v41 = vld [vmem:[#allocation11 + $0x20] ss:$12 sps:$4 sm:$0xff]   ;;  %v7260_v43 = vld [vmem:[#allocation11 + $0xf8] ss:$12 sps:$4 sm:$0xff]  }
 0x124   : > { %1239 = vmatpush1.bf16.msra.mxu1 %v7222_v16  ;;  %1197 = vmatprep.subr.bf16.mxu0 %v7223_v17  ;;  %v7258_v42 = vld [vmem:[#allocation11 + $0xf4] ss:$12 sps:$4 sm:$0xff]   ;;  %v7262_v45 = vld [vmem:[#allocation11 + $0x38] ss:$12 sps:$4 sm:$0xff]   ;;  %v7265_v47 = vld [vmem:[#allocation11 + $0x110] ss:$12 sps:$4 sm:$0xff]  }
 0x125   : > { %1240 = vmatprep.subr.bf16.mxu1 %v7225_v18  ;;  %v7263_v46 = vld [vmem:[#allocation11 + $0x10c] ss:$12 sps:$4 sm:$0xff]   ;;  %v7266_v48 = vld [vmem:[#allocation11 + $0x108] ss:$12 sps:$4 sm:$0xff]   ;;  %v7267_v49 = vld [vmem:[#allocation11 + $0x50] ss:$12 sps:$4 sm:$0xff]  }
 0x126   : > { %v7268_v50 = vld [vmem:[#allocation11 + $0x124] ss:$12 sps:$4 sm:$0xff]   ;;  %v7270_v51 = vld [vmem:[#allocation11 + $0x128] ss:$12 sps:$4 sm:$0xff]   ;;  %v7271_v52 = vld [vmem:[#allocation11 + $0x120] ss:$12 sps:$4 sm:$0xff]  }
 0x127   : > { %1198 = vmatpush1.bf16.msra.mxu0 %v7227_v19  ;;  %v7272_v53 = vld [vmem:[#allocation11 + $0x68] ss:$12 sps:$4 sm:$0xff]   ;;  %v7275_v55 = vld [vmem:[#allocation11 + $0x140] ss:$12 sps:$4 sm:$0xff]   ;;  %v7276_v57 = vld [vmem:[#allocation11 + $0x138] ss:$12 sps:$4 sm:$0xff]  }
 0x128   : > { %1241 = vmatpush1.bf16.msra.mxu1 %v7228_v20  ;;  %1199 = vmatprep.subr.bf16.mxu0 %v7229_v21  ;;  %v7273_v54 = vld [vmem:[#allocation11 + $0x13c] ss:$12 sps:$4 sm:$0xff]   ;;  %v8689_v56 = vld [vmem:[%s8661_s20 + $0x4] ss:$12 sps:$4 sm:$0xff]   ;;  %v9484_v8 = vmov 0.0   ;;  %s9621_s9 = sld [smem:[#allocation78_spill]] }
 0x129   : > { %1242 = vmatprep.subr.bf16.mxu1 %v7231_v22  ;;  %v7277_v58 = vld [vmem:[#allocation11 + $0x80] ss:$12 sps:$4 sm:$0xff]   ;;  %1221 = vmatprep.mubr.bf16.mxu0 %v8689_v56  ;;  %v7280_v60 = vld [vmem:[#allocation11 + $0x158] ss:$12 sps:$4 sm:$0xff]   ;;  %v7281_v61 = vld [vmem:[#allocation11 + $0x150] ss:$12 sps:$4 sm:$0xff]  }
 0x12a   : > { %v7278_v59 = vld [vmem:[#allocation11 + $0x154] ss:$12 sps:$4 sm:$0xff]   ;;  %v7282_v62 = vld [vmem:[#allocation11 + $0x98] ss:$12 sps:$4 sm:$0xff]   ;;  %v7285_v1 = vld [vmem:[#allocation11 + $0x170] ss:$12 sps:$4 sm:$0xff]  }
 0x12b   : > { %1200 = vmatpush1.bf16.msra.mxu0 %v7233_v23  ;;  %v7283_v63 = vld [vmem:[#allocation11 + $0x16c] ss:$12 sps:$4 sm:$0xff]   ;;  %v7286_v2 = vld [vmem:[#allocation11 + $0x168] ss:$12 sps:$4 sm:$0xff]   ;;  %v7287_v3 = vld [vmem:[#allocation11 + $0xb0] ss:$12 sps:$4 sm:$0xff]  }
 0x12c   : > { %1243 = vmatpush1.bf16.msra.mxu1 %v7234_v24  ;;  %1201 = vmatprep.subr.bf16.mxu0 %v7235_v25  ;;  %v7291_v4 = vld [vmem:[#allocation13 + $0xc8] ss:$12 sps:$4 sm:$0xff]   ;;  %v7294_v9 = vld [vmem:[#allocation13 + $0xe0] ss:$12 sps:$4 sm:$0xff]   ;;  %v7297_v12 = vld [vmem:[#allocation13 + $0xf8] ss:$12 sps:$4 sm:$0xff]  }
 0x12d   : > { %1244 = vmatprep.subr.bf16.mxu1 %v7237_v26  ;;  %v8694_v5 = vld [vmem:[%s8661_s20] ss:$12 sps:$4 sm:$0xff]   ;;  %v7295_v10 = vld [vmem:[#allocation11 + $0x1a0] ss:$12 sps:$4 sm:$0xff]   ;;  %v7298_v13 = vld [vmem:[#allocation11 + $0x1b8] ss:$12 sps:$4 sm:$0xff]  }
 0x12e   : > { %v7292_v6 = vld [vmem:[#allocation11 + $0x188] ss:$12 sps:$4 sm:$0xff]   ;;  %v7296_v11 = vld [vmem:[#allocation13 + $0x20] ss:$12 sps:$4 sm:$0xff]   ;;  %v7299_v14 = vld [vmem:[#allocation13 + $0x38] ss:$12 sps:$4 sm:$0xff]  }
 0x12f   : > { %1202 = vmatpush1.bf16.msra.mxu0 %v7239_v27  ;;  %v7293_v7 = vld [vmem:[#allocation13 + $0x8] ss:$12 sps:$4 sm:$0xff]   ;;  %v7300_v15 = vld [vmem:[#allocation13 + $0x110] ss:$12 sps:$4 sm:$0xff]   ;;  %v7306_v21 = vld [vmem:[#allocation13 + $0x140] ss:$12 sps:$4 sm:$0xff]  }
 0x130   : > { %1245 = vmatpush1.bf16.msra.mxu1 %v7240_v28  ;;  %1203 = vmatprep.subr.bf16.mxu0 %v7241_v29  ;;  %v7301_v16 = vld [vmem:[#allocation11 + $0x1d0] ss:$12 sps:$4 sm:$0xff]   ;;  %v7303_v18 = vld [vmem:[#allocation13 + $0x128] ss:$12 sps:$4 sm:$0xff]   ;;  %v7307_v22 = vld [vmem:[#allocation11 + $0x200] ss:$12 sps:$4 sm:$0xff]  }
 0x131   : > { %1246 = vmatprep.subr.bf16.mxu1 %v7243_v30  ;;  %v7302_v17 = vld [vmem:[#allocation13 + $0x50] ss:$12 sps:$4 sm:$0xff]   ;;  %v7304_v19 = vld [vmem:[#allocation11 + $0x1e8] ss:$12 sps:$4 sm:$0xff]   ;;  %v7308_v23 = vld [vmem:[#allocation13 + $0x80] ss:$12 sps:$4 sm:$0xff]  }
 0x132   : > { %v7305_v20 = vld [vmem:[#allocation13 + $0x68] ss:$12 sps:$4 sm:$0xff]   ;;  %v7309_v24 = vld [vmem:[#allocation13 + $0x158] ss:$12 sps:$4 sm:$0xff]   ;;  %v7312_v27 = vld [vmem:[#allocation13 + $0x170] ss:$12 sps:$4 sm:$0xff]  }
 0x133   : > { %1204 = vmatpush1.bf16.msra.mxu0 %v7245_v31  ;;  %v7310_v25 = vld [vmem:[#allocation11 + $0x218] ss:$12 sps:$4 sm:$0xff]   ;;  %v7313_v28 = vld [vmem:[#allocation11 + $0x230] ss:$12 sps:$4 sm:$0xff]   ;;  %v7315_v31 = vld [vmem:[#allocation13] ss:$12 sps:$4 sm:$0xff]  }
 0x134   : > { %1247 = vmatpush1.bf16.msra.mxu1 %v7246_v32  ;;  %1205 = vmatprep.subr.bf16.mxu0 %v7247_v33  ;;  %v7311_v26 = vld [vmem:[#allocation13 + $0x98] ss:$12 sps:$4 sm:$0xff]   ;;  %v7314_v29 = vld [vmem:[#allocation13 + $0xb0] ss:$12 sps:$4 sm:$0xff]   ;;  %v7318_v32 = vld [vmem:[#allocation13 + $0x188] ss:$12 sps:$4 sm:$0xff]  }
 0x135   : > { %6354 = vmatprep.subr.bf16.mxu1 %v7250_v35  ;;  %v7317_v30 = vld [vmem:[#allocation13 + $0x4] ss:$12 sps:$4 sm:$0xff]   ;;  %v7321_v33 = vld [vmem:[#allocation13 + $0x1c] ss:$12 sps:$4 sm:$0xff]   ;;  %s9633_s27 = sld [smem:[#allocation80_spill]]  ;;  %s9634_s29 = sld [smem:[#allocation81_spill]] }
 0x136   : > { %v7319_v35 = vld [vmem:[#allocation13 + $0x18] ss:$12 sps:$4 sm:$0xff]   ;;  %s9661_s19 = sld [smem:[#allocation82_spill]]  ;;  %p9662_p5 = scmp.ne.s32.totalorder %s8387_s0, 0 }
 0x137   : > { %1265 = vmatmul.mubr.bf16.vlgmr.msra.gmra.mrb[0].mxu1 %v8685_v34  ;;  %1206 = vmatpush1.bf16.msra.mxu0 %v7251_v36  ;;  %v7322_v36 = vld [vmem:[#allocation13 + $0x1a0] ss:$12 sps:$4 sm:$0xff]  }
 0x138   : > { %6355 = vmatpush3.bf16.msra.mxu1 %v7252_v37  ;;  %1207 = vmatprep.subr.bf16.mxu0 %v7253_v38  ;;  %v7325_v37 = vld [vmem:[#allocation13 + $0x34] ss:$12 sps:$4 sm:$0xff]   ;;  %v7323_v38 = vld [vmem:[#allocation13 + $0x30] ss:$12 sps:$4 sm:$0xff]  }
 0x139   : > { %6356 = vmatprep.subr.bf16.mxu1 %v7255_v39  ;;  %1307 = vmatprep.mubr.bf16.mxu1 %v8689_v56  ;;  %v7326_v39 = vld [vmem:[#allocation13 + $0x1b8] ss:$12 sps:$4 sm:$0xff]  }
 0x13b   : > { %1208 = vmatpush1.bf16.msra.mxu0 %v7256_v40  ;;  %v7329_v40 = vld [vmem:[#allocation13 + $0x4c] ss:$12 sps:$4 sm:$0xff]  }
 0x13c   : > { %6357 = vmatpush3.bf16.msra.mxu1 %v7257_v41  ;;  %1209 = vmatprep.subr.bf16.mxu0 %v7258_v42  ;;  %v7327_v41 = vld [vmem:[#allocation13 + $0x48] ss:$12 sps:$4 sm:$0xff]   ;;  %v7330_v42 = vld [vmem:[#allocation13 + $0x1d0] ss:$12 sps:$4 sm:$0xff]  }
 0x13d   : > { %6358 = vmatprep.subr.bf16.mxu1 %v7260_v43  ;;  %v7333_v43 = vld [vmem:[#allocation13 + $0x64] ss:$12 sps:$4 sm:$0xff]  }
 0x13f   : > { %1210 = vmatpush1.bf16.msra.mxu0 %v7261_v44  ;;  %v7331_v44 = vld [vmem:[#allocation13 + $0x60] ss:$12 sps:$4 sm:$0xff]  }
 0x140   : > { %6359 = vmatpush3.bf16.msra.mxu1 %v7262_v45  ;;  %1211 = vmatprep.subr.bf16.mxu0 %v7263_v46  ;;  %v7334_v45 = vld [vmem:[#allocation13 + $0x1e8] ss:$12 sps:$4 sm:$0xff]  }
 0x141   : > { %6360 = vmatprep.subr.bf16.mxu1 %v7265_v47  ;;  %v7337_v46 = vld [vmem:[#allocation13 + $0x7c] ss:$12 sps:$4 sm:$0xff]   ;;  %v7335_v47 = vld [vmem:[#allocation13 + $0x78] ss:$12 sps:$4 sm:$0xff]  }
 0x143   : > { %1212 = vmatpush1.bf16.msra.mxu0 %v7266_v48  ;;  %v7338_v48 = vld [vmem:[#allocation13 + $0x200] ss:$12 sps:$4 sm:$0xff]  }
 0x144   : > { %6361 = vmatpush3.bf16.msra.mxu1 %v7267_v49  ;;  %1213 = vmatprep.subr.bf16.mxu0 %v7268_v50  ;;  %v7341_v49 = vld [vmem:[#allocation13 + $0x94] ss:$12 sps:$4 sm:$0xff]   ;;  %v7339_v50 = vld [vmem:[#allocation13 + $0x90] ss:$12 sps:$4 sm:$0xff]  }
 0x145   : > { %6362 = vmatprep.subr.bf16.mxu1 %v7270_v51  ;;  %v7342_v51 = vld [vmem:[#allocation13 + $0x218] ss:$12 sps:$4 sm:$0xff]  }
 0x147   : > { %1214 = vmatpush1.bf16.msra.mxu0 %v7271_v52  ;;  %v7345_v52 = vld [vmem:[#allocation13 + $0xac] ss:$12 sps:$4 sm:$0xff]  }
 0x148   : > { %6363 = vmatpush3.bf16.msra.mxu1 %v7272_v53  ;;  %1215 = vmatprep.subr.bf16.mxu0 %v7273_v54  ;;  %v2035_v53 = vld [vmem:[#allocation14 + $0x8] sm:$0xff]  ;;  %v2041_v54 = vld [vmem:[#allocation14 + $0x38] sm:$0xff] }
 0x149   : > { %6364 = vmatprep.subr.bf16.mxu1 %v7275_v55  ;;  %v7343_v55 = vld [vmem:[#allocation13 + $0xa8] ss:$12 sps:$4 sm:$0xff]  }
 0x14b   : > { %1216 = vmatpush1.bf16.msra.mxu0 %v7276_v57  ;;  %v7349_v57 = vld [vmem:[#allocation13 + $0xc4] ss:$12 sps:$4 sm:$0xff]  }
 0x14c   : > { %6365 = vmatpush3.bf16.msra.mxu1 %v7277_v58  ;;  %1217 = vmatprep.subr.bf16.mxu0 %v7278_v59  ;;  %v2034_v58 = vld [vmem:[#allocation14] sm:$0xff]  ;;  %v8722_v59 = vpack.c.bf16 %v2041_v54, %v2035_v53 }
 0x14d   : > { %6366 = vmatprep.subr.bf16.mxu1 %v7280_v60  ;;  %v2040_v60 = vld [vmem:[#allocation14 + $0x30] sm:$0xff]  ;;  %v2118_v54 = vld [vmem:[#allocation14 + $0x2a0] sm:$0xff] }
 0x14f   : > { %1218 = vmatpush1.bf16.msra.mxu0 %v7281_v61  ;;  %v2047_v61 = vld [vmem:[#allocation14 + $0x68] sm:$0xff] }
 0x150   : > { %6367 = vmatpush3.bf16.msra.mxu1 %v7282_v62  ;;  %1219 = vmatprep.subr.bf16.mxu0 %v7283_v63  ;;  %v2053_v62 = vld [vmem:[#allocation14 + $0x98] sm:$0xff]  ;;  %v7347_v63 = vld [vmem:[#allocation13 + $0xc0] ss:$12 sps:$4 sm:$0xff]  }
 0x151   : > { %6368 = vmatprep.subr.bf16.mxu1 %v7285_v1  ;;  %v8724_v1 = vpack.c.bf16 %v2040_v60, %v2034_v58  ;;  %v7368_v58 = vld [vmem:[#allocation13 + $0x168] ss:$12 sps:$4 sm:$0xff]  }
 0x153   : > { %1220 = vmatpush1.bf16.msra.mxu0 %v7286_v2  ;;  %v7352_v2 = vld [vmem:[#allocation13 + $0xdc] ss:$12 sps:$4 sm:$0xff]  }
 0x154   : > { %6369 = vmatpush3.bf16.msra.mxu1 %v7287_v3  ;;  %6385 = vmatprep.subr.bf16.mxu0 %v7291_v4  ;;  %v8727_v3 = vpack.c.bf16 %v2053_v62, %v2047_v61  ;;  %v2046_v4 = vld [vmem:[#allocation14 + $0x60] sm:$0xff] }
 0x155   : > { %6460 = vmatprep.subr.bf16.mxu1 %v9484_v8  ;;  %v7373_v61 = vld [vmem:[#allocation13 + $0x184] ss:$12 sps:$4 sm:$0xff]  }
 0x156   : > { %1222 = vmatmul.mubr.bf16.vlgmr.msra.gmra.mrb[0].mxu0 %v8694_v5 }
 0x157   : > { %1308 = vmatmul.mubr.bf16.vlgmr.msra.gmra.mrb[4].mxu1 %v8694_v5  ;;  %6386 = vmatpush3.bf16.msra.mxu0 %v7293_v7  ;;  %v2059_v7 = vld [vmem:[#allocation14 + $0xc8] sm:$0xff] }
 0x158   : > { %6461 = vmatpush3.bf16.msra.mxu1 %v7292_v6  ;;  %6387 = vmatprep.subr.bf16.mxu0 %v7294_v9  ;;  %v2052_v6 = vld [vmem:[#allocation14 + $0x90] sm:$0xff]  ;;  %v2065_v9 = vld [vmem:[#allocation14 + $0xf8] sm:$0xff] }
 0x159   : > { %6462 = vmatprep.subr.bf16.mxu1 %v9484_v8  ;;  %6476 = vmatprep.mubr.msk.bf16.mxu1 %vm8271_vm0, %v9484_v8 }
 0x15a   : > { %1978 = vmatprep.mubr.bf16.mxu0 %v8689_v56 }
 0x15b   : > { %6388 = vmatpush3.bf16.msra.mxu0 %v7296_v11  ;;  %v8731_v11 = vpack.c.bf16 %v2052_v6, %v2046_v4  ;;  %v2143_v4 = vld [vmem:[#allocation14 + $0x368] sm:$0xff]  ;;  %v2149_v6 = vld [vmem:[#allocation14 + $0x398] sm:$0xff] }
 0x15c   : > { %6463 = vmatpush3.bf16.msra.mxu1 %v7295_v10  ;;  %6389 = vmatprep.subr.bf16.mxu0 %v7297_v12  ;;  %v7350_v10 = vld [vmem:[#allocation13 + $0xd8] ss:$12 sps:$4 sm:$0xff]   ;;  %v7355_v12 = vld [vmem:[#allocation13 + $0xf4] ss:$12 sps:$4 sm:$0xff]  }
 0x15d   : > { %6464 = vmatprep.subr.bf16.mxu1 %v9484_v8 }
 0x15f   : > { %6390 = vmatpush3.bf16.msra.mxu0 %v7299_v14  ;;  %v8734_v14 = vpack.c.bf16 %v2065_v9, %v2059_v7  ;;  %v7371_v7 = vld [vmem:[#allocation13 + $0x180] ss:$12 sps:$4 sm:$0xff]  }
 0x160   : > { %6465 = vmatpush3.bf16.msra.mxu1 %v7298_v13  ;;  %6391 = vmatprep.subr.bf16.mxu0 %v7300_v15  ;;  %v2058_v13 = vld [vmem:[#allocation14 + $0xc0] sm:$0xff]  ;;  %v2064_v15 = vld [vmem:[#allocation14 + $0xf0] sm:$0xff] }
 0x161   : > { %6466 = vmatprep.subr.bf16.mxu1 %v9484_v8 }
 0x163   : > { %6392 = vmatpush3.bf16.msra.mxu0 %v7302_v17  ;;  %v2077_v17 = vld [vmem:[#allocation14 + $0x158] sm:$0xff] }
 0x164   : > { %6467 = vmatpush3.bf16.msra.mxu1 %v7301_v16  ;;  %6393 = vmatprep.subr.bf16.mxu0 %v7303_v18  ;;  %v2071_v16 = vld [vmem:[#allocation14 + $0x128] sm:$0xff]  ;;  %v8738_v18 = vpack.c.bf16 %v2064_v15, %v2058_v13  ;;  %v2142_v13 = vld [vmem:[#allocation14 + $0x360] sm:$0xff]  ;;  %v2148_v15 = vld [vmem:[#allocation14 + $0x390] sm:$0xff] }
 0x165   : > { %6468 = vmatprep.subr.bf16.mxu1 %v9484_v8 }
 0x167   : > { %6394 = vmatpush3.bf16.msra.mxu0 %v7305_v20  ;;  %v8741_v20 = vpack.c.bf16 %v2077_v17, %v2071_v16  ;;  %v2155_v16 = vld [vmem:[#allocation14 + $0x3c8] sm:$0xff]  ;;  %v2161_v17 = vld [vmem:[#allocation14 + $0x3f8] sm:$0xff] }
 0x168   : > { %6469 = vmatpush3.bf16.msra.mxu1 %v7304_v19  ;;  %6395 = vmatprep.subr.bf16.mxu0 %v7306_v21  ;;  %v7358_v19 = vld [vmem:[#allocation13 + $0x10c] ss:$12 sps:$4 sm:$0xff]   ;;  %v2070_v21 = vld [vmem:[#allocation14 + $0x120] sm:$0xff] }
 0x169   : > { %6470 = vmatprep.subr.bf16.mxu1 %v9484_v8 }
 0x16b   : > { %6396 = vmatpush3.bf16.msra.mxu0 %v7308_v23  ;;  %v2083_v23 = vld [vmem:[#allocation14 + $0x188] sm:$0xff] }
 0x16c   : > { %6471 = vmatpush3.bf16.msra.mxu1 %v7307_v22  ;;  %6397 = vmatprep.subr.bf16.mxu0 %v7309_v24  ;;  %v2076_v22 = vld [vmem:[#allocation14 + $0x150] sm:$0xff]  ;;  %v2089_v24 = vld [vmem:[#allocation14 + $0x1b8] sm:$0xff] }
 0x16d   : > { %6472 = vmatprep.subr.bf16.mxu1 %v9484_v8 }
 0x16f   : > { %6398 = vmatpush3.bf16.msra.mxu0 %v7311_v26  ;;  %v8744_v26 = vpack.c.bf16 %v2076_v22, %v2070_v21  ;;  %v7379_v21 = vld [vmem:[#allocation13 + $0x1b4] ss:$12 sps:$4 sm:$0xff]   ;;  %v8784_v22 = vpack.c.bf16 %v2161_v17, %v2155_v16 }
 0x170   : > { %6473 = vmatpush3.bf16.msra.mxu1 %v7310_v25  ;;  %6399 = vmatprep.subr.bf16.mxu0 %v7312_v27  ;;  %v7356_v25 = vld [vmem:[#allocation13 + $0x108] ss:$12 sps:$4 sm:$0xff]   ;;  %v7361_v27 = vld [vmem:[#allocation13 + $0x124] ss:$12 sps:$4 sm:$0xff]  }
 0x171   : > { %6474 = vmatprep.subr.bf16.mxu1 %v9484_v8  ;;  %v2214_v16 = vld [vmem:[#allocation14 + $0x5a0] sm:$0xff]  ;;  %v2220_v17 = vld [vmem:[#allocation14 + $0x5d0] sm:$0xff] }
 0x173   : > { %6400 = vmatpush3.bf16.msra.mxu0 %v7314_v29  ;;  %v2082_v29 = vld [vmem:[#allocation14 + $0x180] sm:$0xff] }
 0x174   : > { %6475 = vmatpush3.bf16.msra.mxu1 %v7313_v28  ;;  %6480 = vmatprep.subr.bf16.mxu0 %v9484_v8  ;;  %v8747_v28 = vpack.c.bf16 %v2089_v24, %v2083_v23  ;;  %v2154_v23 = vld [vmem:[#allocation14 + $0x3c0] sm:$0xff]  ;;  %v2160_v24 = vld [vmem:[#allocation14 + $0x3f0] sm:$0xff] }
 0x175   : > { %1860 = vmatprep.subr.bf16.mxu1 %v7317_v30  ;;  %v2088_v30 = vld [vmem:[#allocation14 + $0x1b0] sm:$0xff] }
 0x176   : > { %1979 = vmatmul.mubr.bf16.vlgmr.msra.gmra.mrb[4].mxu0 %v8694_v5 }
 0x177   : > { %6477 = vmatmul.mubr.bf16.vlgmr.msra.gmra.mrb[8].mxu1 %v8685_v34  ;;  %6481 = vmatpush3.bf16.msra.mxu0 %v7318_v32  ;;  %v2101_v32 = vld [vmem:[#allocation14 + $0x218] sm:$0xff] }
 0x178   : > { %1861 = vmatpush1.bf16.msra.mxu1 %v7315_v31  ;;  %6482 = vmatprep.subr.bf16.mxu0 %v9484_v8  ;;  %v2095_v31 = vld [vmem:[#allocation14 + $0x1e8] sm:$0xff] }
 0x179   : > { %1862 = vmatprep.subr.bf16.mxu1 %v7321_v33  ;;  %6496 = vmatprep.mubr.msk.bf16.mxu0 %vm8271_vm0, %v9484_v8  ;;  %v7359_v33 = vld [vmem:[#allocation13 + $0x120] ss:$12 sps:$4 sm:$0xff]  }
 0x17a   : > { %1892 = vmatprep.mubr.bf16.mxu1 %v8689_v56  ;;  %v7346_v56 = vld [vmem:[#allocation13 + $0x230] ss:$12 sps:$4 sm:$0xff]  }
 0x17b   : > { %6483 = vmatpush3.bf16.msra.mxu0 %v7322_v36  ;;  %v7364_v36 = vld [vmem:[#allocation13 + $0x13c] ss:$12 sps:$4 sm:$0xff]  }
 0x17c   : > { %1863 = vmatpush1.bf16.msra.mxu1 %v7319_v35  ;;  %6484 = vmatprep.subr.bf16.mxu0 %v9484_v8  ;;  %v8750_v35 = vpack.c.bf16 %v2088_v30, %v2082_v29  ;;  %v8788_v29 = vpack.c.bf16 %v2160_v24, %v2154_v23  ;;  %v7382_v30 = vld [vmem:[#allocation13 + $0x1cc] ss:$12 sps:$4 sm:$0xff]  }
 0x17d   : > { %1864 = vmatprep.subr.bf16.mxu1 %v7325_v37  ;;  %v8753_v37 = vpack.c.bf16 %v2101_v32, %v2095_v31  ;;  %v2166_v32 = vld [vmem:[#allocation14 + $0x420] sm:$0xff]  ;;  %v2043_v23 = vld [vmem:[#allocation14 + $0x48] sm:$0xff] }
 0x17e   : > { %9565 = vst [vmem:[#allocation30_spill] sm:$0xff] %v8788_v29  ;;  %v2039_v24 = vld [vmem:[#allocation14 + $0x28] sm:$0xff] }
 0x17f   : > { %6485 = vmatpush3.bf16.msra.mxu0 %v7326_v39  ;;  %v2100_v39 = vld [vmem:[#allocation14 + $0x210] sm:$0xff] }
 0x180   : > { %1865 = vmatpush1.bf16.msra.mxu1 %v7323_v38  ;;  %6486 = vmatprep.subr.bf16.mxu0 %v9484_v8  ;;  %v2094_v38 = vld [vmem:[#allocation14 + $0x1e0] sm:$0xff] }
 0x181   : > { %1866 = vmatprep.subr.bf16.mxu1 %v7329_v40  ;;  %v2107_v40 = vld [vmem:[#allocation14 + $0x248] sm:$0xff] }
 0x183   : > { %6487 = vmatpush3.bf16.msra.mxu0 %v7330_v42  ;;  %v7362_v42 = vld [vmem:[#allocation13 + $0x138] ss:$12 sps:$4 sm:$0xff]  }
 0x184   : > { %1867 = vmatpush1.bf16.msra.mxu1 %v7327_v41  ;;  %6488 = vmatprep.subr.bf16.mxu0 %v9484_v8  ;;  %v2113_v41 = vld [vmem:[#allocation14 + $0x278] sm:$0xff] }
 0x185   : > { %1868 = vmatprep.subr.bf16.mxu1 %v7333_v43  ;;  %v8756_v43 = vpack.c.bf16 %v2100_v39, %v2094_v38  ;;  %v2185_v38 = vld [vmem:[#allocation14 + $0x4b8] sm:$0xff] }
 0x187   : > { %6489 = vmatpush3.bf16.msra.mxu0 %v7334_v45  ;;  %v8759_v45 = vpack.c.bf16 %v2113_v41, %v2107_v40  ;;  %v7385_v40 = vld [vmem:[#allocation13 + $0x1e4] ss:$12 sps:$4 sm:$0xff]  }
 0x188   : > { %1869 = vmatpush1.bf16.msra.mxu1 %v7331_v44  ;;  %6490 = vmatprep.subr.bf16.mxu0 %v9484_v8  ;;  %v7367_v44 = vld [vmem:[#allocation13 + $0x154] ss:$12 sps:$4 sm:$0xff]  }
 0x189   : > { %1870 = vmatprep.subr.bf16.mxu1 %v7337_v46  ;;  %v2106_v46 = vld [vmem:[#allocation14 + $0x240] sm:$0xff] }
 0x18b   : > { %6491 = vmatpush3.bf16.msra.mxu0 %v7338_v48  ;;  %v2119_v48 = vld [vmem:[#allocation14 + $0x2a8] sm:$0xff] }
 0x18c   : > { %1871 = vmatpush1.bf16.msra.mxu1 %v7335_v47  ;;  %6492 = vmatprep.subr.bf16.mxu0 %v9484_v8  ;;  %v2112_v47 = vld [vmem:[#allocation14 + $0x270] sm:$0xff] }
 0x18d   : > { %1872 = vmatprep.subr.bf16.mxu1 %v7341_v49  ;;  %v2125_v49 = vld [vmem:[#allocation14 + $0x2d8] sm:$0xff] }
 0x18e   : > { %v8765_v53 = vpack.c.bf16 %v2125_v49, %v2119_v48  ;;  %v7383_v48 = vld [vmem:[#allocation13 + $0x1e0] ss:$12 sps:$4 sm:$0xff]  }
 0x18f   : > { %6493 = vmatpush3.bf16.msra.mxu0 %v7342_v51  ;;  %v8762_v51 = vpack.c.bf16 %v2112_v47, %v2106_v46  ;;  %v2191_v46 = vld [vmem:[#allocation14 + $0x4e8] sm:$0xff]  ;;  %v2197_v47 = vld [vmem:[#allocation14 + $0x518] sm:$0xff] }
 0x190   : > { %1873 = vmatpush1.bf16.msra.mxu1 %v7339_v50  ;;  %6494 = vmatprep.subr.bf16.mxu0 %v9484_v8  ;;  %v7365_v50 = vld [vmem:[#allocation13 + $0x150] ss:$12 sps:$4 sm:$0xff]  }
 0x191   : > { %1874 = vmatprep.subr.bf16.mxu1 %v7345_v52  ;;  %v7370_v52 = vld [vmem:[#allocation13 + $0x16c] ss:$12 sps:$4 sm:$0xff]  }
 0x193   : > { %6495 = vmatpush3.bf16.msra.mxu0 %v7346_v56  ;;  %v2131_v56 = vld [vmem:[#allocation14 + $0x308] sm:$0xff] }
 0x194   : > { %1875 = vmatpush1.bf16.msra.mxu1 %v7343_v55  ;;  %6501 = vmatprep.subr.bf16.mxu0 %v8722_v59  ;;  %v2124_v55 = vld [vmem:[#allocation14 + $0x2d0] sm:$0xff] }
 0x195   : > { %1876 = vmatprep.subr.bf16.mxu1 %v7349_v57  ;;  %v2137_v57 = vld [vmem:[#allocation14 + $0x338] sm:$0xff]  ;;  %v8768_v60 = vpack.c.bf16 %v2124_v55, %v2118_v54  ;;  %v2190_v54 = vld [vmem:[#allocation14 + $0x4e0] sm:$0xff]  ;;  %v2196_v55 = vld [vmem:[#allocation14 + $0x510] sm:$0xff] }
 0x196   : > { %6497 = vmatmul.mubr.bf16.vlgmr.msra.gmra.mrb[8].mxu0 %v8685_v34  ;;  %v7353_v34 = vld [vmem:[#allocation13 + $0xf0] ss:$12 sps:$4 sm:$0xff]   ;;  %v8771_v62 = vpack.c.bf16 %v2137_v57, %v2131_v56  ;;  %v7386_v56 = vld [vmem:[#allocation13 + $0x1f8] ss:$12 sps:$4 sm:$0xff]   ;;  %v2203_v57 = vld [vmem:[#allocation14 + $0x548] sm:$0xff] }
 0x197   : > { %6503 = vmatpush1.bf16.msra.mxu0 %v8724_v1  ;;  %2316 = vmatprep.mubr.f32.mxu0 %v9484_v8 }
 0x198   : > { %1877 = vmatpush1.bf16.msra.mxu1 %v7347_v63  ;;  %6505 = vmatprep.subr.bf16.mxu0 %v8727_v3  ;;  %v2130_v63 = vld [vmem:[#allocation14 + $0x300] sm:$0xff] }
 0x199   : > { %1878 = vmatprep.subr.bf16.mxu1 %v7352_v2  ;;  %v2136_v2 = vld [vmem:[#allocation14 + $0x330] sm:$0xff] }
 0x19a   : > { %v8774_v9 = vpack.c.bf16 %v2136_v2, %v2130_v63  ;;  %v2202_v63 = vld [vmem:[#allocation14 + $0x540] sm:$0xff]  ;;  %v2208_v2 = vld [vmem:[#allocation14 + $0x570] sm:$0xff] }
 0x19b   : > { %6507 = vmatpush1.bf16.msra.mxu0 %v8731_v11 }
 0x19c   : > { %1879 = vmatpush1.bf16.msra.mxu1 %v7350_v10  ;;  %6509 = vmatprep.subr.bf16.mxu0 %v8734_v14  ;;  %v7376_v10 = vld [vmem:[#allocation13 + $0x19c] ss:$12 sps:$4 sm:$0xff]  }
 0x19d   : > { %1880 = vmatprep.subr.bf16.mxu1 %v7355_v12  ;;  %v8777_v12 = vpack.c.bf16 %v2149_v6, %v2143_v4  ;;  %v8806_v4 = vpack.c.bf16 %v2196_v55, %v2190_v54  ;;  %v2215_v6 = vld [vmem:[#allocation14 + $0x5a8] sm:$0xff]  ;;  %v2048_v54 = vld [vmem:[#allocation14 + $0x70] sm:$0xff]  ;;  %v2054_v55 = vld [vmem:[#allocation14 + $0xa0] sm:$0xff] }
 0x19f   : > { %6511 = vmatpush1.bf16.msra.mxu0 %v8738_v18  ;;  %9571 = vst [vmem:[#allocation36_spill] sm:$0xff] %v8806_v4 }
 0x1a0   : > { %1881 = vmatpush1.bf16.msra.mxu1 %v7353_v34  ;;  %6513 = vmatprep.subr.bf16.mxu0 %v8741_v20  ;;  %v7374_v34 = vld [vmem:[#allocation13 + $0x198] ss:$12 sps:$4 sm:$0xff]  }
 0x1a1   : > { %1882 = vmatprep.subr.bf16.mxu1 %v7358_v19  ;;  %v8781_v19 = vpack.c.bf16 %v2148_v15, %v2142_v13  ;;  %v7389_v13 = vld [vmem:[#allocation13 + $0x210] ss:$12 sps:$4 sm:$0xff]   ;;  %v7394_v15 = vld [vmem:[#allocation13 + $0x22c] ss:$12 sps:$4 sm:$0xff]  }
 0x1a3   : > { %6515 = vmatpush1.bf16.msra.mxu0 %v8744_v26 }
 0x1a4   : > { %1883 = vmatpush1.bf16.msra.mxu1 %v7356_v25  ;;  %6517 = vmatprep.subr.bf16.mxu0 %v8747_v28  ;;  %v2167_v25 = vld [vmem:[#allocation14 + $0x428] sm:$0xff] }
 0x1a5   : > { %1884 = vmatprep.subr.bf16.mxu1 %v7361_v27  ;;  %v2173_v27 = vld [vmem:[#allocation14 + $0x458] sm:$0xff] }
 0x1a6   : > { %v8791_v31 = vpack.c.bf16 %v2173_v27, %v2167_v25  ;;  %v7392_v27 = vld [vmem:[#allocation13 + $0x228] ss:$12 sps:$4 sm:$0xff]  }
 0x1a7   : > { %6519 = vmatpush1.bf16.msra.mxu0 %v8750_v35 }
 0x1a8   : > { %1885 = vmatpush1.bf16.msra.mxu1 %v7359_v33  ;;  %6521 = vmatprep.subr.bf16.mxu0 %v8753_v37  ;;  %9566 = vst [vmem:[#allocation31_spill] sm:$0xff] %v8791_v31  ;;  %v2172_v33 = vld [vmem:[#allocation14 + $0x450] sm:$0xff] }
 0x1a9   : > { %1886 = vmatprep.subr.bf16.mxu1 %v7364_v36  ;;  %v2179_v36 = vld [vmem:[#allocation14 + $0x488] sm:$0xff]  ;;  %v8794_v39 = vpack.c.bf16 %v2172_v33, %v2166_v32  ;;  %v2042_v32 = vld [vmem:[#allocation14 + $0x40] sm:$0xff] }
 0x1aa   : > { %v8797_v41 = vpack.c.bf16 %v2185_v38, %v2179_v36  ;;  %v2038_v33 = vld [vmem:[#allocation14 + $0x20] sm:$0xff]  ;;  %v2044_v36 = vld [vmem:[#allocation14 + $0x50] sm:$0xff]  ;;  %v8818_v38 = vpack.c.bf16 %v2220_v17, %v2214_v16 }
 0x1ab   : > { %6523 = vmatpush1.bf16.msra.mxu0 %v8756_v43  ;;  %9567 = vst [vmem:[#allocation32_spill] sm:$0xff] %v8794_v39  ;;  %v2060_v17 = vld [vmem:[#allocation14 + $0xd0] sm:$0xff] }
 0x1ac   : > { %1887 = vmatpush1.bf16.msra.mxu1 %v7362_v42  ;;  %6525 = vmatprep.subr.bf16.mxu0 %v8759_v45  ;;  %9568 = vst [vmem:[#allocation33_spill] sm:$0xff] %v8797_v41  ;;  %v2178_v42 = vld [vmem:[#allocation14 + $0x480] sm:$0xff]  ;;  %9575 = vst [vmem:[#allocation40_spill] sm:$0xff] %v8818_v38 }
 0x1ad   : > { %1888 = vmatprep.subr.bf16.mxu1 %v7367_v44  ;;  %v2184_v44 = vld [vmem:[#allocation14 + $0x4b0] sm:$0xff] }
 0x1ae   : > { %v8800_v49 = vpack.c.bf16 %v2184_v44, %v2178_v42  ;;  %v2049_v42 = vld [vmem:[#allocation14 + $0x78] sm:$0xff]  ;;  %v2055_v44 = vld [vmem:[#allocation14 + $0xa8] sm:$0xff] }
 0x1af   : > { %6527 = vmatpush1.bf16.msra.mxu0 %v8762_v51 }
 0x1b0   : > { %1889 = vmatpush1.bf16.msra.mxu1 %v7365_v50  ;;  %6529 = vmatprep.subr.bf16.mxu0 %v8765_v53  ;;  %9569 = vst [vmem:[#allocation34_spill] sm:$0xff] %v8800_v49  ;;  %v7388_v50 = vld [vmem:[#allocation13 + $0x1fc] ss:$12 sps:$4 sm:$0xff]  }
 0x1b1   : > { %1890 = vmatprep.subr.bf16.mxu1 %v7370_v52  ;;  %v8803_v52 = vpack.c.bf16 %v2197_v47, %v2191_v46  ;;  %v2051_v46 = vld [vmem:[#allocation14 + $0x88] sm:$0xff]  ;;  %v2057_v47 = vld [vmem:[#allocation14 + $0xb8] sm:$0xff] }
 0x1b3   : > { %6531 = vmatpush1.bf16.msra.mxu0 %v8768_v60  ;;  %9570 = vst [vmem:[#allocation35_spill] sm:$0xff] %v8803_v52 }
 0x1b4   : > { %1891 = vmatpush1.bf16.msra.mxu1 %v7368_v58  ;;  %6533 = vmatprep.subr.bf16.mxu0 %v8771_v62  ;;  %v2209_v58 = vld [vmem:[#allocation14 + $0x578] sm:$0xff] }
 0x1b5   : > { %1903 = vmatprep.subr.bf16.mxu1 %v7373_v61  ;;  %v7391_v61 = vld [vmem:[#allocation13 + $0x214] ss:$12 sps:$4 sm:$0xff]  }
 0x1b7   : > { %1893 = vmatmul.mubr.bf16.vlgmr.msra.gmra.mrb[12].mxu1 %v8694_v5  ;;  %6535 = vmatpush1.bf16.msra.mxu0 %v8774_v9  ;;  %v7377_v5 = vld [vmem:[#allocation13 + $0x1b0] ss:$12 sps:$4 sm:$0xff]  }
 0x1b8   : > { %1904 = vmatpush1.bf16.msra.mxu1 %v7371_v7  ;;  %6537 = vmatprep.subr.bf16.mxu0 %v8777_v12  ;;  %v2221_v7 = vld [vmem:[#allocation14 + $0x5d8] sm:$0xff] }
 0x1b9   : > { %1905 = vmatprep.subr.bf16.mxu1 %v7376_v10  ;;  %1935 = vmatprep.mubr.bf16.mxu1 %v8269_v0  ;;  %v7380_v0 = vld [vmem:[#allocation13 + $0x1c8] ss:$12 sps:$4 sm:$0xff]   ;;  %v8809_v10 = vpack.c.bf16 %v2209_v58, %v2203_v57  ;;  %v8815_v25 = vpack.c.bf16 %v2221_v7, %v2215_v6  ;;  %v8834_v57 = vpack.c.bf16 %v2057_v47, %v2051_v46  ;;  %v2050_v58 = vld [vmem:[#allocation14 + $0x80] sm:$0xff]  ;;  %v2069_v7 = vld [vmem:[#allocation14 + $0x118] sm:$0xff] }
 0x1ba   : > { %v2063_v6 = vld [vmem:[#allocation14 + $0xe8] sm:$0xff]  ;;  %v2072_v46 = vld [vmem:[#allocation14 + $0x130] sm:$0xff]  ;;  %v2078_v47 = vld [vmem:[#allocation14 + $0x160] sm:$0xff] }
 0x1bb   : > { %6539 = vmatpush1.bf16.msra.mxu0 %v8781_v19  ;;  %9572 = vst [vmem:[#allocation37_spill] sm:$0xff] %v8809_v10  ;;  %9574 = vst [vmem:[#allocation39_spill] sm:$0xff] %v8815_v25 }
 0x1bc   : > { %1906 = vmatpush1.bf16.msra.mxu1 %v7374_v34  ;;  %6541 = vmatprep.subr.bf16.mxu0 %v8784_v22  ;;  %v8812_v34 = vpack.c.bf16 %v2208_v2, %v2202_v63  ;;  %9578 = vst [vmem:[#allocation43_spill] sm:$0xff] %v8834_v57  ;;  %v2061_v63 = vld [vmem:[#allocation14 + $0xd8] sm:$0xff]  ;;  %v2067_v2 = vld [vmem:[#allocation14 + $0x108] sm:$0xff] }
 0x1bd   : > { %1907 = vmatprep.subr.bf16.mxu1 %v7379_v21  ;;  %v2037_v21 = vld [vmem:[#allocation14 + $0x18] sm:$0xff] }
 0x1be   : > { %9573 = vst [vmem:[#allocation38_spill] sm:$0xff] %v8812_v34 }
 0x1bf   : > { %6543 = vmatpush1.bf16.msra.mxu0 %v8788_v29  ;;  %v2195_v29 = vld [vmem:[#allocation14 + $0x508] sm:$0xff] }
 0x1c0   : > { %1908 = vmatpush1.bf16.msra.mxu1 %v7377_v5  ;;  %6545 = vmatprep.subr.bf16.mxu0 %v8791_v31  ;;  %v2045_v5 = vld [vmem:[#allocation14 + $0x58] sm:$0xff]  ;;  %v2183_v31 = vld [vmem:[#allocation14 + $0x4a8] sm:$0xff] }
 0x1c1   : > { %1909 = vmatprep.subr.bf16.mxu1 %v7382_v30  ;;  %v2036_v30 = vld [vmem:[#allocation14 + $0x10] sm:$0xff] }
 0x1c3   : > { %6547 = vmatpush1.bf16.msra.mxu0 %v8794_v39  ;;  %v2187_v39 = vld [vmem:[#allocation14 + $0x4c8] sm:$0xff] }
 0x1c4   : > { %1910 = vmatpush1.bf16.msra.mxu1 %v7380_v0  ;;  %6549 = vmatprep.subr.bf16.mxu0 %v8797_v41  ;;  %v8821_v0 = vpack.c.bf16 %v2043_v23, %v2037_v21  ;;  %v2066_v21 = vld [vmem:[#allocation14 + $0x100] sm:$0xff]  ;;  %v8846_v23 = vpack.c.bf16 %v2067_v2, %v2061_v63  ;;  %v2085_v63 = vld [vmem:[#allocation14 + $0x198] sm:$0xff]  ;;  %v2091_v2 = vld [vmem:[#allocation14 + $0x1c8] sm:$0xff] }
 0x1c5   : > { %1911 = vmatprep.subr.bf16.mxu1 %v7385_v40  ;;  %v8823_v40 = vpack.c.bf16 %v2045_v5, %v2039_v24  ;;  %v8848_v24 = vpack.c.bf16 %v2069_v7, %v2063_v6  ;;  %v2068_v5 = vld [vmem:[#allocation14 + $0x110] sm:$0xff]  ;;  %v2087_v6 = vld [vmem:[#allocation14 + $0x1a8] sm:$0xff]  ;;  %v2093_v7 = vld [vmem:[#allocation14 + $0x1d8] sm:$0xff] }
 0x1c6   : > { %v2171_v41 = vld [vmem:[#allocation14 + $0x448] sm:$0xff] }
 0x1c7   : > { %6551 = vmatpush1.bf16.msra.mxu0 %v8800_v49  ;;  %9576 = vst [vmem:[#allocation41_spill] sm:$0xff] %v8823_v40  ;;  %9580 = vst [vmem:[#allocation45_spill] sm:$0xff] %v8848_v24  ;;  %v2175_v49 = vld [vmem:[#allocation14 + $0x468] sm:$0xff] }
 0x1c8   : > { %1912 = vmatpush1.bf16.msra.mxu1 %v7383_v48  ;;  %6553 = vmatprep.subr.bf16.mxu0 %v8803_v52  ;;  %v8826_v48 = vpack.c.bf16 %v2042_v32, %v2036_v30  ;;  %v2073_v30 = vld [vmem:[#allocation14 + $0x138] sm:$0xff]  ;;  %v2079_v32 = vld [vmem:[#allocation14 + $0x168] sm:$0xff] }
 0x1c9   : > { %1913 = vmatprep.subr.bf16.mxu1 %v7388_v50  ;;  %v8828_v50 = vpack.c.bf16 %v2044_v36, %v2038_v33  ;;  %v2075_v33 = vld [vmem:[#allocation14 + $0x148] sm:$0xff]  ;;  %v2081_v36 = vld [vmem:[#allocation14 + $0x178] sm:$0xff] }
 0x1ca   : > { %v2159_v52 = vld [vmem:[#allocation14 + $0x3e8] sm:$0xff] }
 0x1cb   : > { %6555 = vmatpush1.bf16.msra.mxu0 %v8806_v4  ;;  %9577 = vst [vmem:[#allocation42_spill] sm:$0xff] %v8828_v50  ;;  %v2163_v4 = vld [vmem:[#allocation14 + $0x408] sm:$0xff] }
 0x1cc   : > { %1914 = vmatpush1.bf16.msra.mxu1 %v7386_v56  ;;  %6557 = vmatprep.subr.bf16.mxu0 %v8809_v10  ;;  %v8832_v56 = vpack.c.bf16 %v2055_v44, %v2049_v42  ;;  %v8854_v42 = vpack.c.bf16 %v2066_v21, %v2060_v17  ;;  %v2084_v21 = vld [vmem:[#allocation14 + $0x190] sm:$0xff]  ;;  %v2147_v10 = vld [vmem:[#allocation14 + $0x388] sm:$0xff] }
 0x1cd   : > { %1915 = vmatprep.subr.bf16.mxu1 %v7391_v61  ;;  %v2056_v61 = vld [vmem:[#allocation14 + $0xb0] sm:$0xff] }
 0x1ce   : > { %v8842_v16 = vpack.c.bf16 %v2056_v61, %v2050_v58  ;;  %v2074_v58 = vld [vmem:[#allocation14 + $0x140] sm:$0xff]  ;;  %v2080_v61 = vld [vmem:[#allocation14 + $0x170] sm:$0xff] }
 0x1cf   : > { %6559 = vmatpush1.bf16.msra.mxu0 %v8812_v34  ;;  %v8868_v17 = vpack.c.bf16 %v2080_v61, %v2074_v58  ;;  %v2096_v58 = vld [vmem:[#allocation14 + $0x1f0] sm:$0xff]  ;;  %v2102_v61 = vld [vmem:[#allocation14 + $0x220] sm:$0xff]  ;;  %v2151_v34 = vld [vmem:[#allocation14 + $0x3a8] sm:$0xff] }
 0x1d0   : > { %1916 = vmatpush1.bf16.msra.mxu1 %v7389_v13  ;;  %6561 = vmatprep.subr.bf16.mxu0 %v8815_v25  ;;  %v7491_v13 = vld [vmem:[%s8661_s20 + $0x8] ss:$12 sps:$4 sm:$0xff]   ;;  %9579 = vst [vmem:[#allocation44_spill] sm:$0xff] %v8842_v16  ;;  %v2135_v25 = vld [vmem:[#allocation14 + $0x328] sm:$0xff] }
 0x1d1   : > { %1917 = vmatprep.subr.bf16.mxu1 %v7394_v15  ;;  %v8840_v15 = vpack.c.bf16 %v2054_v55, %v2048_v54  ;;  %v8860_v54 = vpack.c.bf16 %v2079_v32, %v2073_v30  ;;  %v8862_v55 = vpack.c.bf16 %v2081_v36, %v2075_v33  ;;  %9583 = vst [vmem:[#allocation48_spill] sm:$0xff] %v8868_v17  ;;  %v2086_v32 = vld [vmem:[#allocation14 + $0x1a0] sm:$0xff]  ;;  %v2092_v33 = vld [vmem:[#allocation14 + $0x1d0] sm:$0xff]  ;;  %v2097_v36 = vld [vmem:[#allocation14 + $0x1f8] sm:$0xff] }
 0x1d2   : > { %v8874_v30 = vpack.c.bf16 %v2093_v7, %v2087_v6  ;;  %v2098_v6 = vld [vmem:[#allocation14 + $0x200] sm:$0xff]  ;;  %v2104_v7 = vld [vmem:[#allocation14 + $0x230] sm:$0xff] }
 0x1d3   : > { %6563 = vmatpush1.bf16.msra.mxu0 %v8818_v38  ;;  %9582 = vst [vmem:[#allocation47_spill] sm:$0xff] %v8862_v55  ;;  %v2139_v38 = vld [vmem:[#allocation14 + $0x348] sm:$0xff] }
 0x1d4   : > { %1918 = vmatpush1.bf16.msra.mxu1 %v7392_v27  ;;  %6629 = vmatprep.subr.bf16.mxu0 %v8823_v40  ;;  %v2062_v27 = vld [vmem:[#allocation14 + $0xe0] sm:$0xff]  ;;  %9584 = vst [vmem:[#allocation49_spill] sm:$0xff] %v8874_v30  ;;  %v2123_v40 = vld [vmem:[#allocation14 + $0x2c8] sm:$0xff] }
 0x1d5   : > { %6565 = vmatprep.subr.bf16.mxu1 %v8821_v0  ;;  %v8856_v44 = vpack.c.bf16 %v2068_v5, %v2062_v27  ;;  %v2090_v27 = vld [vmem:[#allocation14 + $0x1c0] sm:$0xff]  ;;  %v8872_v5 = vpack.c.bf16 %v2091_v2, %v2085_v63 }
 0x1d6   : > { %2317 = vmatmul.mubr.f32.vlgmr.msra.gmra.mrb[12].mxu0 %v9484_v8 }
 0x1d7   : > { %1936 = vmatmul.mubr.bf16.vlgmr.msra.gmra.mrb[12].mxu1 %v7491_v13  ;;  %6631 = vmatpush1.bf16.msra.mxu0 %v8828_v50  ;;  %9581 = vst [vmem:[#allocation46_spill] sm:$0xff] %v8856_v44  ;;  %v8866_v13 = vpack.c.bf16 %v2078_v47, %v2072_v46  ;;  %v8878_v46 = vpack.c.bf16 %v2090_v27, %v2084_v21  ;;  %v2127_v50 = vld [vmem:[#allocation14 + $0x2e8] sm:$0xff] }
 0x1d8   : > { %6567 = vmatpush1.bf16.msra.mxu1 %v8826_v48  ;;  %6633 = vmatprep.subr.bf16.mxu0 %v8834_v57  ;;  %v8880_v47 = vpack.c.bf16 %v2092_v33, %v2086_v32  ;;  %v2111_v57 = vld [vmem:[#allocation14 + $0x268] sm:$0xff]  ;;  %v8890_v21 = vpack.c.bf16 %v2102_v61, %v2096_v58  ;;  %v8892_v27 = vpack.c.bf16 %v2104_v7, %v2098_v6  ;;  %v2108_v32 = vld [vmem:[#allocation14 + $0x250] sm:$0xff]  ;;  %v2114_v33 = vld [vmem:[#allocation14 + $0x280] sm:$0xff] }
 0x1d9   : > { %6569 = vmatprep.subr.bf16.mxu1 %v8832_v56  ;;  %2387 = vmatprep.mubr.f32.mxu1 %v9484_v8  ;;  %v8902_v58 = vpack.c.bf16 %v2114_v33, %v2108_v32  ;;  %v2120_v6 = vld [vmem:[#allocation14 + $0x2b0] sm:$0xff]  ;;  %v2126_v7 = vld [vmem:[#allocation14 + $0x2e0] sm:$0xff] }
 0x1da   : > { %2458 = vmatprep.mubr.f32.mxu0 %v9484_v8  ;;  %v2103_v8 = vld [vmem:[#allocation14 + $0x228] sm:$0xff]  ;;  %9585 = vst [vmem:[#allocation50_spill] sm:$0xff] %v8880_v47  ;;  %9587 = vst [vmem:[#allocation52_spill] sm:$0xff] %v8892_v27  ;;  %v8914_v32 = vpack.c.bf16 %v2126_v7, %v2120_v6 }
 0x1db   : > { %6635 = vmatpush1.bf16.msra.mxu0 %v8842_v16  ;;  %v8884_v63 = vpack.c.bf16 %v2103_v8, %v2097_v36  ;;  %v2115_v16 = vld [vmem:[#allocation14 + $0x288] sm:$0xff]  ;;  %v2116_v36 = vld [vmem:[#allocation14 + $0x290] sm:$0xff] }
 0x1dc   : > { %6571 = vmatpush1.bf16.msra.mxu1 %v8840_v15  ;;  %6637 = vmatprep.subr.bf16.mxu0 %v8848_v24  ;;  %v2099_v24 = vld [vmem:[#allocation14 + $0x208] sm:$0xff] }
 0x1dd   : > { %6573 = vmatprep.subr.bf16.mxu1 %v8846_v23 }
 0x1df   : > { %6639 = vmatpush1.bf16.msra.mxu0 %v8856_v44  ;;  %v2105_v44 = vld [vmem:[#allocation14 + $0x238] sm:$0xff] }
 0x1e0   : > { %6575 = vmatpush1.bf16.msra.mxu1 %v8854_v42  ;;  %6641 = vmatprep.subr.bf16.mxu0 %v8862_v55  ;;  %v8886_v2 = vpack.c.bf16 %v2105_v44, %v2099_v24  ;;  %v2109_v55 = vld [vmem:[#allocation14 + $0x258] sm:$0xff]  ;;  %v2110_v44 = vld [vmem:[#allocation14 + $0x260] sm:$0xff] }
 0x1e1   : > { %6577 = vmatprep.subr.bf16.mxu1 %v8860_v54  ;;  %v8896_v8 = vpack.c.bf16 %v2115_v16, %v2109_v55  ;;  %v8904_v61 = vpack.c.bf16 %v2116_v36, %v2110_v44  ;;  %v2122_v55 = vld [vmem:[#allocation14 + $0x2c0] sm:$0xff]  ;;  %v2132_v44 = vld [vmem:[#allocation14 + $0x310] sm:$0xff] }
 0x1e2   : > { %9586 = vst [vmem:[#allocation51_spill] sm:$0xff] %v8886_v2  ;;  %v2138_v36 = vld [vmem:[#allocation14 + $0x340] sm:$0xff] }
 0x1e3   : > { %6643 = vmatpush1.bf16.msra.mxu0 %v8868_v17  ;;  %v2117_v17 = vld [vmem:[#allocation14 + $0x298] sm:$0xff]  ;;  %9589 = vst [vmem:[#allocation54_spill] sm:$0xff] %v8904_v61  ;;  %v8926_v6 = vpack.c.bf16 %v2138_v36, %v2132_v44 }
 0x1e4   : > { %6579 = vmatpush1.bf16.msra.mxu1 %v8866_v13  ;;  %6645 = vmatprep.subr.bf16.mxu0 %v8874_v30  ;;  %v8898_v24 = vpack.c.bf16 %v2117_v17, %v2111_v57  ;;  %v2121_v30 = vld [vmem:[#allocation14 + $0x2b8] sm:$0xff]  ;;  %v2128_v17 = vld [vmem:[#allocation14 + $0x2f0] sm:$0xff] }
 0x1e5   : > { %6581 = vmatprep.subr.bf16.mxu1 %v8872_v5  ;;  %v8908_v57 = vpack.c.bf16 %v2127_v50, %v2121_v30  ;;  %v8916_v33 = vpack.c.bf16 %v2128_v17, %v2122_v55  ;;  %v2134_v30 = vld [vmem:[#allocation14 + $0x320] sm:$0xff]  ;;  %v2144_v55 = vld [vmem:[#allocation14 + $0x370] sm:$0xff] }
 0x1e6   : > { %9588 = vst [vmem:[#allocation53_spill] sm:$0xff] %v8898_v24  ;;  %v2150_v17 = vld [vmem:[#allocation14 + $0x3a0] sm:$0xff] }
 0x1e7   : > { %6647 = vmatpush1.bf16.msra.mxu0 %v8880_v47  ;;  %v2129_v47 = vld [vmem:[#allocation14 + $0x2f8] sm:$0xff]  ;;  %9591 = vst [vmem:[#allocation56_spill] sm:$0xff] %v8916_v33  ;;  %v8938_v44 = vpack.c.bf16 %v2150_v17, %v2144_v55 }
 0x1e8   : > { %6583 = vmatpush1.bf16.msra.mxu1 %v8878_v46  ;;  %6649 = vmatprep.subr.bf16.mxu0 %v8886_v2  ;;  %v8910_v16 = vpack.c.bf16 %v2129_v47, %v2123_v40  ;;  %v2133_v2 = vld [vmem:[#allocation14 + $0x318] sm:$0xff]  ;;  %v2140_v47 = vld [vmem:[#allocation14 + $0x350] sm:$0xff] }
 0x1e9   : > { %6585 = vmatprep.subr.bf16.mxu1 %v8884_v63  ;;  %v8920_v40 = vpack.c.bf16 %v2139_v38, %v2133_v2  ;;  %v8928_v7 = vpack.c.bf16 %v2140_v47, %v2134_v30  ;;  %v2146_v2 = vld [vmem:[#allocation14 + $0x380] sm:$0xff]  ;;  %v2156_v30 = vld [vmem:[#allocation14 + $0x3d0] sm:$0xff] }
 0x1ea   : > { %9590 = vst [vmem:[#allocation55_spill] sm:$0xff] %v8910_v16  ;;  %v2162_v47 = vld [vmem:[#allocation14 + $0x400] sm:$0xff] }
 0x1eb   : > { %6651 = vmatpush1.bf16.msra.mxu0 %v8892_v27  ;;  %v2141_v27 = vld [vmem:[#allocation14 + $0x358] sm:$0xff]  ;;  %9593 = vst [vmem:[#allocation58_spill] sm:$0xff] %v8928_v7  ;;  %v8950_v55 = vpack.c.bf16 %v2162_v47, %v2156_v30 }
 0x1ec   : > { %6587 = vmatpush1.bf16.msra.mxu1 %v8890_v21  ;;  %6653 = vmatprep.subr.bf16.mxu0 %v8898_v24  ;;  %v8922_v50 = vpack.c.bf16 %v2141_v27, %v2135_v25  ;;  %v2145_v24 = vld [vmem:[#allocation14 + $0x378] sm:$0xff]  ;;  %v2152_v27 = vld [vmem:[#allocation14 + $0x3b0] sm:$0xff] }
 0x1ed   : > { %6589 = vmatprep.subr.bf16.mxu1 %v8896_v8  ;;  %v8932_v25 = vpack.c.bf16 %v2151_v34, %v2145_v24  ;;  %v8940_v36 = vpack.c.bf16 %v2152_v27, %v2146_v2  ;;  %v2158_v24 = vld [vmem:[#allocation14 + $0x3e0] sm:$0xff]  ;;  %9598 = vst [vmem:[#allocation63_spill] sm:$0xff] %v8950_v55  ;;  %v2168_v2 = vld [vmem:[#allocation14 + $0x430] sm:$0xff] }
 0x1ee   : > { %9592 = vst [vmem:[#allocation57_spill] sm:$0xff] %v8922_v50  ;;  %v2174_v27 = vld [vmem:[#allocation14 + $0x460] sm:$0xff] }
 0x1ef   : > { %6655 = vmatpush1.bf16.msra.mxu0 %v8904_v61  ;;  %v2153_v61 = vld [vmem:[#allocation14 + $0x3b8] sm:$0xff]  ;;  %9595 = vst [vmem:[#allocation60_spill] sm:$0xff] %v8940_v36  ;;  %v8962_v30 = vpack.c.bf16 %v2174_v27, %v2168_v2 }
 0x1f0   : > { %6591 = vmatpush1.bf16.msra.mxu1 %v8902_v58  ;;  %6657 = vmatprep.subr.bf16.mxu0 %v8910_v16  ;;  %v8934_v38 = vpack.c.bf16 %v2153_v61, %v2147_v10  ;;  %v2157_v16 = vld [vmem:[#allocation14 + $0x3d8] sm:$0xff]  ;;  %v2164_v61 = vld [vmem:[#allocation14 + $0x410] sm:$0xff] }
 0x1f1   : > { %6593 = vmatprep.subr.bf16.mxu1 %v8908_v57  ;;  %v8944_v10 = vpack.c.bf16 %v2163_v4, %v2157_v16  ;;  %v8952_v17 = vpack.c.bf16 %v2164_v61, %v2158_v24  ;;  %v2170_v16 = vld [vmem:[#allocation14 + $0x440] sm:$0xff]  ;;  %9602 = vst [vmem:[#allocation67_spill] sm:$0xff] %v8962_v30  ;;  %v2180_v24 = vld [vmem:[#allocation14 + $0x490] sm:$0xff] }
 0x1f2   : > { %9594 = vst [vmem:[#allocation59_spill] sm:$0xff] %v8934_v38  ;;  %v2186_v61 = vld [vmem:[#allocation14 + $0x4c0] sm:$0xff] }
 0x1f3   : > { %6659 = vmatpush1.bf16.msra.mxu0 %v8916_v33  ;;  %v2165_v33 = vld [vmem:[#allocation14 + $0x418] sm:$0xff]  ;;  %9596 = vst [vmem:[#allocation61_spill] sm:$0xff] %v8944_v10  ;;  %9599 = vst [vmem:[#allocation64_spill] sm:$0xff] %v8952_v17  ;;  %v8974_v2 = vpack.c.bf16 %v2186_v61, %v2180_v24 }
 0x1f4   : > { %6595 = vmatpush1.bf16.msra.mxu1 %v8914_v32  ;;  %6661 = vmatprep.subr.bf16.mxu0 %v8922_v50  ;;  %v8946_v34 = vpack.c.bf16 %v2165_v33, %v2159_v52  ;;  %v2169_v50 = vld [vmem:[#allocation14 + $0x438] sm:$0xff]  ;;  %v2176_v33 = vld [vmem:[#allocation14 + $0x470] sm:$0xff] }
 0x1f5   : > { %6597 = vmatprep.subr.bf16.mxu1 %v8920_v40  ;;  %v8956_v52 = vpack.c.bf16 %v2175_v49, %v2169_v50  ;;  %v8964_v47 = vpack.c.bf16 %v2176_v33, %v2170_v16  ;;  %v2182_v50 = vld [vmem:[#allocation14 + $0x4a0] sm:$0xff]  ;;  %9606 = vst [vmem:[#allocation71_spill] sm:$0xff] %v8974_v2  ;;  %v2192_v16 = vld [vmem:[#allocation14 + $0x4f0] sm:$0xff] }
 0x1f6   : > { %9597 = vst [vmem:[#allocation62_spill] sm:$0xff] %v8946_v34  ;;  %v2198_v33 = vld [vmem:[#allocation14 + $0x520] sm:$0xff] }
 0x1f7   : > { %6663 = vmatpush1.bf16.msra.mxu0 %v8928_v7  ;;  %v2177_v7 = vld [vmem:[#allocation14 + $0x478] sm:$0xff]  ;;  %9600 = vst [vmem:[#allocation65_spill] sm:$0xff] %v8956_v52  ;;  %9603 = vst [vmem:[#allocation68_spill] sm:$0xff] %v8964_v47  ;;  %v8986_v24 = vpack.c.bf16 %v2198_v33, %v2192_v16  ;;  %v2219_v16 = vld [vmem:[#allocation14 + $0x5c8] sm:$0xff] }
 0x1f8   : > { %6599 = vmatpush1.bf16.msra.mxu1 %v8926_v6  ;;  %6665 = vmatprep.subr.bf16.mxu0 %v8934_v38  ;;  %v8958_v4 = vpack.c.bf16 %v2177_v7, %v2171_v41  ;;  %v2181_v38 = vld [vmem:[#allocation14 + $0x498] sm:$0xff]  ;;  %v2188_v7 = vld [vmem:[#allocation14 + $0x4d0] sm:$0xff] }
 0x1f9   : > { %6601 = vmatprep.subr.bf16.mxu1 %v8932_v25  ;;  %v8968_v41 = vpack.c.bf16 %v2187_v39, %v2181_v38  ;;  %v8976_v27 = vpack.c.bf16 %v2188_v7, %v2182_v50  ;;  %v2194_v38 = vld [vmem:[#allocation14 + $0x500] sm:$0xff]  ;;  %9610 = vst [vmem:[#allocation75_spill] sm:$0xff] %v8986_v24  ;;  %v2204_v50 = vld [vmem:[#allocation14 + $0x550] sm:$0xff]  ;;  %v2225_v33 = vld [vmem:[#allocation14 + $0x5f8] sm:$0xff] }
 0x1fa   : > { %9601 = vst [vmem:[#allocation66_spill] sm:$0xff] %v8958_v4  ;;  %v2210_v7 = vld [vmem:[#allocation14 + $0x580] sm:$0xff] }
 0x1fb   : > { %6667 = vmatpush1.bf16.msra.mxu0 %v8940_v36  ;;  %v2189_v36 = vld [vmem:[#allocation14 + $0x4d8] sm:$0xff]  ;;  %9604 = vst [vmem:[#allocation69_spill] sm:$0xff] %v8968_v41  ;;  %9607 = vst [vmem:[#allocation72_spill] sm:$0xff] %v8976_v27 }
 0x1fc   : > { %6603 = vmatpush1.bf16.msra.mxu1 %v8938_v44  ;;  %6669 = vmatprep.subr.bf16.mxu0 %v8946_v34  ;;  %v8970_v49 = vpack.c.bf16 %v2189_v36, %v2183_v31  ;;  %v2193_v34 = vld [vmem:[#allocation14 + $0x4f8] sm:$0xff]  ;;  %v2200_v36 = vld [vmem:[#allocation14 + $0x530] sm:$0xff] }
 0x1fd   : > { %6605 = vmatprep.subr.bf16.mxu1 %v8944_v10  ;;  %v8988_v61 = vpack.c.bf16 %v2200_v36, %v2194_v38  ;;  %v2218_v10 = vld [vmem:[#allocation14 + $0x5c0] sm:$0xff] }
 0x1fe   : > { %9605 = vst [vmem:[#allocation70_spill] sm:$0xff] %v8970_v49 }
 0x1ff   : > { %6671 = vmatpush1.bf16.msra.mxu0 %v8952_v17  ;;  %v2201_v17 = vld [vmem:[#allocation14 + $0x538] sm:$0xff] }
 0x200   : > { %6607 = vmatpush1.bf16.msra.mxu1 %v8950_v55  ;;  %6673 = vmatprep.subr.bf16.mxu0 %v8958_v4  ;;  %v2199_v55 = vld [vmem:[#allocation14 + $0x528] sm:$0xff]  ;;  %v8982_v39 = vpack.c.bf16 %v2201_v17, %v2195_v29  ;;  %v2205_v4 = vld [vmem:[#allocation14 + $0x558] sm:$0xff]  ;;  %v2212_v17 = vld [vmem:[#allocation14 + $0x590] sm:$0xff] }
 0x201   : > { %6609 = vmatprep.subr.bf16.mxu1 %v8956_v52  ;;  %v8980_v31 = vpack.c.bf16 %v2199_v55, %v2193_v34  ;;  %v2207_v52 = vld [vmem:[#allocation14 + $0x568] sm:$0xff]  ;;  %v2206_v55 = vld [vmem:[#allocation14 + $0x560] sm:$0xff] }
 0x202   : > { %9609 = vst [vmem:[#allocation74_spill] sm:$0xff] %v8982_v39 }
 0x203   : > { %6675 = vmatpush1.bf16.msra.mxu0 %v8964_v47  ;;  %9608 = vst [vmem:[#allocation73_spill] sm:$0xff] %v8980_v31  ;;  %v2213_v47 = vld [vmem:[#allocation14 + $0x598] sm:$0xff] }
 0x204   : > { %6611 = vmatpush1.bf16.msra.mxu1 %v8962_v30  ;;  %6677 = vmatprep.subr.bf16.mxu0 %v8970_v49  ;;  %v2211_v30 = vld [vmem:[#allocation14 + $0x588] sm:$0xff]  ;;  %v8994_v34 = vpack.c.bf16 %v2213_v47, %v2207_v52  ;;  %v2217_v49 = vld [vmem:[#allocation14 + $0x5b8] sm:$0xff]  ;;  %v9006_v52 = vpack.c.bf16 %v2212_v17, %v2206_v55 }
 0x205   : > { %6613 = vmatprep.subr.bf16.mxu1 %v8968_v41  ;;  %v8992_v29 = vpack.c.bf16 %v2211_v30, %v2205_v4  ;;  %v9004_v4 = vpack.c.bf16 %v2210_v7, %v2204_v50  ;;  %v2216_v30 = vld [vmem:[#allocation14 + $0x5b0] sm:$0xff]  ;;  %v2222_v41 = vld [vmem:[#allocation14 + $0x5e0] sm:$0xff] }
 0x206   : > { %v9018_v50 = vpack.c.bf16 %v2222_v41, %v2216_v30  ;;  %v9626_v30 = vld [vmem:[#allocation36_spill] sm:$0xff] }
 0x207   : > { %6679 = vmatpush1.bf16.msra.mxu0 %v8976_v27  ;;  %v2223_v27 = vld [vmem:[#allocation14 + $0x5e8] sm:$0xff] }
 0x208   : > { %6615 = vmatpush1.bf16.msra.mxu1 %v8974_v2  ;;  %6681 = vmatprep.subr.bf16.mxu0 %v8982_v39  ;;  %v9012_v39 = vpack.c.bf16 %v2223_v27, %v2217_v49  ;;  %v9611_v49 = vmov 0.0  }
 0x209   : > { %6617 = vmatprep.subr.bf16.mxu1 %v8980_v31  ;;  %v9014_v31 = vpack.c.bf16 %v2225_v33, %v2219_v16 }
 0x20a   : > { %v8996_v2 = vpop.f32.mrb[0].mxu1 }
 0x20b   : > { %v8998_v38 = vpop.f32.mrb[1].mxu1  ;;  %6683 = vmatpush1.bf16.msra.mxu0 %v8988_v61 }
 0x20c   : > { %v9000_v36 = vpop.f32.mrb[2].mxu1  ;;  %6619 = vmatpush1.bf16.msra.mxu1 %v8986_v24  ;;  %6685 = vmatprep.subr.bf16.mxu0 %v8994_v34  ;;  %v2224_v24 = vld [vmem:[#allocation14 + $0x5f0] sm:$0xff] }
 0x20d   : > { %v9008_v47 = vpop.f32.mrb[3].mxu1  ;;  %6621 = vmatprep.subr.bf16.mxu1 %v8992_v29  ;;  %v9020_v7 = vpack.c.bf16 %v2224_v24, %v2218_v10  ;;  %v774_v10 = vlaneseq }
 0x20f   : > { %6687 = vmatpush1.bf16.msra.mxu0 %v9006_v52 }
 0x210   : > { %6623 = vmatpush1.bf16.msra.mxu1 %v9004_v4  ;;  %6689 = vmatprep.subr.bf16.mxu0 %v9014_v31 }
 0x211   : > { %6625 = vmatprep.subr.bf16.mxu1 %v9012_v39 }
 0x213   : > { %6691 = vmatpush1.bf16.msra.mxu0 %v9020_v7 }
 0x214   : > { %6627 = vmatpush1.bf16.msra.mxu1 %v9018_v50  ;;  %6757 = vmatprep.subr.bf16.mxu0 %v8821_v0 }
 0x215   : > { %6693 = vmatprep.subr.bf16.mxu1 %v8722_v59  ;;  %v9038_v59 = vshrl.u32 %v774_v10, 7 }
 0x216   : > { %2459 = vmatmul.mubr.f32.vlgmr.msra.gmra.mrb[14].mxu0 %v9611_v49 }
 0x217   : > { %2388 = vmatmul.mubr.f32.vlgmr.msra.gmra.mrb[16].mxu1 %v9611_v49  ;;  %6759 = vmatpush1.bf16.msra.mxu0 %v8826_v48  ;;  %v9064_v0 = vsub.s32 2, %v9038_v59 }
 0x218   : > { %6695 = vmatpush1.bf16.msra.mxu1 %v8724_v1  ;;  %6761 = vmatprep.subr.bf16.mxu0 %v8832_v56  ;;  %v9045_v1 = vsub.s32 0, %v9038_v59 }
 0x219   : > { %6697 = vmatprep.subr.bf16.mxu1 %v8727_v3  ;;  %v772_v3 = vld [vmem:[%s9457_s3] sm:$0x7] }
 0x21a   : > { %v785_v41 = vrot.slane %v772_v3, %v9064_v0 }
 0x21b   : > { %6763 = vmatpush1.bf16.msra.mxu0 %v8840_v15 }
 0x21c   : > { %6699 = vmatpush1.bf16.msra.mxu1 %v8731_v11  ;;  %6765 = vmatprep.subr.bf16.mxu0 %v8846_v23  ;;  %v9051_v11 = vsub.s32 1, %v9038_v59 }
 0x21d   : > { %6701 = vmatprep.subr.bf16.mxu1 %v8734_v14  ;;  %v777_v14 = vrot.slane %v772_v3, %v9045_v1 }
 0x21f   : > { %6767 = vmatpush1.bf16.msra.mxu0 %v8854_v42 }
 0x220   : > { %6703 = vmatpush1.bf16.msra.mxu1 %v8738_v18  ;;  %6769 = vmatprep.subr.bf16.mxu0 %v8860_v54  ;;  %v781_v18 = vrot.slane %v772_v3, %v9051_v11 }
 0x221   : > { %6705 = vmatprep.subr.bf16.mxu1 %v8741_v20 }
 0x223   : > { %6771 = vmatpush1.bf16.msra.mxu0 %v8866_v13 }
 0x224   : > { %6707 = vmatpush1.bf16.msra.mxu1 %v8744_v26  ;;  %6773 = vmatprep.subr.bf16.mxu0 %v8872_v5 }
 0x225   : > { %6709 = vmatprep.subr.bf16.mxu1 %v8747_v28 }
 0x227   : > { %6775 = vmatpush1.bf16.msra.mxu0 %v8878_v46 }
 0x228   : > { %6711 = vmatpush1.bf16.msra.mxu1 %v8750_v35  ;;  %6777 = vmatprep.subr.bf16.mxu0 %v8884_v63 }
 0x229   : > { %6713 = vmatprep.subr.bf16.mxu1 %v8753_v37  ;;  %v1223_v20 = vpop.f32.mrb[0].mxu0 }
 0x22a   : > { %v6370_v26 = vpop.f32.mrb[4].mxu1  ;;  %v1224_v28 = vadd.f32 %v1223_v20, %v777_v14  ;;  %v1225_v48 = vpop.f32.mrb[1].mxu0 }
 0x22b   : > { %v6371_v56 = vpop.f32.mrb[5].mxu1  ;;  %v1226_v15 = vadd.f32 %v1225_v48, %v781_v18  ;;  %v1227_v42 = vpop.f32.mrb[2].mxu0  ;;  %6779 = vmatpush1.bf16.msra.mxu0 %v8890_v21  ;;  %v9630_v48 = vld [vmem:[#allocation39_spill] sm:$0xff] }
 0x22c   : > { %v6372_v23 = vadd.f32 %v6371_v56, %v6370_v26  ;;  %v6373_v54 = vpop.f32.mrb[6].mxu1  ;;  %6715 = vmatpush1.bf16.msra.mxu1 %v8756_v43  ;;  %v1228_v35 = vadd.f32 %v1227_v42, %v777_v14  ;;  %v1229_v37 = vpop.f32.mrb[3].mxu0  ;;  %v9069_v5 = vadd.f32 %v8996_v2, %v1224_v28  ;;  %6781 = vmatprep.subr.bf16.mxu0 %v8896_v8  ;;  %v9619_v8 = vld [vmem:[#allocation33_spill] sm:$0xff]  ;;  %v9629_v28 = vld [vmem:[#allocation38_spill] sm:$0xff]  ;;  %v9631_v56 = vld [vmem:[#allocation40_spill] sm:$0xff] }
 0x22d   : > { %v6374_v13 = vpop.f32.mrb[7].mxu1  ;;  %6717 = vmatprep.subr.bf16.mxu1 %v8759_v45  ;;  %v1230_v46 = vadd.f32 %v1229_v37, %v781_v18  ;;  %v9075_v27 = vadd.f32 %v8998_v38, %v1226_v15  ;;  %v9612_v45 = vld [vmem:[#allocation61_spill] sm:$0xff] }
 0x22e   : > { %v6375_v63 = vadd.f32 %v6374_v13, %v6373_v54  ;;  %v9078_v43 = vadd.f32 %v9000_v36, %v1228_v35  ;;  %v9628_v18 = vld [vmem:[#allocation37_spill] sm:$0xff] }
 0x22f   : > { %6783 = vmatpush1.bf16.msra.mxu0 %v8902_v58  ;;  %v9083_v2 = vadd.f32 %v9008_v47, %v1230_v46  ;;  %v9622_v58 = vld [vmem:[#allocation34_spill] sm:$0xff]  ;;  %v9627_v47 = vld [vmem:[#allocation75_spill] sm:$0xff]  ;;  %v9632_v15 = vld [vmem:[#allocation41_spill] sm:$0xff] }
 0x230   : > { %v1313_v21 = vadd.f32 %v6375_v63, %v785_v41  ;;  %6719 = vmatpush1.bf16.msra.mxu1 %v8762_v51  ;;  %6785 = vmatprep.subr.bf16.mxu0 %v8908_v57  ;;  %v9613_v51 = vld [vmem:[#allocation30_spill] sm:$0xff]  ;;  %v9623_v57 = vld [vmem:[#allocation71_spill] sm:$0xff] }
 0x231   : > { %6721 = vmatprep.subr.bf16.mxu1 %v8765_v53  ;;  %v9614_v53 = vld [vmem:[#allocation63_spill] sm:$0xff] }
 0x233   : > { %6787 = vmatpush1.bf16.msra.mxu0 %v8914_v32  ;;  %v1310_v32 = vadd.f32 %v6372_v23, %v785_v41 }
 0x234   : > { %6723 = vmatpush1.bf16.msra.mxu1 %v8768_v60  ;;  %6789 = vmatprep.subr.bf16.mxu0 %v8920_v40  ;;  %v9615_v60 = vld [vmem:[#allocation31_spill] sm:$0xff] }
 0x235   : > { %6725 = vmatprep.subr.bf16.mxu1 %v8771_v62  ;;  %v9616_v62 = vld [vmem:[#allocation65_spill] sm:$0xff]  ;;  %v9624_v40 = vld [vmem:[#allocation35_spill] sm:$0xff] }
 0x237   : > { %6791 = vmatpush1.bf16.msra.mxu0 %v8926_v6  ;;  %v9625_v6 = vld [vmem:[#allocation73_spill] sm:$0xff] }
 0x238   : > { %6727 = vmatpush1.bf16.msra.mxu1 %v8774_v9  ;;  %6793 = vmatprep.subr.bf16.mxu0 %v8932_v25  ;;  %v9617_v9 = vld [vmem:[#allocation32_spill] sm:$0xff] }
 0x239   : > { %6729 = vmatprep.subr.bf16.mxu1 %v8777_v12  ;;  %v9618_v12 = vld [vmem:[#allocation67_spill] sm:$0xff] }
 0x23b   : > { %6795 = vmatpush1.bf16.msra.mxu0 %v8938_v44 }
 0x23c   : > { %6731 = vmatpush1.bf16.msra.mxu1 %v8781_v19  ;;  %6797 = vmatprep.subr.bf16.mxu0 %v9612_v45  ;;  %v9620_v19 = vld [vmem:[#allocation69_spill] sm:$0xff] }
 0x23d   : > { %6733 = vmatprep.subr.bf16.mxu1 %v8784_v22  ;;  %v1459_v22 = vld [vmem:[%s9621_s9] sm:$0x7] }
 0x23e   : > { %v1472_v24 = vrot.slane %v1459_v22, %v9064_v0  ;;  %v1468_v46 = vrot.slane %v1459_v22, %v9051_v11 }
 0x23f   : > { %6799 = vmatpush1.bf16.msra.mxu0 %v9614_v53 }
 0x240   : > { %6735 = vmatpush1.bf16.msra.mxu1 %v9613_v51  ;;  %6801 = vmatprep.subr.bf16.mxu0 %v9616_v62 }
 0x241   : > { %6737 = vmatprep.subr.bf16.mxu1 %v9615_v60 }
 0x243   : > { %6803 = vmatpush1.bf16.msra.mxu0 %v9618_v12 }
 0x244   : > { %6739 = vmatpush1.bf16.msra.mxu1 %v9617_v9  ;;  %6805 = vmatprep.subr.bf16.mxu0 %v9620_v19 }
 0x245   : > { %6741 = vmatprep.subr.bf16.mxu1 %v9619_v8 }
 0x247   : > { %6807 = vmatpush1.bf16.msra.mxu0 %v9623_v57 }
 0x248   : > { %6743 = vmatpush1.bf16.msra.mxu1 %v9622_v58  ;;  %6809 = vmatprep.subr.bf16.mxu0 %v9625_v6 }
 0x249   : > { %6745 = vmatprep.subr.bf16.mxu1 %v9624_v40  ;;  %v6401_v44 = vpop.f32.mrb[4].mxu0 }
 0x24a   : > { %v1350_v25 = vpop.f32.mrb[8].mxu1  ;;  %v6402_v16 = vpop.f32.mrb[5].mxu0 }
 0x24b   : > { %v9115_v55 = vadd.f32 %v1350_v25, %v1310_v32  ;;  %v6478_v17 = vpop.f32.mrb[9].mxu1  ;;  %v6403_v38 = vadd.f32 %v6402_v16, %v6401_v44  ;;  %v6404_v36 = vpop.f32.mrb[6].mxu0  ;;  %6811 = vmatpush1.bf16.msra.mxu0 %v9627_v47 }
 0x24c   : > { %v1353_v33 = vpop.f32.mrb[10].mxu1  ;;  %6747 = vmatpush1.bf16.msra.mxu1 %v9626_v30  ;;  %v6405_v14 = vpop.f32.mrb[7].mxu0  ;;  %6813 = vmatprep.subr.bf16.mxu0 %v8992_v29 }
 0x24d   : > { %v9119_v10 = vadd.f32 %v1353_v33, %v1313_v21  ;;  %v6479_v3 = vpop.f32.mrb[11].mxu1  ;;  %6749 = vmatprep.subr.bf16.mxu1 %v9628_v18  ;;  %v6406_v20 = vadd.f32 %v6405_v14, %v6404_v36  ;;  %v1981_v26 = vadd.f32 %v6403_v38, %v1472_v24 }
 0x24f   : > { %6815 = vmatpush1.bf16.msra.mxu0 %v9004_v4  ;;  %v1984_v54 = vadd.f32 %v6406_v20, %v1472_v24  ;;  %v1464_v4 = vrot.slane %v1459_v22, %v9045_v1 }
 0x250   : > { %6751 = vmatpush1.bf16.msra.mxu1 %v9629_v28  ;;  %6817 = vmatprep.subr.bf16.mxu0 %v9012_v39 }
 0x251   : > { %6753 = vmatprep.subr.bf16.mxu1 %v9630_v48 }
 0x253   : > { %6819 = vmatpush1.bf16.msra.mxu0 %v9018_v50 }
 0x254   : > { %6755 = vmatpush1.bf16.msra.mxu1 %v9631_v56 }
 0x255   : > { %6821 = vmatprep.subr.bf16.mxu1 %v9632_v15  ;;  %v9152_v15 = vld [vmem:[%s9634_s29] ss:$0 sm:$0xff] }
 0x269   : > { %v2021_v23 = vpop.f32.mrb[8].mxu0 }
 0x26a   : > { %v9130_v42 = vadd.f32 %v2021_v23, %v1981_v26  ;;  %v6498_v29 = vpop.f32.mrb[9].mxu0 }
 0x26b   : > { %v2024_v35 = vpop.f32.mrb[10].mxu0 }
 0x26c   : > { %v2025_v37 = vadd.f32 %v2024_v35, %v1984_v54  ;;  %v6499_v13 = vpop.f32.mrb[11].mxu0 }
 0x2a9   : > { %v2318_v39 = vpop.f32.mrb[12].mxu0 }
 0x2aa   : > { %v1937_v63 = vpop.f32.mrb[12].mxu1  ;;  %v2465_v50 = vadd.f32 %v2318_v39, %v9069_v5  ;;  %v2320_v45 = vpop.f32.mrb[13].mxu0  ;;  %v9143_v5 = vld [vmem:[%s9633_s27] ss:$0 sm:$0xff] }
 0x2ab   : > { %v9134_v41 = vadd.f32 %v1937_v63, %v1464_v4  ;;  %v1939_v21 = vpop.f32.mrb[13].mxu1  ;;  %v2472_v53 = vadd.f32 %v2320_v45, %v9075_v27  ;;  %v9637_v45 = vld [vmem:[#allocation44_spill] sm:$0xff] }
 0x2ac   : > { %v9137_v51 = vadd.f32 %v1939_v21, %v1468_v46  ;;  %v1941_v60 = vpop.f32.mrb[14].mxu1  ;;  %v6017_v9 = vmul.f32 -1.442695, %v2465_v50  ;;  %v9635_v21 = vld [vmem:[#allocation42_spill] sm:$0xff] }
 0x2ad   : > { %v1943_v62 = vpop.f32.mrb[15].mxu1  ;;  %v6018_v12 = vmul.f32 -1.442695, %v2472_v53  ;;  %v7022_v32 = vadd.f32 %v1941_v60, %v1464_v4  ;;  %v9638_v53 = vld [vmem:[#allocation45_spill] sm:$0xff]  ;;  %v9639_v60 = vld [vmem:[#allocation46_spill] sm:$0xff] }
 0x2ae   : > { %7443 = vpow2.f32 %v6017_v9  ;;  %v7023_v57 = vadd.f32 %v1943_v62, %v1468_v46  ;;  %v9640_v62 = vld [vmem:[#allocation47_spill] sm:$0xff]  ;;  %v9641_v9 = vld [vmem:[#allocation48_spill] sm:$0xff] }
 0x2af   : > { %7445 = vpow2.f32 %v6018_v12  ;;  %v9642_v12 = vld [vmem:[#allocation49_spill] sm:$0xff] }
 0x2b8   : > { %v7444_v8 = vpop.eup %7443 }
 0x2b9   : > { %v2469_v19 = vadd.f32 1.0, %v7444_v8  ;;  %v7446_v22 = vpop.eup %7445  ;;  %v9643_v8 = vld [vmem:[#allocation50_spill] sm:$0xff] }
 0x2ba   : > { %v2476_v58 = vadd.f32 1.0, %v7446_v22  ;;  %v9645_v22 = vld [vmem:[#allocation52_spill] sm:$0xff] }
 0x2bb   : > { %7447 = vrcp.f32 %v2469_v19  ;;  %v9644_v19 = vld [vmem:[#allocation51_spill] sm:$0xff] }
 0x2bc   : > { %7449 = vrcp.f32 %v2476_v58  ;;  %v9646_v58 = vld [vmem:[#allocation53_spill] sm:$0xff] }
 0x2c5   : > { %v7448_v17 = vpop.eup %7447 }
 0x2c6   : > { %v7450_v47 = vpop.eup %7449 }
 0x2c7   : > { %v2501_v14 = vsub.f32 1.0, %v7450_v47  ;;  %v2503_v28 = vmul.f32 0.0, %v7450_v47  ;;  %v7395_v47 = vld [vmem:[#allocation16] ss:$8 sps:$4 sm:$0xff]  }
 0x2e9   : > { %v2460_v27 = vpop.f32.mrb[14].mxu0 }
 0x2ea   : > { %v2389_v40 = vpop.f32.mrb[16].mxu1  ;;  %v2490_v25 = vadd.f32 %v7023_v57, %v2460_v27  ;;  %v2462_v24 = vpop.f32.mrb[15].mxu0  ;;  %v9647_v57 = vld [vmem:[#allocation54_spill] sm:$0xff]  ;;  %v9650_v27 = vld [vmem:[#allocation57_spill] sm:$0xff] }
 0x2eb   : > { %v2479_v6 = vadd.f32 %v9143_v5, %v2389_v40  ;;  %v2391_v44 = vpop.f32.mrb[17].mxu1  ;;  %v2497_v23 = vadd.f32 %v9152_v15, %v2462_v24  ;;  %v9649_v40 = vld [vmem:[#allocation56_spill] sm:$0xff]  ;;  %v9654_v24 = vld [vmem:[#allocation62_spill] sm:$0xff] }
 0x2ec   : > { %v2483_v16 = vadd.f32 %v7022_v32, %v2391_v44  ;;  %v6020_v30 = vmul.f32 -1.442695, %v2490_v25  ;;  %v9648_v32 = vld [vmem:[#allocation55_spill] sm:$0xff]  ;;  %v9653_v44 = vld [vmem:[#allocation60_spill] sm:$0xff] }
 0x2ed   : > { %v2480_v33 = vmul.f32 %v7448_v17, %v2479_v6  ;;  %v9651_v6 = vld [vmem:[#allocation58_spill] sm:$0xff]  ;;  %v9652_v25 = vld [vmem:[#allocation59_spill] sm:$0xff]  ;;  %v9655_v17 = vld [vmem:[#allocation64_spill] sm:$0xff] }
 0x2ee   : > { %v6019_v38 = vmul.f32 -1.442695, %v2483_v16  ;;  %v9656_v16 = vld [vmem:[#allocation66_spill] sm:$0xff] }
 0x2ef   : > { %v2481_v36 = vadd.f32 %v2480_v33, %v9115_v55  ;;  %v9657_v33 = vld [vmem:[#allocation68_spill] sm:$0xff] }
 0x2f0   : > { %7451 = vpow2.f32 %v6019_v38  ;;  %v9658_v38 = vld [vmem:[#allocation70_spill] sm:$0xff] }
 0x2f1   : > { %7453 = vtanh.f32 %v2481_v36  ;;  %v9659_v36 = vld [vmem:[#allocation72_spill] sm:$0xff] }
 0x2f2   : > { %7455 = vpow2.f32 %v6020_v30  ;;  %v9660_v30 = vld [vmem:[#allocation74_spill] sm:$0xff] }
 0x2fa   : > { %v7452_v3 = vpop.eup %7451 }
 0x2fb   : > { %v7454_v18 = vpop.eup %7453  ;;  %v2487_v20 = vadd.f32 1.0, %v7452_v3  ;;  %v7397_v3 = vld [vmem:[#allocation16 + $0x4] ss:$8 sps:$4 sm:$0xff]  }
 0x2fc   : > { %v2502_v26 = vmul.f32 %v7454_v18, %v2501_v14  ;;  %v7456_v56 = vpop.eup %7455  ;;  %v3044_v14 = vld [vmem:[#allocation17 + $0x8] sm:$0xff]  ;;  %v3046_v18 = vld [vmem:[#allocation17 + $0x18] sm:$0xff]  ;;  %2996 = vmatprep.subr.bf16.mxu0 %v7397_v3 }
 0x2fd   : > { %7457 = vrcp.f32 %v2487_v20  ;;  %v2494_v55 = vadd.f32 1.0, %v7456_v56  ;;  %v3043_v20 = vld [vmem:[#allocation17] sm:$0xff]  ;;  %v3068_v3 = vld [vmem:[#allocation17 + $0xc8] sm:$0xff] }
 0x2fe   : > { %v9147_v48 = vadd.f32 %v2503_v28, %v2502_v26  ;;  %v3045_v26 = vld [vmem:[#allocation17 + $0x10] sm:$0xff]  ;;  %v3047_v56 = vld [vmem:[#allocation17 + $0x20] sm:$0xff] }
 0x2ff   : > { %7459 = vrcp.f32 %v2494_v55  ;;  %v7400_v28 = vld [vmem:[#allocation16 + $0x14] ss:$8 sps:$4 sm:$0xff]  }
 0x300   : > { %v3049_v55 = vld [vmem:[#allocation17 + $0x30] sm:$0xff] }
 0x307   : > { %v7458_v29 = vpop.eup %7457 }
 0x308   : > { %v2498_v54 = vmul.f32 %v7458_v29, %v2497_v23  ;;  %v7403_v29 = vld [vmem:[#allocation16 + $0x24] ss:$8 sps:$4 sm:$0xff]  }
 0x309   : > { %v7460_v13 = vpop.eup %7459 }
 0x30a   : > { %v2499_v35 = vadd.f32 %v2498_v54, %v2025_v37  ;;  %v2505_v4 = vsub.f32 1.0, %v7460_v13  ;;  %v2507_v39 = vmul.f32 0.0, %v7460_v13  ;;  %v9636_v37 = vld [vmem:[#allocation43_spill] sm:$0xff]  ;;  %v3054_v13 = vld [vmem:[#allocation17 + $0x58] sm:$0xff] }
 0x30b   : > { %v3052_v54 = vld [vmem:[#allocation17 + $0x48] sm:$0xff] }
 0x30c   : > { %7461 = vtanh.f32 %v2499_v35  ;;  %v9203_v35 = vpack.c.bf16 %v3049_v55, %v3047_v56  ;;  %v3074_v56 = vld [vmem:[#allocation17 + $0xf8] sm:$0xff] }
 0x316   : > { %v7462_v46 = vpop.eup %7461 }
 0x317   : > { %v2506_v63 = vmul.f32 %v7462_v46, %v2505_v4  ;;  %v9206_v4 = vpack.c.bf16 %v3054_v13, %v3052_v54  ;;  %v3051_v46 = vld [vmem:[#allocation17 + $0x40] sm:$0xff]  ;;  %v3073_v54 = vld [vmem:[#allocation17 + $0xf0] sm:$0xff] }
 0x319   : > { %v9155_v50 = vadd.f32 %v2507_v39, %v2506_v63  ;;  %v3053_v63 = vld [vmem:[#allocation17 + $0x50] sm:$0xff]  ;;  %v7401_v39 = vld [vmem:[#allocation16 + $0x20] ss:$8 sps:$4 sm:$0xff]  }
 0x31b   : > { %2591 = vmatprep.mubr.f32.mxu1 %v9155_v50  ;;  %2662 = vmatprep.mubr.f32.mxu0 %v9155_v50 }
 0x31c   : > { %2592 = vmatmul.mubr.f32.vlgmr.msra.gmra.mrb[18].mxu1 %v9147_v48  ;;  %2663 = vmatmul.mubr.f32.vlgmr.msra.gmra.mrb[16].mxu0 %v9147_v48 }
 0x31d   : > { %6823 = vmatpush1.bf16.msra.mxu1 %v9635_v21  ;;  %2733 = vmatprep.mubr.f32.mxu1 %v9155_v50  ;;  %v3056_v21 = vld [vmem:[#allocation17 + $0x68] sm:$0xff] }
 0x31e   : > { %6825 = vmatprep.subr.bf16.mxu1 %v9636_v37  ;;  %2997 = vmatpush1.bf16.msra.mxu0 %v7395_v47  ;;  %v3058_v37 = vld [vmem:[#allocation17 + $0x78] sm:$0xff]  ;;  %v7413_v47 = vld [vmem:[#allocation16 + $0x60] ss:$8 sps:$4 sm:$0xff]  }
 0x31f   : > { %2998 = vmatprep.subr.bf16.mxu0 %v7400_v28  ;;  %v7418_v28 = vld [vmem:[#allocation16 + $0x74] ss:$8 sps:$4 sm:$0xff]  }
 0x321   : > { %6827 = vmatpush1.bf16.msra.mxu1 %v9637_v45  ;;  %v7406_v45 = vld [vmem:[#allocation16 + $0x34] ss:$8 sps:$4 sm:$0xff]  }
 0x322   : > { %6829 = vmatprep.subr.bf16.mxu1 %v9638_v53  ;;  %v9209_v53 = vpack.c.bf16 %v3053_v63, %v3051_v46  ;;  %v7421_v46 = vld [vmem:[#allocation16 + $0x84] ss:$8 sps:$4 sm:$0xff]   ;;  %v7419_v63 = vld [vmem:[#allocation16 + $0x80] ss:$8 sps:$4 sm:$0xff]  }
 0x325   : > { %6831 = vmatpush1.bf16.msra.mxu1 %v9639_v60  ;;  %v9212_v60 = vpack.c.bf16 %v3058_v37, %v3056_v21  ;;  %v3078_v21 = vld [vmem:[#allocation17 + $0x118] sm:$0xff] }
 0x326   : > { %6833 = vmatprep.subr.bf16.mxu1 %v9640_v62  ;;  %v3055_v62 = vld [vmem:[#allocation17 + $0x60] sm:$0xff] }
 0x329   : > { %6835 = vmatpush1.bf16.msra.mxu1 %v9641_v9  ;;  %v3057_v9 = vld [vmem:[#allocation17 + $0x70] sm:$0xff] }
 0x32a   : > { %6837 = vmatprep.subr.bf16.mxu1 %v9642_v12  ;;  %v7404_v12 = vld [vmem:[#allocation16 + $0x30] ss:$8 sps:$4 sm:$0xff]  }
 0x32d   : > { %6839 = vmatpush1.bf16.msra.mxu1 %v9643_v8  ;;  %v3060_v8 = vld [vmem:[#allocation17 + $0x88] sm:$0xff] }
 0x32e   : > { %6841 = vmatprep.subr.bf16.mxu1 %v9644_v19  ;;  %v3062_v19 = vld [vmem:[#allocation17 + $0x98] sm:$0xff] }
 0x331   : > { %6843 = vmatpush1.bf16.msra.mxu1 %v9645_v22  ;;  %v7409_v22 = vld [vmem:[#allocation16 + $0x44] ss:$8 sps:$4 sm:$0xff]  }
 0x332   : > { %6845 = vmatprep.subr.bf16.mxu1 %v9646_v58  ;;  %v9215_v58 = vpack.c.bf16 %v3057_v9, %v3055_v62  ;;  %v3077_v62 = vld [vmem:[#allocation17 + $0x110] sm:$0xff] }
 0x335   : > { %6847 = vmatpush1.bf16.msra.mxu1 %v9647_v57  ;;  %v9218_v57 = vpack.c.bf16 %v3062_v19, %v3060_v8  ;;  %v7422_v8 = vld [vmem:[#allocation16 + $0x90] ss:$8 sps:$4 sm:$0xff]   ;;  %v3080_v19 = vld [vmem:[#allocation17 + $0x128] sm:$0xff] }
 0x336   : > { %6849 = vmatprep.subr.bf16.mxu1 %v9648_v32  ;;  %v3059_v32 = vld [vmem:[#allocation17 + $0x80] sm:$0xff] }
 0x339   : > { %6851 = vmatpush1.bf16.msra.mxu1 %v9649_v40  ;;  %v3061_v40 = vld [vmem:[#allocation17 + $0x90] sm:$0xff] }
 0x33a   : > { %6853 = vmatprep.subr.bf16.mxu1 %v9650_v27  ;;  %v7407_v27 = vld [vmem:[#allocation16 + $0x40] ss:$8 sps:$4 sm:$0xff]  }
 0x33d   : > { %6855 = vmatpush1.bf16.msra.mxu1 %v9651_v6  ;;  %v3064_v6 = vld [vmem:[#allocation17 + $0xa8] sm:$0xff] }
 0x33e   : > { %6857 = vmatprep.subr.bf16.mxu1 %v9652_v25  ;;  %v3066_v25 = vld [vmem:[#allocation17 + $0xb8] sm:$0xff] }
 0x341   : > { %6859 = vmatpush1.bf16.msra.mxu1 %v9653_v44  ;;  %v7412_v44 = vld [vmem:[#allocation16 + $0x54] ss:$8 sps:$4 sm:$0xff]  }
 0x342   : > { %6861 = vmatprep.subr.bf16.mxu1 %v9654_v24  ;;  %v9221_v24 = vpack.c.bf16 %v3061_v40, %v3059_v32  ;;  %v3079_v40 = vld [vmem:[#allocation17 + $0x120] sm:$0xff] }
 0x345   : > { %6863 = vmatpush1.bf16.msra.mxu1 %v9655_v17  ;;  %v9224_v17 = vpack.c.bf16 %v3066_v25, %v3064_v6  ;;  %v7427_v25 = vld [vmem:[#allocation16 + $0xa4] ss:$8 sps:$4 sm:$0xff]  }
 0x346   : > { %6865 = vmatprep.subr.bf16.mxu1 %v9656_v16  ;;  %v3063_v16 = vld [vmem:[#allocation17 + $0xa0] sm:$0xff] }
 0x349   : > { %6867 = vmatpush1.bf16.msra.mxu1 %v9657_v33  ;;  %v3065_v33 = vld [vmem:[#allocation17 + $0xb0] sm:$0xff] }
 0x34a   : > { %6869 = vmatprep.subr.bf16.mxu1 %v9658_v38  ;;  %v7410_v38 = vld [vmem:[#allocation16 + $0x50] ss:$8 sps:$4 sm:$0xff]  }
 0x34d   : > { %6871 = vmatpush1.bf16.msra.mxu1 %v9659_v36  ;;  %v7415_v36 = vld [vmem:[#allocation16 + $0x64] ss:$8 sps:$4 sm:$0xff]  }
 0x34e   : > { %6873 = vmatprep.subr.bf16.mxu1 %v9660_v30  ;;  %v9227_v30 = vpack.c.bf16 %v3065_v33, %v3063_v16  ;;  %v3084_v16 = vld [vmem:[#allocation17 + $0x148] sm:$0xff]  ;;  %v3086_v33 = vld [vmem:[#allocation17 + $0x158] sm:$0xff] }
 0x351   : > { %6875 = vmatpush1.bf16.msra.mxu1 %v8988_v61  ;;  %v9195_v61 = vpack.c.bf16 %v3046_v18, %v3044_v14  ;;  %v3070_v14 = vld [vmem:[#allocation17 + $0xd8] sm:$0xff] }
 0x352   : > { %6877 = vmatprep.subr.bf16.mxu1 %v8994_v34  ;;  %v9197_v34 = vpack.c.bf16 %v3045_v26, %v3043_v20  ;;  %v9231_v18 = vpack.c.bf16 %v3070_v14, %v3068_v3  ;;  %v3067_v20 = vld [vmem:[#allocation17 + $0xc0] sm:$0xff]  ;;  %v3069_v26 = vld [vmem:[#allocation17 + $0xd0] sm:$0xff] }
 0x353   : > { %v7430_v14 = vld [vmem:[#allocation16 + $0xb4] ss:$8 sps:$4 sm:$0xff]  }
 0x355   : > { %6879 = vmatpush1.bf16.msra.mxu1 %v9006_v52  ;;  %v7398_v52 = vld [vmem:[#allocation16 + $0x10] ss:$8 sps:$4 sm:$0xff]  }
 0x356   : > { %6881 = vmatprep.subr.bf16.mxu1 %v9014_v31  ;;  %v3048_v31 = vld [vmem:[#allocation17 + $0x28] sm:$0xff]  ;;  %2999 = vmatpush1.bf16.msra.mxu0 %v7398_v52  ;;  %v9233_v52 = vpack.c.bf16 %v3069_v26, %v3067_v20  ;;  %v7428_v20 = vld [vmem:[#allocation16 + $0xb0] ss:$8 sps:$4 sm:$0xff]  }
 0x357   : > { %3000 = vmatprep.subr.bf16.mxu0 %v7403_v29  ;;  %v3071_v29 = vld [vmem:[#allocation17 + $0xe0] sm:$0xff]  ;;  %v3088_v26 = vld [vmem:[#allocation17 + $0x168] sm:$0xff] }
 0x358   : > { %v9239_v13 = vpack.c.bf16 %v3073_v54, %v3071_v29  ;;  %v7431_v29 = vld [vmem:[#allocation16 + $0xc0] ss:$8 sps:$4 sm:$0xff]  }
 0x359   : > { %6883 = vmatpush1.bf16.msra.mxu1 %v9020_v7  ;;  %v3050_v7 = vld [vmem:[#allocation17 + $0x38] sm:$0xff] }
 0x35a   : > { %6885 = vmatprep.subr.bf16.mxu1 %v9195_v61  ;;  %v9200_v23 = vpack.c.bf16 %v3050_v7, %v3048_v31  ;;  %3001 = vmatpush1.bf16.msra.mxu0 %v7401_v39  ;;  %v7416_v31 = vld [vmem:[#allocation16 + $0x70] ss:$8 sps:$4 sm:$0xff]   ;;  %v3072_v7 = vld [vmem:[#allocation17 + $0xe8] sm:$0xff] }
 0x35b   : > { %3002 = vmatprep.subr.bf16.mxu0 %v7406_v45  ;;  %v9237_v55 = vpack.c.bf16 %v3074_v56, %v3072_v7  ;;  %v3076_v39 = vld [vmem:[#allocation17 + $0x108] sm:$0xff]  ;;  %v3075_v45 = vld [vmem:[#allocation17 + $0x100] sm:$0xff]  ;;  %v3089_v56 = vld [vmem:[#allocation17 + $0x170] sm:$0xff] }
 0x35c   : > { %2734 = vmatmul.mubr.f32.vlgmr.msra.gmra.mrb[20].mxu1 %v9147_v48  ;;  %v9243_v37 = vpack.c.bf16 %v3078_v21, %v3076_v39  ;;  %v9245_v9 = vpack.c.bf16 %v3077_v62, %v3075_v45  ;;  %v3087_v7 = vld [vmem:[#allocation17 + $0x160] sm:$0xff]  ;;  %v3094_v39 = vld [vmem:[#allocation17 + $0x198] sm:$0xff]  ;;  %v3093_v62 = vld [vmem:[#allocation17 + $0x190] sm:$0xff] }
 0x35d   : > { %3171 = vmatprep.mubr.f32.mxu1 %v9611_v49  ;;  %6887 = vmatpush1.bf16.msra.mxu1 %v9197_v34  ;;  %v9263_v54 = vpack.c.bf16 %v3089_v56, %v3087_v7  ;;  %v3091_v45 = vld [vmem:[#allocation17 + $0x180] sm:$0xff]  ;;  %v3104_v7 = vld [vmem:[#allocation17 + $0x1e8] sm:$0xff]  ;;  %v3106_v56 = vld [vmem:[#allocation17 + $0x1f8] sm:$0xff] }
 0x35e   : > { %6889 = vmatprep.subr.bf16.mxu1 %v9200_v23  ;;  %3003 = vmatpush1.bf16.msra.mxu0 %v7404_v12  ;;  %v7424_v12 = vld [vmem:[#allocation16 + $0x94] ss:$8 sps:$4 sm:$0xff]  }
 0x35f   : > { %3004 = vmatprep.subr.bf16.mxu0 %v7409_v22  ;;  %v3082_v22 = vld [vmem:[#allocation17 + $0x138] sm:$0xff] }
 0x360   : > { %v9249_v32 = vpack.c.bf16 %v3082_v22, %v3080_v19  ;;  %v3096_v19 = vld [vmem:[#allocation17 + $0x1a8] sm:$0xff]  ;;  %v3098_v22 = vld [vmem:[#allocation17 + $0x1b8] sm:$0xff] }
 0x361   : > { %6891 = vmatpush1.bf16.msra.mxu1 %v9203_v35 }
 0x362   : > { %6893 = vmatprep.subr.bf16.mxu1 %v9206_v4  ;;  %3005 = vmatpush1.bf16.msra.mxu0 %v7407_v27  ;;  %v3081_v27 = vld [vmem:[#allocation17 + $0x130] sm:$0xff] }
 0x363   : > { %3006 = vmatprep.subr.bf16.mxu0 %v7412_v44  ;;  %v9251_v6 = vpack.c.bf16 %v3081_v27, %v3079_v40  ;;  %v7425_v44 = vld [vmem:[#allocation16 + $0xa0] ss:$8 sps:$4 sm:$0xff]   ;;  %v9272_v40 = vpack.c.bf16 %v3098_v22, %v3096_v19 }
 0x364   : > { %v3095_v27 = vld [vmem:[#allocation17 + $0x1a0] sm:$0xff] }
 0x365   : > { %6895 = vmatpush1.bf16.msra.mxu1 %v9209_v53 }
 0x366   : > { %6897 = vmatprep.subr.bf16.mxu1 %v9212_v60  ;;  %3007 = vmatpush1.bf16.msra.mxu0 %v7410_v38  ;;  %v9255_v38 = vpack.c.bf16 %v3086_v33, %v3084_v16  ;;  %v3100_v16 = vld [vmem:[#allocation17 + $0x1c8] sm:$0xff]  ;;  %v3102_v33 = vld [vmem:[#allocation17 + $0x1d8] sm:$0xff] }
 0x367   : > { %3008 = vmatprep.subr.bf16.mxu0 %v7415_v36  ;;  %v3083_v36 = vld [vmem:[#allocation17 + $0x140] sm:$0xff] }
 0x369   : > { %6899 = vmatpush1.bf16.msra.mxu1 %v9215_v58 }
 0x36a   : > { %6901 = vmatprep.subr.bf16.mxu1 %v9218_v57  ;;  %3009 = vmatpush1.bf16.msra.mxu0 %v7413_v47  ;;  %v3085_v47 = vld [vmem:[#allocation17 + $0x150] sm:$0xff] }
 0x36b   : > { %3010 = vmatprep.subr.bf16.mxu0 %v7418_v28  ;;  %v9257_v3 = vpack.c.bf16 %v3085_v47, %v3083_v36  ;;  %v3090_v28 = vld [vmem:[#allocation17 + $0x178] sm:$0xff]  ;;  %v7439_v36 = vld [vmem:[#allocation16 + $0xe4] ss:$8 sps:$4 sm:$0xff]  }
 0x36d   : > { %6903 = vmatpush1.bf16.msra.mxu1 %v9221_v24 }
 0x36e   : > { %6905 = vmatprep.subr.bf16.mxu1 %v9224_v17  ;;  %3011 = vmatpush1.bf16.msra.mxu0 %v7416_v31  ;;  %v9261_v31 = vpack.c.bf16 %v3090_v28, %v3088_v26  ;;  %v3101_v26 = vld [vmem:[#allocation17 + $0x1d0] sm:$0xff]  ;;  %v7437_v28 = vld [vmem:[#allocation16 + $0xe0] ss:$8 sps:$4 sm:$0xff]  }
 0x36f   : > { %3012 = vmatprep.subr.bf16.mxu0 %v7421_v46  ;;  %v7433_v46 = vld [vmem:[#allocation16 + $0xc4] ss:$8 sps:$4 sm:$0xff]  }
 0x371   : > { %6907 = vmatpush1.bf16.msra.mxu1 %v9227_v30 }
 0x372   : > { %6909 = vmatprep.subr.bf16.mxu1 %v9231_v18  ;;  %3013 = vmatpush1.bf16.msra.mxu0 %v7419_v63  ;;  %v3092_v63 = vld [vmem:[#allocation17 + $0x188] sm:$0xff] }
 0x373   : > { %3014 = vmatprep.subr.bf16.mxu0 %v7424_v12  ;;  %v9266_v21 = vpack.c.bf16 %v3094_v39, %v3092_v63  ;;  %v9269_v12 = vpack.c.bf16 %v3093_v62, %v3091_v45  ;;  %v9284_v63 = vpack.c.bf16 %v3106_v56, %v3104_v7  ;;  %v7440_v39 = vld [vmem:[#allocation16 + $0xf0] ss:$8 sps:$4 sm:$0xff]   ;;  %v3103_v45 = vld [vmem:[#allocation17 + $0x1e0] sm:$0xff] }
 0x374   : > { %v3105_v62 = vld [vmem:[#allocation17 + $0x1f0] sm:$0xff] }
 0x375   : > { %6911 = vmatpush1.bf16.msra.mxu1 %v9233_v52 }
 0x376   : > { %6913 = vmatprep.subr.bf16.mxu1 %v9237_v55  ;;  %3015 = vmatpush1.bf16.msra.mxu0 %v7422_v8  ;;  %v7436_v8 = vld [vmem:[#allocation16 + $0xd4] ss:$8 sps:$4 sm:$0xff]  }
 0x377   : > { %3016 = vmatprep.subr.bf16.mxu0 %v7427_v25  ;;  %v3097_v25 = vld [vmem:[#allocation17 + $0x1b0] sm:$0xff] }
 0x378   : > { %v9275_v47 = vpack.c.bf16 %v3097_v25, %v3095_v27 }
 0x379   : > { %6915 = vmatpush1.bf16.msra.mxu1 %v9239_v13 }
 0x37a   : > { %6917 = vmatprep.subr.bf16.mxu1 %v9243_v37  ;;  %3017 = vmatpush1.bf16.msra.mxu0 %v7425_v44  ;;  %v7434_v44 = vld [vmem:[#allocation16 + $0xd0] ss:$8 sps:$4 sm:$0xff]  }
 0x37b   : > { %3018 = vmatprep.subr.bf16.mxu0 %v7430_v14  ;;  %v9278_v14 = vpack.c.bf16 %v3102_v33, %v3100_v16 }
 0x37d   : > { %6919 = vmatpush1.bf16.msra.mxu1 %v9245_v9 }
 0x37e   : > { %6921 = vmatprep.subr.bf16.mxu1 %v9249_v32  ;;  %3019 = vmatpush1.bf16.msra.mxu0 %v7428_v20  ;;  %v3099_v20 = vld [vmem:[#allocation17 + $0x1c0] sm:$0xff] }
 0x37f   : > { %3020 = vmatprep.subr.bf16.mxu0 %v7433_v46  ;;  %v9281_v46 = vpack.c.bf16 %v3101_v26, %v3099_v20 }
 0x381   : > { %6923 = vmatpush1.bf16.msra.mxu1 %v9251_v6 }
 0x382   : > { %6925 = vmatprep.subr.bf16.mxu1 %v9255_v38  ;;  %3021 = vmatpush1.bf16.msra.mxu0 %v7431_v29  ;;  %v7442_v29 = vld [vmem:[#allocation16 + $0xf4] ss:$8 sps:$4 sm:$0xff]  }
 0x383   : > { %3022 = vmatprep.subr.bf16.mxu0 %v7436_v8  ;;  %v9288_v8 = vpack.c.bf16 %v3105_v62, %v3103_v45 }
 0x385   : > { %6927 = vmatpush1.bf16.msra.mxu1 %v9257_v3 }
 0x386   : > { %6929 = vmatprep.subr.bf16.mxu1 %v9261_v31  ;;  %3023 = vmatpush1.bf16.msra.mxu0 %v7434_v44 }
 0x387   : > { %3024 = vmatprep.subr.bf16.mxu0 %v7439_v36 }
 0x389   : > { %6931 = vmatpush1.bf16.msra.mxu1 %v9263_v54 }
 0x38a   : > { %6933 = vmatprep.subr.bf16.mxu1 %v9266_v21  ;;  %3025 = vmatpush1.bf16.msra.mxu0 %v7437_v28 }
 0x38b   : > { %3026 = vmatprep.subr.bf16.mxu0 %v7442_v29 }
 0x38d   : > { %6935 = vmatpush1.bf16.msra.mxu1 %v9269_v12 }
 0x38e   : > { %6937 = vmatprep.subr.bf16.mxu1 %v9272_v40  ;;  %3027 = vmatpush1.bf16.msra.mxu0 %v7440_v39 }
 0x38f   : > { %6949 = vmatprep.subr.bf16.mxu0 %v9195_v61 }
 0x391   : > { %6939 = vmatpush1.bf16.msra.mxu1 %v9275_v47 }
 0x392   : > { %6941 = vmatprep.subr.bf16.mxu1 %v9278_v14 }
 0x395   : > { %6943 = vmatpush1.bf16.msra.mxu1 %v9281_v46 }
 0x396   : > { %6945 = vmatprep.subr.bf16.mxu1 %v9284_v63 }
 0x399   : > { %6947 = vmatpush1.bf16.msra.mxu1 %v9288_v8 }
 0x39c   : > { %3172 = vmatmul.mubr.f32.vlgmr.msra.gmra.mrb[22].mxu1 %v9611_v49 }
 0x3ef   : > { %v2593_v19 = vpop.f32.mrb[18].mxu1  ;;  %v2664_v22 = vpop.f32.mrb[16].mxu0 }
 0x3f0   : > { %v2740_v27 = vadd.f32 %v2593_v19, %v9078_v43  ;;  %v2595_v25 = vpop.f32.mrb[19].mxu1  ;;  %v2666_v44 = vpop.f32.mrb[17].mxu0  ;;  %v2754_v49 = vadd.f32 %v9143_v5, %v2664_v22 }
 0x3f1   : > { %v2747_v16 = vadd.f32 %v2595_v25, %v9083_v2  ;;  %v2758_v33 = vadd.f32 %v9134_v41, %v2666_v44 }
 0x3f2   : > { %v6021_v36 = vmul.f32 -1.442695, %v2740_v27 }
 0x3f3   : > { %v6022_v20 = vmul.f32 -1.442695, %v2747_v16  ;;  %v6023_v2 = vmul.f32 -1.442695, %v2758_v33 }
 0x3f4   : > { %7463 = vpow2.f32 %v6021_v36 }
 0x3f5   : > { %7465 = vpow2.f32 %v6022_v20 }
 0x3fe   : > { %v7464_v26 = vpop.eup %7463 }
 0x3ff   : > { %v2744_v61 = vadd.f32 1.0, %v7464_v26  ;;  %v7466_v28 = vpop.eup %7465 }
 0x400   : > { %v2751_v7 = vadd.f32 1.0, %v7466_v28 }
 0x401   : > { %7467 = vrcp.f32 %v2744_v61 }
 0x402   : > { %7469 = vrcp.f32 %v2751_v7 }
 0x40b   : > { %v7468_v56 = vpop.eup %7467 }
 0x40c   : > { %v2755_v29 = vmul.f32 %v7468_v56, %v2754_v49  ;;  %v7470_v39 = vpop.eup %7469 }
 0x40d   : > { %v2776_v41 = vsub.f32 1.0, %v7470_v39  ;;  %v2778_v19 = vmul.f32 %v7470_v39, %v9147_v48 }
 0x40e   : > { %v2756_v43 = vadd.f32 %v2755_v29, %v9119_v10 }
 0x410   : > { %7471 = vtanh.f32 %v2756_v43 }
 0x411   : > { %7473 = vpow2.f32 %v6023_v2 }
 0x41a   : > { %v7472_v45 = vpop.eup %7471 }
 0x41b   : > { %v2777_v62 = vmul.f32 %v7472_v45, %v2776_v41  ;;  %v7474_v25 = vpop.eup %7473 }
 0x41c   : > { %v2762_v44 = vadd.f32 1.0, %v7474_v25 }
 0x41d   : > { %v2779_v27 = vadd.f32 %v2778_v19, %v2777_v62 }
 0x41e   : > { %7475 = vrcp.f32 %v2762_v44 }
 0x428   : > { %v7476_v10 = vpop.eup %7475 }
 0x42f   : > { %v2735_v16 = vpop.f32.mrb[20].mxu1 }
 0x430   : > { %v2765_v5 = vadd.f32 %v9137_v51, %v2735_v16  ;;  %v2737_v22 = vpop.f32.mrb[21].mxu1 }
 0x431   : > { %v2772_v36 = vadd.f32 %v9152_v15, %v2737_v22  ;;  %v2790_v15 = vpack.c.bf16 %v2779_v27, %v9147_v48 }
 0x432   : > { %v6024_v20 = vmul.f32 -1.442695, %v2765_v5 }
 0x433   : > { %v2773_v33 = vmul.f32 %v7476_v10, %v2772_v36 }
 0x434   : > { %7477 = vpow2.f32 %v6024_v20 }
 0x435   : > { %v2774_v26 = vadd.f32 %v2773_v33, %v9130_v42 }
 0x43e   : > { %v7478_v61 = vpop.eup %7477 }
 0x43f   : > { %v2769_v28 = vadd.f32 1.0, %v7478_v61 }
 0x441   : > { %7479 = vrcp.f32 %v2769_v28 }
 0x442   : > { %7481 = vtanh.f32 %v2774_v26 }
 0x44b   : > { %v7480_v7 = vpop.eup %7479 }
 0x44c   : > { %v2780_v49 = vsub.f32 1.0, %v7480_v7  ;;  %v7482_v56 = vpop.eup %7481  ;;  %v2782_v43 = vmul.f32 %v7480_v7, %v9155_v50 }
 0x44e   : > { %v2781_v29 = vmul.f32 %v7482_v56, %v2780_v49 }
 0x450   : > { %v2783_v51 = vadd.f32 %v2782_v43, %v2781_v29 }
 0x452   : > { %v2791_v2 = vpack.c.bf16 %v9155_v50, %v2783_v51  ;;  %v2824_v50 = vld [vmem:[%s9661_s19] sm:$0x3] }
 0x454   : > { %3028 = vmatprep.mubr.bf16.mxu0 %v2791_v2 }
 0x455   : > { %3029 = vmatmul.mubr.bf16.vlgmr.msra.gmra.mrb[20].mxu0 %v2790_v15 }
 0x456   : > { %6951 = vmatpush1.bf16.msra.mxu0 %v9197_v34  ;;  %v2829_v34 = vrot.slane %v2824_v50, %v9045_v1 }
 0x457   : > { %6953 = vmatprep.subr.bf16.mxu0 %v9200_v23  ;;  %v2833_v23 = vrot.slane %v2824_v50, %v9051_v11 }
 0x45a   : > { %6955 = vmatpush1.bf16.msra.mxu0 %v9203_v35 }
 0x45b   : > { %6957 = vmatprep.subr.bf16.mxu0 %v9206_v4 }
 0x45e   : > { %6959 = vmatpush1.bf16.msra.mxu0 %v9209_v53 }
 0x45f   : > { %6961 = vmatprep.subr.bf16.mxu0 %v9212_v60 }
 0x462   : > { %6963 = vmatpush1.bf16.msra.mxu0 %v9215_v58 }
 0x463   : > { %6965 = vmatprep.subr.bf16.mxu0 %v9218_v57 }
 0x466   : > { %6967 = vmatpush1.bf16.msra.mxu0 %v9221_v24 }
 0x467   : > { %6969 = vmatprep.subr.bf16.mxu0 %v9224_v17 }
 0x46a   : > { %6971 = vmatpush1.bf16.msra.mxu0 %v9227_v30 }
 0x46b   : > { %6973 = vmatprep.subr.bf16.mxu0 %v9231_v18 }
 0x46e   : > { %6975 = vmatpush1.bf16.msra.mxu0 %v9233_v52 }
 0x46f   : > { %6977 = vmatprep.subr.bf16.mxu0 %v9237_v55  ;;  %v3173_v42 = vpop.f32.mrb[22].mxu1 }
 0x470   : > { %v3175_v48 = vpop.f32.mrb[23].mxu1 }
 0x472   : > { %6979 = vmatpush1.bf16.msra.mxu0 %v9239_v13 }
 0x473   : > { %6981 = vmatprep.subr.bf16.mxu0 %v9243_v37 }
 0x476   : > { %6983 = vmatpush1.bf16.msra.mxu0 %v9245_v9 }
 0x477   : > { %6985 = vmatprep.subr.bf16.mxu0 %v9249_v32 }
 0x47a   : > { %6987 = vmatpush1.bf16.msra.mxu0 %v9251_v6 }
 0x47b   : > { %6989 = vmatprep.subr.bf16.mxu0 %v9255_v38 }
 0x47e   : > { %6991 = vmatpush1.bf16.msra.mxu0 %v9257_v3 }
 0x47f   : > { %6993 = vmatprep.subr.bf16.mxu0 %v9261_v31 }
 0x482   : > { %6995 = vmatpush1.bf16.msra.mxu0 %v9263_v54 }
 0x483   : > { %6997 = vmatprep.subr.bf16.mxu0 %v9266_v21 }
 0x486   : > { %6999 = vmatpush1.bf16.msra.mxu0 %v9269_v12 }
 0x487   : > { %7001 = vmatprep.subr.bf16.mxu0 %v9272_v40 }
 0x48a   : > { %7003 = vmatpush1.bf16.msra.mxu0 %v9275_v47 }
 0x48b   : > { %7005 = vmatprep.subr.bf16.mxu0 %v9278_v14 }
 0x48e   : > { %7007 = vmatpush1.bf16.msra.mxu0 %v9281_v46 }
 0x48f   : > { %7009 = vmatprep.subr.bf16.mxu0 %v9284_v63 }
 0x492   : > { %7011 = vmatpush1.bf16.msra.mxu0 %v9288_v8 }
 0x528   : > { %v3030_v35 = vpop.f32.mrb[20].mxu0 }
 0x529   : > { %v3031_v4 = vadd.f32 %v3030_v35, %v2829_v34  ;;  %v3032_v53 = vpop.f32.mrb[21].mxu0 }
 0x52a   : > { %v3033_v60 = vadd.f32 %v3032_v53, %v2833_v23  ;;  %v3034_v58 = vpop.f32.mrb[22].mxu0  ;;  %v8272_v53 = vmov (!%p9662_p5), -inf  }
 0x52b   : > { %v3035_v57 = vadd.f32 %v3034_v58, %v2829_v34  ;;  %v3181_v24 = vadd.f32 %v3173_v42, %v3031_v4  ;;  %v3036_v17 = vpop.f32.mrb[23].mxu0  ;;  %3325 = vst [vmem:[#allocation6] sm:$0xf] (!%p9662_p5), %v8272_v53 }
 0x52c   : > { %v3037_v30 = vadd.f32 %v3036_v17, %v2833_v23 }
 0x52d   : > { %7483 = vtanh.f32 %v3181_v24 }
 0x52e   : > { %v3186_v18 = vadd.f32 %v3175_v48, %v3037_v30 }
 0x530   : > { %7485 = vtanh.f32 %v3186_v18 }
 0x537   : > { %v7484_v52 = vpop.eup %7483 }
 0x538   : > { %v3273_v55 = vrot.slane %v7484_v52, 4 }
 0x53a   : > { %v7486_v13 = vpop.eup %7485  ;;  %v3274_v37 = vmax.f32 %v7484_v52, %v3273_v55  ;;  %v3298_v9 = vadd.f32 %v7484_v52, %v3273_v55 }
 0x53b   : > { %v3291_v32 = vrot.slane %v7486_v13, 4  ;;  %3254 = vmatprep.mubr.f32.mxu0 %v7486_v13 }
 0x53c   : > { %v3275_v6 = vrot.slane %v3274_v37, 2  ;;  %v3299_v38 = vrot.slane %v3298_v9, 2  ;;  %3255 = vmatmul.mubr.f32.vlgmr.msra.gmra.mrb[18].mxu0 %v7484_v52 }
 0x53d   : > { %v3292_v3 = vmax.f32 %v7486_v13, %v3291_v32  ;;  %v3316_v31 = vadd.f32 %v7486_v13, %v3291_v32 }
 0x53e   : > { %v3276_v54 = vmax.f32 %v3274_v37, %v3275_v6  ;;  %v3300_v21 = vadd.f32 %v3299_v38, %v3298_v9 }
 0x53f   : > { %v3293_v12 = vrot.slane %v3292_v3, 2  ;;  %v3317_v40 = vrot.slane %v3316_v31, 2 }
 0x540   : > { %v3277_v47 = vrot.slane %v3276_v54, 1  ;;  %v3301_v14 = vrot.slane %v3300_v21, 1 }
 0x541   : > { %v3294_v46 = vmax.f32 %v3292_v3, %v3293_v12  ;;  %v3318_v63 = vadd.f32 %v3317_v40, %v3316_v31 }
 0x542   : > { %v3278_v8 = vmax.f32 %v3276_v54, %v3277_v47  ;;  %v3302_v39 = vadd.f32 %v3301_v14, %v3300_v21 }
 0x543   : > { %v3295_v41 = vrot.slane %v3294_v46, 1  ;;  %v3319_v45 = vrot.slane %v3318_v63, 1 }
 0x545   : > { %v3296_v62 = vmax.f32 %v3294_v46, %v3295_v41  ;;  %v3320_v19 = vadd.f32 %v3319_v45, %v3318_v63 }
 0x60f   : > { %v3256_v27 = vpop.f32.mrb[18].mxu0 }
 0x610   : > { %v3262_v25 = vadd.f32 %v3256_v27, %v3035_v57  ;;  %v3258_v44 = vpop.f32.mrb[19].mxu0 }
 0x611   : > { %v3265_v16 = vadd.f32 %v3258_v44, %v3033_v60  ;;  %v8273_v60 = vmov (!%p9662_p5), 0.0  }
 0x612   : > { %7487 = vtanh.f32 %v3262_v25  ;;  %3326 = vst [vmem:[#allocation7] sm:$0xf] (!%p9662_p5), %v8273_v60 }
 0x613   : > { %7489 = vtanh.f32 %v3265_v16 }
 0x61c   : > { %v7488_v5 = vpop.eup %7487 }
 0x61d   : > { %v7490_v22 = vpop.eup %7489  ;;  %v3285_v36 = vrot.slane %v7488_v5, 4 }
 0x61e   : > { %v3279_v10 = vrot.slane %v7490_v22, 4 }
 0x61f   : > { %v3286_v20 = vmax.f32 %v7488_v5, %v3285_v36  ;;  %v3310_v33 = vadd.f32 %v7488_v5, %v3285_v36 }
 0x620   : > { %v3280_v26 = vmax.f32 %v7490_v22, %v3279_v10  ;;  %v3304_v61 = vadd.f32 %v7490_v22, %v3279_v10 }
 0x621   : > { %v3287_v28 = vrot.slane %v3286_v20, 2  ;;  %v3311_v7 = vrot.slane %v3310_v33, 2 }
 0x622   : > { %v3281_v49 = vrot.slane %v3280_v26, 2  ;;  %v3305_v56 = vrot.slane %v3304_v61, 2  ;;  %3324 = sbr.rel (%p9662_p5) target bundleno = 1577 (0x629), region = 128 }
 0x623   : > { %v3288_v29 = vmax.f32 %v3286_v20, %v3287_v28  ;;  %v3312_v43 = vadd.f32 %v3311_v7, %v3310_v33 }
 0x624   : > { %v3282_v51 = vmax.f32 %v3280_v26, %v3281_v49  ;;  %v3306_v2 = vadd.f32 %v3305_v56, %v3304_v61 }
 0x625   : > { %v3289_v15 = vrot.slane %v3288_v29, 1  ;;  %v3313_v42 = vrot.slane %v3312_v43, 1 }
 0x626   : > { %v3283_v48 = vrot.slane %v3282_v51, 1  ;;  %v3307_v50 = vrot.slane %v3306_v2, 1 }
 0x627   : > { %v3290_v34 = vmax.f32 %v3288_v29, %v3289_v15  ;;  %v3314_v23 = vadd.f32 %v3313_v42, %v3312_v43 }
 0x628   : > { %v3284_v35 = vmax.f32 %v3282_v51, %v3283_v48  ;;  %v3308_v4 = vadd.f32 %v3307_v50, %v3306_v2 }
 0x629 PF: > { %v8274_v58 = vmov 1983009808   ;;  %v3340_v30 = vcombine.low %v3290_v34, %v3296_v62  ;;  %v3377_v52 = vcombine.low %v3314_v23, %v3320_v19  ;;  %vm3353_vm1 = vcmask 1041409   ;;  %v3327_v54 = vld [vmem:[#allocation6] sm:$0xf]  ;;  %p6058_p9 = scmp.ne.s32.totalorder %s8387_s0, 1 }
 0x62a   : > { %v3334_v57 = vunpack.c.l.s4 %v8274_v58  ;;  %v3332_v24 = vcombine.low %v3278_v8, %v3284_v35  ;;  %v3369_v18 = vcombine.low %v3302_v39, %v3308_v4  ;;  %vm3355_vm2 = vcmask 1043459   ;;  %v3364_v12 = vld [vmem:[#allocation7] sm:$0xf]  ;;  %v7492_v41 = vld [vmem:[#allocation19 + $0x4] ss:$16 sps:$4 sm:$0xff] (!%p6058_p9)   ;;  %s9663_s4 = sld [smem:[#allocation83_spill]] (!%p6058_p9) }
 0x62b   : > { %vm3357_vm3 = vcmask 1045509   ;;  %vm3359_vm4 = vcmask 1047559   ;;  %v7494_v45 = vld [vmem:[#allocation19 + $0xc] ss:$16 sps:$4 sm:$0xff] (!%p6058_p9)   ;;  %4218 = vmatprep.subr.bf16.mxu0 (!%p6058_p9), %v7492_v41  ;;  %v7496_v62 = vld [vmem:[#allocation19] ss:$16 sps:$4 sm:$0xff] (!%p6058_p9)  }
 0x62c   : > { %v3335_v17 = vunpack.c.0.s8 %v3334_v57  ;;  %v7497_v19 = vld [vmem:[#allocation19 + $0x8] ss:$16 sps:$4 sm:$0xff] (!%p6058_p9)   ;;  %4300 = vmatprep.subr.bf16.mxu1 (!%p6058_p9), %v7494_v45  ;;  %v7498_v27 = vld [vmem:[#allocation19 + $0x24] ss:$16 sps:$4 sm:$0xff] (!%p6058_p9)   ;;  %4219 = vmatpush1.bf16.msra.mxu0 (!%p6058_p9), %v7496_v62  ;;  %v7500_v25 = vld [vmem:[#allocation19 + $0x2c] ss:$16 sps:$4 sm:$0xff] (!%p6058_p9)  }
 0x62d   : > { %4301 = vmatpush1.bf16.msra.mxu1 (!%p6058_p9), %v7497_v19  ;;  %v7502_v44 = vld [vmem:[#allocation19 + $0x20] ss:$16 sps:$4 sm:$0xff] (!%p6058_p9)   ;;  %4220 = vmatprep.subr.bf16.mxu0 (!%p6058_p9), %v7498_v27  ;;  %v7503_v16 = vld [vmem:[#allocation19 + $0x28] ss:$16 sps:$4 sm:$0xff] (!%p6058_p9)   ;;  %v7504_v5 = vld [vmem:[#allocation19 + $0x44] ss:$16 sps:$4 sm:$0xff] (!%p6058_p9)  }
 0x62e   : > { %v9344_v55 = vsub.s32 %v3335_v17, %v9038_v59  ;;  %4302 = vmatprep.subr.bf16.mxu1 (!%p6058_p9), %v7500_v25  ;;  %v7506_v22 = vld [vmem:[#allocation19 + $0x4c] ss:$16 sps:$4 sm:$0xff] (!%p6058_p9)   ;;  %v7508_v36 = vld [vmem:[#allocation19 + $0x40] ss:$16 sps:$4 sm:$0xff] (!%p6058_p9)   ;;  %v7509_v10 = vld [vmem:[#allocation19 + $0x48] ss:$16 sps:$4 sm:$0xff] (!%p6058_p9)  }
 0x62f   : > { %v7510_v20 = vld [vmem:[#allocation19 + $0x64] ss:$16 sps:$4 sm:$0xff] (!%p6058_p9)   ;;  %v7512_v33 = vld [vmem:[#allocation19 + $0x6c] ss:$16 sps:$4 sm:$0xff] (!%p6058_p9)   ;;  %v7514_v26 = vld [vmem:[#allocation19 + $0x60] ss:$16 sps:$4 sm:$0xff] (!%p6058_p9)  }
 0x630   : > { %v3339_v13 = vrot.slane %v3332_v24, %v9344_v55  ;;  %v3347_v37 = vrot.slane %v3340_v30, %v9344_v55  ;;  %v3376_v9 = vrot.slane %v3369_v18, %v9344_v55  ;;  %v3384_v32 = vrot.slane %v3377_v52, %v9344_v55  ;;  %4221 = vmatpush1.bf16.msra.mxu0 (!%p6058_p9), %v7502_v44  ;;  %v7515_v61 = vld [vmem:[#allocation19 + $0x68] ss:$16 sps:$4 sm:$0xff] (!%p6058_p9)   ;;  %v7516_v28 = vld [vmem:[#allocation19 + $0x84] ss:$16 sps:$4 sm:$0xff] (!%p6058_p9)   ;;  %v7518_v7 = vld [vmem:[#allocation19 + $0x8c] ss:$16 sps:$4 sm:$0xff] (!%p6058_p9)  }
 0x631   : > { %4303 = vmatpush1.bf16.msra.mxu1 (!%p6058_p9), %v7503_v16  ;;  %4222 = vmatprep.subr.bf16.mxu0 (!%p6058_p9), %v7504_v5  ;;  %v7520_v49 = vld [vmem:[#allocation19 + $0x80] ss:$16 sps:$4 sm:$0xff] (!%p6058_p9)   ;;  %v7521_v56 = vld [vmem:[#allocation19 + $0x88] ss:$16 sps:$4 sm:$0xff] (!%p6058_p9)   ;;  %v7522_v29 = vld [vmem:[#allocation19 + $0xa4] ss:$16 sps:$4 sm:$0xff] (!%p6058_p9)  }
 0x632   : > { %v3352_v6 = vrot.slane %v3347_v37, 7  ;;  %v3387_v38 = vrot.slane %v3384_v32, 7  ;;  %4304 = vmatprep.subr.bf16.mxu1 (!%p6058_p9), %v7506_v22  ;;  %v7524_v43 = vld [vmem:[#allocation19 + $0xac] ss:$16 sps:$4 sm:$0xff] (!%p6058_p9)   ;;  %v7526_v51 = vld [vmem:[#allocation19 + $0xa0] ss:$16 sps:$4 sm:$0xff] (!%p6058_p9)  }
 0x633   : > { %v7527_v2 = vld [vmem:[#allocation19 + $0xa8] ss:$16 sps:$4 sm:$0xff] (!%p6058_p9)   ;;  %v7528_v15 = vld [vmem:[#allocation19 + $0xc4] ss:$16 sps:$4 sm:$0xff] (!%p6058_p9)   ;;  %v7530_v42 = vld [vmem:[#allocation19 + $0xcc] ss:$16 sps:$4 sm:$0xff] (!%p6058_p9)  }
 0x634   : > { %v3354_v3 = vsel %vm3353_vm1, %v3352_v6, %v3339_v13  ;;  %v3388_v31 = vsel %vm3353_vm1, %v3387_v38, %v3376_v9  ;;  %3398 = sbr.rel (%p6058_p9) target bundleno = 2461 (0x99d), region = 132  ;;  %4223 = vmatpush1.bf16.msra.mxu0 (!%p6058_p9), %v7508_v36  ;;  %v7532_v48 = vld [vmem:[#allocation19 + $0xc0] ss:$16 sps:$4 sm:$0xff] (!%p6058_p9)   ;;  %v7533_v50 = vld [vmem:[#allocation19 + $0xc8] ss:$16 sps:$4 sm:$0xff] (!%p6058_p9)   ;;  %s9664_s17 = sld [smem:[#allocation84_spill]] (!%p6058_p9) }
 0x635   : > { %v3356_v21 = vsel %vm3355_vm2, %v3352_v6, %v3354_v3  ;;  %v3389_v40 = vsel %vm3355_vm2, %v3387_v38, %v3388_v31  ;;  %4305 = vmatpush1.bf16.msra.mxu1 (!%p6058_p9), %v7509_v10  ;;  %4224 = vmatprep.subr.bf16.mxu0 (!%p6058_p9), %v7510_v20  ;;  %v7534_v34 = vld [vmem:[#allocation19 + $0xe4] ss:$16 sps:$4 sm:$0xff] (!%p6058_p9)   ;;  %v7536_v23 = vld [vmem:[#allocation19 + $0xec] ss:$16 sps:$4 sm:$0xff] (!%p6058_p9)   ;;  %v7538_v35 = vld [vmem:[#allocation19 + $0xe0] ss:$16 sps:$4 sm:$0xff] (!%p6058_p9)  }
 0x636   : > { %v3358_v47 = vsel %vm3357_vm3, %v3352_v6, %v3356_v21  ;;  %v3390_v14 = vsel %vm3357_vm3, %v3387_v38, %v3389_v40  ;;  %4306 = vmatprep.subr.bf16.mxu1 (!%p6058_p9), %v7512_v33  ;;  %v7539_v4 = vld [vmem:[#allocation19 + $0xe8] ss:$16 sps:$4 sm:$0xff] (!%p6058_p9)   ;;  %v7540_v53 = vld [vmem:[#allocation19 + $0x104] ss:$16 sps:$4 sm:$0xff] (!%p6058_p9)   ;;  %v7542_v60 = vld [vmem:[#allocation19 + $0x10c] ss:$16 sps:$4 sm:$0xff] (!%p6058_p9)  }
 0x637   : > { %v3360_v46 = vsel %vm3359_vm4, %v3352_v6, %v3358_v47  ;;  %v3391_v63 = vsel %vm3359_vm4, %v3387_v38, %v3390_v14  ;;  %v7544_v58 = vld [vmem:[#allocation19 + $0x100] ss:$16 sps:$4 sm:$0xff] (!%p6058_p9)   ;;  %v7545_v57 = vld [vmem:[#allocation19 + $0x108] ss:$16 sps:$4 sm:$0xff] (!%p6058_p9)   ;;  %v7546_v24 = vld [vmem:[#allocation19 + $0x124] ss:$16 sps:$4 sm:$0xff] (!%p6058_p9)  }
 0x638   : > { %v3362_v8 = vmax.f32 %v3327_v54, %v3360_v46  ;;  %v3393_v39 = vadd.f32 %v3391_v63, %v3364_v12  ;;  %4225 = vmatpush1.bf16.msra.mxu0 (!%p6058_p9), %v7514_v26  ;;  %v7548_v17 = vld [vmem:[#allocation19 + $0x12c] ss:$16 sps:$4 sm:$0xff] (!%p6058_p9)   ;;  %v7550_v30 = vld [vmem:[#allocation19 + $0x120] ss:$16 sps:$4 sm:$0xff] (!%p6058_p9)   ;;  %v7551_v18 = vld [vmem:[#allocation19 + $0x128] ss:$16 sps:$4 sm:$0xff] (!%p6058_p9)  }
 0x639   : > { %4307 = vmatpush1.bf16.msra.mxu1 (!%p6058_p9), %v7515_v61  ;;  %4226 = vmatprep.subr.bf16.mxu0 (!%p6058_p9), %v7516_v28  ;;  %v7552_v52 = vld [vmem:[#allocation19 + $0x144] ss:$16 sps:$4 sm:$0xff] (!%p6058_p9)   ;;  %v7554_v13 = vld [vmem:[#allocation19 + $0x14c] ss:$16 sps:$4 sm:$0xff] (!%p6058_p9)   ;;  %v7556_v37 = vld [vmem:[#allocation19 + $0x140] ss:$16 sps:$4 sm:$0xff] (!%p6058_p9)  }
 0x63a   : > { %3363 = vst [vmem:[#allocation6] sm:$0xf] %v3362_v8  ;;  %3394 = vst [vmem:[#allocation7] sm:$0xf] %v3393_v39  ;;  %4308 = vmatprep.subr.bf16.mxu1 (!%p6058_p9), %v7518_v7  ;;  %v7557_v9 = vld [vmem:[#allocation19 + $0x148] ss:$16 sps:$4 sm:$0xff] (!%p6058_p9)  }
 0x63b   : > { %v7558_v32 = vld [vmem:[#allocation19 + $0x164] ss:$16 sps:$4 sm:$0xff]   ;;  %v7560_v6 = vld [vmem:[#allocation19 + $0x16c] ss:$16 sps:$4 sm:$0xff]   ;;  %v7562_v3 = vld [vmem:[#allocation19 + $0x160] ss:$16 sps:$4 sm:$0xff]  }
 0x63c   : > { %4227 = vmatpush1.bf16.msra.mxu0 %v7520_v49  ;;  %v7563_v31 = vld [vmem:[#allocation19 + $0x168] ss:$16 sps:$4 sm:$0xff]   ;;  %v7564_v21 = vld [vmem:[#allocation19 + $0x184] ss:$16 sps:$4 sm:$0xff]   ;;  %v7566_v12 = vld [vmem:[#allocation19 + $0x18c] ss:$16 sps:$4 sm:$0xff]  }
 0x63d   : > { %4309 = vmatpush1.bf16.msra.mxu1 %v7521_v56  ;;  %4228 = vmatprep.subr.bf16.mxu0 %v7522_v29  ;;  %v7568_v47 = vld [vmem:[#allocation19 + $0x180] ss:$16 sps:$4 sm:$0xff]   ;;  %v7569_v14 = vld [vmem:[#allocation19 + $0x188] ss:$16 sps:$4 sm:$0xff]   ;;  %v7570_v46 = vld [vmem:[#allocation19 + $0x1a4] ss:$16 sps:$4 sm:$0xff]  }
 0x63e   : > { %4310 = vmatprep.subr.bf16.mxu1 %v7524_v43  ;;  %v7572_v63 = vld [vmem:[#allocation19 + $0x1ac] ss:$16 sps:$4 sm:$0xff]   ;;  %v7574_v8 = vld [vmem:[#allocation19 + $0x1a0] ss:$16 sps:$4 sm:$0xff]   ;;  %v7575_v39 = vld [vmem:[#allocation19 + $0x1a8] ss:$16 sps:$4 sm:$0xff]  }
 0x63f   : > { %v7576_v41 = vld [vmem:[#allocation19 + $0x1c4] ss:$16 sps:$4 sm:$0xff]   ;;  %v7578_v45 = vld [vmem:[#allocation19 + $0x1cc] ss:$16 sps:$4 sm:$0xff]   ;;  %v7580_v62 = vld [vmem:[#allocation19 + $0x1c0] ss:$16 sps:$4 sm:$0xff]  }
 0x640   : > { %4229 = vmatpush1.bf16.msra.mxu0 %v7526_v51  ;;  %v7581_v19 = vld [vmem:[#allocation19 + $0x1c8] ss:$16 sps:$4 sm:$0xff]   ;;  %v7582_v27 = vld [vmem:[#allocation19 + $0x1e4] ss:$16 sps:$4 sm:$0xff]   ;;  %v7584_v25 = vld [vmem:[#allocation19 + $0x1ec] ss:$16 sps:$4 sm:$0xff]  }
 0x641   : > { %4311 = vmatpush1.bf16.msra.mxu1 %v7527_v2  ;;  %4230 = vmatprep.subr.bf16.mxu0 %v7528_v15  ;;  %v6059_v38 = vld.sshfl [vmem:[#allocation6] sm:$0x33 pattern:$0x76325410]  ;;  %v7586_v44 = vld [vmem:[#allocation19 + $0x1e0] ss:$16 sps:$4 sm:$0xff]  }
 0x642   : > { %4312 = vmatprep.subr.bf16.mxu1 %v7530_v42  ;;  %v9351_v54 = vcombine.high %v6059_v38, %v6059_v38  ;;  %v7587_v16 = vld [vmem:[#allocation19 + $0x1e8] ss:$16 sps:$4 sm:$0xff]   ;;  %v7590_v5 = vld [vmem:[#allocation19 + $0x204] ss:$16 sps:$4 sm:$0xff]   ;;  %v7593_v22 = vld [vmem:[#allocation19 + $0x20c] ss:$16 sps:$4 sm:$0xff]   ;;  %v3424_v10 = vpack.c.bf16 %v6059_v38, %v6059_v38 }
 0x643   : > { %v7588_v36 = vld [vmem:[#allocation19 + $0x200] ss:$16 sps:$4 sm:$0xff]   ;;  %v7591_v20 = vld [vmem:[#allocation19 + $0x208] ss:$16 sps:$4 sm:$0xff]   ;;  %v7596_v33 = vld [vmem:[#allocation19 + $0x224] ss:$16 sps:$4 sm:$0xff]  }
 0x644   : > { %4231 = vmatpush1.bf16.msra.mxu0 %v7532_v48  ;;  %v3425_v40 = vpack.c.bf16 %v9351_v54, %v9351_v54  ;;  %v7599_v26 = vld [vmem:[#allocation19 + $0x22c] ss:$16 sps:$4 sm:$0xff]   ;;  %v7594_v61 = vld [vmem:[#allocation19 + $0x220] ss:$16 sps:$4 sm:$0xff]   ;;  %v7597_v28 = vld [vmem:[#allocation19 + $0x228] ss:$16 sps:$4 sm:$0xff]  }
 0x645   : > { %4313 = vmatpush1.bf16.msra.mxu1 %v7533_v50  ;;  %4232 = vmatprep.subr.bf16.mxu0 %v7534_v34  ;;  %v7602_v7 = vld [vmem:[#allocation19 + $0x244] ss:$16 sps:$4 sm:$0xff]   ;;  %v7605_v49 = vld [vmem:[#allocation19 + $0x24c] ss:$16 sps:$4 sm:$0xff]   ;;  %v7600_v56 = vld [vmem:[#allocation19 + $0x240] ss:$16 sps:$4 sm:$0xff]  }
 0x646   : > { %4314 = vmatprep.subr.bf16.mxu1 %v7536_v23  ;;  %4250 = vmatprep.mubr.bf16.mxu0 %v3425_v40  ;;  %v7603_v29 = vld [vmem:[#allocation19 + $0x248] ss:$16 sps:$4 sm:$0xff]   ;;  %v7608_v43 = vld [vmem:[#allocation19 + $0x264] ss:$16 sps:$4 sm:$0xff]   ;;  %v7611_v51 = vld [vmem:[#allocation19 + $0x26c] ss:$16 sps:$4 sm:$0xff]  }
 0x647   : > { %4332 = vmatprep.mubr.bf16.mxu1 %v3425_v40  ;;  %v7606_v2 = vld [vmem:[#allocation19 + $0x260] ss:$16 sps:$4 sm:$0xff]   ;;  %v7609_v15 = vld [vmem:[#allocation19 + $0x268] ss:$16 sps:$4 sm:$0xff]   ;;  %v7614_v42 = vld [vmem:[#allocation19 + $0x284] ss:$16 sps:$4 sm:$0xff]  }
 0x648   : > { %4233 = vmatpush1.bf16.msra.mxu0 %v7538_v35  ;;  %v7617_v48 = vld [vmem:[#allocation19 + $0x28c] ss:$16 sps:$4 sm:$0xff]   ;;  %v7612_v50 = vld [vmem:[#allocation19 + $0x280] ss:$16 sps:$4 sm:$0xff]   ;;  %v7615_v34 = vld [vmem:[#allocation19 + $0x288] ss:$16 sps:$4 sm:$0xff]  }
 0x649   : > { %4315 = vmatpush1.bf16.msra.mxu1 %v7539_v4  ;;  %4234 = vmatprep.subr.bf16.mxu0 %v7540_v53  ;;  %v7620_v23 = vld [vmem:[#allocation19 + $0x2a4] ss:$16 sps:$4 sm:$0xff]   ;;  %v7623_v35 = vld [vmem:[#allocation19 + $0x2ac] ss:$16 sps:$4 sm:$0xff]   ;;  %v7618_v4 = vld [vmem:[#allocation19 + $0x2a0] ss:$16 sps:$4 sm:$0xff]  }
 0x64a   : > { %4316 = vmatprep.subr.bf16.mxu1 %v7542_v60  ;;  %v7621_v53 = vld [vmem:[#allocation19 + $0x2a8] ss:$16 sps:$4 sm:$0xff]   ;;  %v7626_v60 = vld [vmem:[#allocation19 + $0x2c4] ss:$16 sps:$4 sm:$0xff]   ;;  %v7642_v40 = vld [vmem:[#allocation19 + $0x320] ss:$16 sps:$4 sm:$0xff]  }
 0x64b   : > { %v7638_v38 = vld [vmem:[#allocation19 + $0x304] ss:$16 sps:$4 sm:$0xff]   ;;  %s9665_s9 = sld [smem:[#allocation85_spill]] }
 0x64c   : > { %4235 = vmatpush1.bf16.msra.mxu0 %v7544_v58  ;;  %v7629_v58 = vld [vmem:[#allocation19 + $0x2cc] ss:$16 sps:$4 sm:$0xff]  }
 0x64d   : > { %4317 = vmatpush1.bf16.msra.mxu1 %v7545_v57  ;;  %4236 = vmatprep.subr.bf16.mxu0 %v7546_v24  ;;  %v3400_v57 = vld [vmem:[#allocation7] sm:$0xf] }
 0x64e   : > { %4318 = vmatprep.subr.bf16.mxu1 %v7548_v17  ;;  %v3401_v24 = vmul.f32 0.0625, %v3400_v57  ;;  %v7624_v17 = vld [vmem:[#allocation19 + $0x2c0] ss:$16 sps:$4 sm:$0xff]   ;;  %v7705_v57 = vld [vmem:[#allocation20 + $0x68] ss:$16 sps:$4 sm:$0xff]  }
 0x650   : > { %4237 = vmatpush1.bf16.msra.mxu0 %v7550_v30  ;;  %v7627_v30 = vld [vmem:[#allocation19 + $0x2c8] ss:$16 sps:$4 sm:$0xff]  }
 0x651   : > { %4319 = vmatpush1.bf16.msra.mxu1 %v7551_v18  ;;  %4238 = vmatprep.subr.bf16.mxu0 %v7552_v52  ;;  %v9356_v18 = vrot.slane %v3401_v24, %v9344_v55  ;;  %v7632_v52 = vld [vmem:[#allocation19 + $0x2e4] ss:$16 sps:$4 sm:$0xff]   ;;  %v7641_v55 = vld [vmem:[#allocation19 + $0x30c] ss:$16 sps:$4 sm:$0xff]  }
 0x652   : > { %4320 = vmatprep.subr.bf16.mxu1 %v7554_v13  ;;  %v7635_v13 = vld [vmem:[#allocation19 + $0x2ec] ss:$16 sps:$4 sm:$0xff]   ;;  %v7710_v24 = vld [vmem:[#allocation20 + $0x84] ss:$16 sps:$4 sm:$0xff]  }
 0x654   : > { %4239 = vmatpush1.bf16.msra.mxu0 %v7556_v37  ;;  %v9360_v37 = vcombine.high %v9356_v18, %v9356_v18 }
 0x655   : > { %4321 = vmatpush1.bf16.msra.mxu1 %v7557_v9  ;;  %4240 = vmatprep.subr.bf16.mxu0 %v7558_v32  ;;  %v7630_v9 = vld [vmem:[#allocation19 + $0x2e0] ss:$16 sps:$4 sm:$0xff]   ;;  %v7633_v32 = vld [vmem:[#allocation19 + $0x2e8] ss:$16 sps:$4 sm:$0xff]  }
 0x656   : > { %4322 = vmatprep.subr.bf16.mxu1 %v7560_v6  ;;  %v3427_v6 = vpack.c.bf16 %v9360_v37, %v9360_v37 }
 0x658   : > { %4241 = vmatpush1.bf16.msra.mxu0 %v7562_v3  ;;  %v7636_v3 = vld [vmem:[#allocation19 + $0x300] ss:$16 sps:$4 sm:$0xff]  }
 0x659   : > { %4323 = vmatpush1.bf16.msra.mxu1 %v7563_v31  ;;  %4242 = vmatprep.subr.bf16.mxu0 %v7564_v21  ;;  %v7639_v31 = vld [vmem:[#allocation19 + $0x308] ss:$16 sps:$4 sm:$0xff]   ;;  %v7644_v21 = vld [vmem:[#allocation19 + $0x324] ss:$16 sps:$4 sm:$0xff]  }
 0x65a   : > { %4324 = vmatprep.subr.bf16.mxu1 %v7566_v12  ;;  %v7647_v12 = vld [vmem:[#allocation19 + $0x32c] ss:$16 sps:$4 sm:$0xff]  }
 0x65c   : > { %4243 = vmatpush1.bf16.msra.mxu0 %v7568_v47  ;;  %v7645_v47 = vld [vmem:[#allocation19 + $0x328] ss:$16 sps:$4 sm:$0xff]  }
 0x65d   : > { %4325 = vmatpush1.bf16.msra.mxu1 %v7569_v14  ;;  %4244 = vmatprep.subr.bf16.mxu0 %v7570_v46  ;;  %v7650_v14 = vld [vmem:[#allocation19 + $0x344] ss:$16 sps:$4 sm:$0xff]   ;;  %v7653_v46 = vld [vmem:[#allocation19 + $0x34c] ss:$16 sps:$4 sm:$0xff]  }
 0x65e   : > { %4326 = vmatprep.subr.bf16.mxu1 %v7572_v63  ;;  %v7648_v63 = vld [vmem:[#allocation19 + $0x340] ss:$16 sps:$4 sm:$0xff]  }
 0x660   : > { %4245 = vmatpush1.bf16.msra.mxu0 %v7574_v8  ;;  %v7651_v8 = vld [vmem:[#allocation19 + $0x348] ss:$16 sps:$4 sm:$0xff]  }
 0x661   : > { %4327 = vmatpush1.bf16.msra.mxu1 %v7575_v39  ;;  %4246 = vmatprep.subr.bf16.mxu0 %v7576_v41  ;;  %v7656_v39 = vld [vmem:[#allocation19 + $0x364] ss:$16 sps:$4 sm:$0xff]   ;;  %v7659_v41 = vld [vmem:[#allocation19 + $0x36c] ss:$16 sps:$4 sm:$0xff]  }
 0x662   : > { %4328 = vmatprep.subr.bf16.mxu1 %v7578_v45  ;;  %v7654_v45 = vld [vmem:[#allocation19 + $0x360] ss:$16 sps:$4 sm:$0xff]  }
 0x664   : > { %4247 = vmatpush1.bf16.msra.mxu0 %v7580_v62  ;;  %v7657_v62 = vld [vmem:[#allocation19 + $0x368] ss:$16 sps:$4 sm:$0xff]  }
 0x665   : > { %4329 = vmatpush1.bf16.msra.mxu1 %v7581_v19  ;;  %4248 = vmatprep.subr.bf16.mxu0 %v7582_v27  ;;  %v7662_v19 = vld [vmem:[#allocation19 + $0x384] ss:$16 sps:$4 sm:$0xff]   ;;  %v7665_v27 = vld [vmem:[#allocation19 + $0x38c] ss:$16 sps:$4 sm:$0xff]  }
 0x666   : > { %4330 = vmatprep.subr.bf16.mxu1 %v7584_v25  ;;  %v7660_v25 = vld [vmem:[#allocation19 + $0x380] ss:$16 sps:$4 sm:$0xff]  }
 0x668   : > { %4249 = vmatpush1.bf16.msra.mxu0 %v7586_v44  ;;  %v7663_v44 = vld [vmem:[#allocation19 + $0x388] ss:$16 sps:$4 sm:$0xff]  }
 0x669   : > { %4331 = vmatpush1.bf16.msra.mxu1 %v7587_v16  ;;  %4259 = vmatprep.subr.bf16.mxu0 %v7590_v5  ;;  %v7668_v16 = vld [vmem:[#allocation19 + $0x3a4] ss:$16 sps:$4 sm:$0xff]   ;;  %v7671_v5 = vld [vmem:[#allocation19 + $0x3ac] ss:$16 sps:$4 sm:$0xff]  }
 0x66a   : > { %4341 = vmatprep.subr.bf16.mxu1 %v7593_v22  ;;  %v7666_v22 = vld [vmem:[#allocation19 + $0x3a0] ss:$16 sps:$4 sm:$0xff]  }
 0x66b   : > { %4251 = vmatmul.mubr.bf16.vlgmr.msra.gmra.mrb[0].mxu0 %v3424_v10 }
 0x66c   : > { %4333 = vmatmul.mubr.bf16.vlgmr.msra.gmra.mrb[0].mxu1 %v3424_v10  ;;  %4260 = vmatpush1.bf16.msra.mxu0 %v7588_v36  ;;  %v7669_v36 = vld [vmem:[#allocation19 + $0x3a8] ss:$16 sps:$4 sm:$0xff]   ;;  %v7674_v10 = vld [vmem:[#allocation19 + $0x3c4] ss:$16 sps:$4 sm:$0xff]  }
 0x66d   : > { %4342 = vmatpush1.bf16.msra.mxu1 %v7591_v20  ;;  %4261 = vmatprep.subr.bf16.mxu0 %v7596_v33  ;;  %v7677_v20 = vld [vmem:[#allocation19 + $0x3cc] ss:$16 sps:$4 sm:$0xff]   ;;  %v7672_v33 = vld [vmem:[#allocation19 + $0x3c0] ss:$16 sps:$4 sm:$0xff]  }
 0x66e   : > { %4343 = vmatprep.subr.bf16.mxu1 %v7599_v26  ;;  %4291 = vmatprep.mubr.bf16.mxu0 %v3427_v6  ;;  %v7675_v26 = vld [vmem:[#allocation19 + $0x3c8] ss:$16 sps:$4 sm:$0xff]  }
 0x66f   : > { %4373 = vmatprep.mubr.bf16.mxu1 %v3427_v6  ;;  %v7717_v6 = vld [vmem:[#allocation20 + $0xa8] ss:$16 sps:$4 sm:$0xff]  }
 0x670   : > { %4262 = vmatpush1.bf16.msra.mxu0 %v7594_v61  ;;  %v7680_v61 = vld [vmem:[#allocation19 + $0x3e4] ss:$16 sps:$4 sm:$0xff]  }
 0x671   : > { %4344 = vmatpush1.bf16.msra.mxu1 %v7597_v28  ;;  %4263 = vmatprep.subr.bf16.mxu0 %v7602_v7  ;;  %v7683_v28 = vld [vmem:[#allocation19 + $0x3ec] ss:$16 sps:$4 sm:$0xff]   ;;  %v7678_v7 = vld [vmem:[#allocation19 + $0x3e0] ss:$16 sps:$4 sm:$0xff]  }
 0x672   : > { %4345 = vmatprep.subr.bf16.mxu1 %v7605_v49  ;;  %v7681_v49 = vld [vmem:[#allocation19 + $0x3e8] ss:$16 sps:$4 sm:$0xff]  }
 0x674   : > { %4264 = vmatpush1.bf16.msra.mxu0 %v7600_v56  ;;  %v7686_v56 = vld [vmem:[#allocation20 + $0x4] ss:$16 sps:$4 sm:$0xff]  }
 0x675   : > { %4346 = vmatpush1.bf16.msra.mxu1 %v7603_v29  ;;  %4265 = vmatprep.subr.bf16.mxu0 %v7608_v43  ;;  %v7689_v29 = vld [vmem:[#allocation20 + $0xc] ss:$16 sps:$4 sm:$0xff]   ;;  %v7684_v43 = vld [vmem:[#allocation20] ss:$16 sps:$4 sm:$0xff]  }
 0x676   : > { %4347 = vmatprep.subr.bf16.mxu1 %v7611_v51  ;;  %v7687_v51 = vld [vmem:[#allocation20 + $0x8] ss:$16 sps:$4 sm:$0xff]  }
 0x678   : > { %4266 = vmatpush1.bf16.msra.mxu0 %v7606_v2  ;;  %v3426_v2 = vpack.c.bf16 %v9356_v18, %v9356_v18 }
 0x679   : > { %4348 = vmatpush1.bf16.msra.mxu1 %v7609_v15  ;;  %4267 = vmatprep.subr.bf16.mxu0 %v7614_v42  ;;  %v7692_v15 = vld [vmem:[#allocation20 + $0x24] ss:$16 sps:$4 sm:$0xff]   ;;  %v7695_v42 = vld [vmem:[#allocation20 + $0x2c] ss:$16 sps:$4 sm:$0xff]  }
 0x67a   : > { %4349 = vmatprep.subr.bf16.mxu1 %v7617_v48  ;;  %v7690_v48 = vld [vmem:[#allocation20 + $0x20] ss:$16 sps:$4 sm:$0xff]  }
 0x67c   : > { %4268 = vmatpush1.bf16.msra.mxu0 %v7612_v50  ;;  %v7693_v50 = vld [vmem:[#allocation20 + $0x28] ss:$16 sps:$4 sm:$0xff]  }
 0x67d   : > { %4350 = vmatpush1.bf16.msra.mxu1 %v7615_v34  ;;  %4269 = vmatprep.subr.bf16.mxu0 %v7620_v23  ;;  %v7698_v34 = vld [vmem:[#allocation20 + $0x44] ss:$16 sps:$4 sm:$0xff]   ;;  %v7701_v23 = vld [vmem:[#allocation20 + $0x4c] ss:$16 sps:$4 sm:$0xff]  }
 0x67e   : > { %4351 = vmatprep.subr.bf16.mxu1 %v7623_v35  ;;  %v7696_v35 = vld [vmem:[#allocation20 + $0x40] ss:$16 sps:$4 sm:$0xff]  }
 0x680   : > { %4270 = vmatpush1.bf16.msra.mxu0 %v7618_v4  ;;  %v7699_v4 = vld [vmem:[#allocation20 + $0x48] ss:$16 sps:$4 sm:$0xff]  }
 0x681   : > { %4352 = vmatpush1.bf16.msra.mxu1 %v7621_v53  ;;  %4271 = vmatprep.subr.bf16.mxu0 %v7626_v60  ;;  %v7704_v53 = vld [vmem:[#allocation20 + $0x64] ss:$16 sps:$4 sm:$0xff]   ;;  %v7707_v60 = vld [vmem:[#allocation20 + $0x6c] ss:$16 sps:$4 sm:$0xff]  }
 0x682   : > { %4353 = vmatprep.subr.bf16.mxu1 %v7629_v58  ;;  %v7702_v58 = vld [vmem:[#allocation20 + $0x60] ss:$16 sps:$4 sm:$0xff]  }
 0x684   : > { %4272 = vmatpush1.bf16.msra.mxu0 %v7624_v17  ;;  %v7713_v17 = vld [vmem:[#allocation20 + $0x8c] ss:$16 sps:$4 sm:$0xff]  }
 0x685   : > { %4354 = vmatpush1.bf16.msra.mxu1 %v7627_v30  ;;  %4273 = vmatprep.subr.bf16.mxu0 %v7632_v52  ;;  %v7708_v30 = vld [vmem:[#allocation20 + $0x80] ss:$16 sps:$4 sm:$0xff]   ;;  %v7711_v52 = vld [vmem:[#allocation20 + $0x88] ss:$16 sps:$4 sm:$0xff]  }
 0x686   : > { %4355 = vmatprep.subr.bf16.mxu1 %v7635_v13  ;;  %v7716_v13 = vld [vmem:[#allocation20 + $0xa4] ss:$16 sps:$4 sm:$0xff]  }
 0x688   : > { %4274 = vmatpush1.bf16.msra.mxu0 %v7630_v9  ;;  %v7719_v9 = vld [vmem:[#allocation20 + $0xac] ss:$16 sps:$4 sm:$0xff]  }
 0x689   : > { %4356 = vmatpush1.bf16.msra.mxu1 %v7633_v32  ;;  %4275 = vmatprep.subr.bf16.mxu0 %v7638_v38  ;;  %v7714_v32 = vld [vmem:[#allocation20 + $0xa0] ss:$16 sps:$4 sm:$0xff]   ;;  %v7722_v38 = vld [vmem:[#allocation20 + $0xc4] ss:$16 sps:$4 sm:$0xff]  }
 0x68a   : > { %4357 = vmatprep.subr.bf16.mxu1 %v7641_v55  ;;  %v7725_v55 = vld [vmem:[#allocation20 + $0xcc] ss:$16 sps:$4 sm:$0xff]  }
 0x68c   : > { %4276 = vmatpush1.bf16.msra.mxu0 %v7636_v3  ;;  %v7720_v3 = vld [vmem:[#allocation20 + $0xc0] ss:$16 sps:$4 sm:$0xff]  }
 0x68d   : > { %4358 = vmatpush1.bf16.msra.mxu1 %v7639_v31  ;;  %4277 = vmatprep.subr.bf16.mxu0 %v7644_v21  ;;  %v7723_v31 = vld [vmem:[#allocation20 + $0xc8] ss:$16 sps:$4 sm:$0xff]   ;;  %v7728_v21 = vld [vmem:[#allocation20 + $0xe4] ss:$16 sps:$4 sm:$0xff]  }
 0x68e   : > { %4359 = vmatprep.subr.bf16.mxu1 %v7647_v12  ;;  %v7731_v12 = vld [vmem:[#allocation20 + $0xec] ss:$16 sps:$4 sm:$0xff]  }
 0x690   : > { %4278 = vmatpush1.bf16.msra.mxu0 %v7642_v40  ;;  %v7726_v40 = vld [vmem:[#allocation20 + $0xe0] ss:$16 sps:$4 sm:$0xff]  }
 0x691   : > { %4360 = vmatpush1.bf16.msra.mxu1 %v7645_v47  ;;  %4279 = vmatprep.subr.bf16.mxu0 %v7650_v14  ;;  %v7729_v47 = vld [vmem:[#allocation20 + $0xe8] ss:$16 sps:$4 sm:$0xff]   ;;  %v7734_v14 = vld [vmem:[#allocation20 + $0x104] ss:$16 sps:$4 sm:$0xff]  }
 0x692   : > { %4361 = vmatprep.subr.bf16.mxu1 %v7653_v46  ;;  %v7737_v46 = vld [vmem:[#allocation20 + $0x10c] ss:$16 sps:$4 sm:$0xff]  }
 0x694   : > { %4280 = vmatpush1.bf16.msra.mxu0 %v7648_v63  ;;  %v7732_v63 = vld [vmem:[#allocation20 + $0x100] ss:$16 sps:$4 sm:$0xff]  }
 0x695   : > { %4362 = vmatpush1.bf16.msra.mxu1 %v7651_v8  ;;  %4281 = vmatprep.subr.bf16.mxu0 %v7656_v39  ;;  %v7735_v8 = vld [vmem:[#allocation20 + $0x108] ss:$16 sps:$4 sm:$0xff]   ;;  %v7740_v39 = vld [vmem:[#allocation20 + $0x124] ss:$16 sps:$4 sm:$0xff]  }
 0x696   : > { %4363 = vmatprep.subr.bf16.mxu1 %v7659_v41  ;;  %v7743_v41 = vld [vmem:[#allocation20 + $0x12c] ss:$16 sps:$4 sm:$0xff]  }
 0x698   : > { %4282 = vmatpush1.bf16.msra.mxu0 %v7654_v45  ;;  %v7738_v45 = vld [vmem:[#allocation20 + $0x120] ss:$16 sps:$4 sm:$0xff]  }
 0x699   : > { %4364 = vmatpush1.bf16.msra.mxu1 %v7657_v62  ;;  %4283 = vmatprep.subr.bf16.mxu0 %v7662_v19  ;;  %v7741_v62 = vld [vmem:[#allocation20 + $0x128] ss:$16 sps:$4 sm:$0xff]   ;;  %v7746_v19 = vld [vmem:[#allocation20 + $0x144] ss:$16 sps:$4 sm:$0xff]  }
 0x69a   : > { %4365 = vmatprep.subr.bf16.mxu1 %v7665_v27  ;;  %v7749_v27 = vld [vmem:[#allocation20 + $0x14c] ss:$16 sps:$4 sm:$0xff]  }
 0x69c   : > { %4284 = vmatpush1.bf16.msra.mxu0 %v7660_v25  ;;  %v7744_v25 = vld [vmem:[#allocation20 + $0x140] ss:$16 sps:$4 sm:$0xff]  }
 0x69d   : > { %4366 = vmatpush1.bf16.msra.mxu1 %v7663_v44  ;;  %4285 = vmatprep.subr.bf16.mxu0 %v7668_v16  ;;  %v7747_v44 = vld [vmem:[#allocation20 + $0x148] ss:$16 sps:$4 sm:$0xff]   ;;  %v7752_v16 = vld [vmem:[#allocation20 + $0x164] ss:$16 sps:$4 sm:$0xff]  }
 0x69e   : > { %4367 = vmatprep.subr.bf16.mxu1 %v7671_v5  ;;  %v7755_v5 = vld [vmem:[#allocation20 + $0x16c] ss:$16 sps:$4 sm:$0xff]  }
 0x6a0   : > { %4286 = vmatpush1.bf16.msra.mxu0 %v7666_v22  ;;  %v7750_v22 = vld [vmem:[#allocation20 + $0x160] ss:$16 sps:$4 sm:$0xff]  }
 0x6a1   : > { %4368 = vmatpush1.bf16.msra.mxu1 %v7669_v36  ;;  %4287 = vmatprep.subr.bf16.mxu0 %v7674_v10  ;;  %v7753_v36 = vld [vmem:[#allocation20 + $0x168] ss:$16 sps:$4 sm:$0xff]   ;;  %v7758_v10 = vld [vmem:[#allocation20 + $0x184] ss:$16 sps:$4 sm:$0xff]  }
 0x6a2   : > { %4369 = vmatprep.subr.bf16.mxu1 %v7677_v20  ;;  %v7761_v20 = vld [vmem:[#allocation20 + $0x18c] ss:$16 sps:$4 sm:$0xff]  }
 0x6a4   : > { %4288 = vmatpush1.bf16.msra.mxu0 %v7672_v33  ;;  %v7756_v33 = vld [vmem:[#allocation20 + $0x180] ss:$16 sps:$4 sm:$0xff]  }
 0x6a5   : > { %4370 = vmatpush1.bf16.msra.mxu1 %v7675_v26  ;;  %4289 = vmatprep.subr.bf16.mxu0 %v7680_v61  ;;  %v7759_v26 = vld [vmem:[#allocation20 + $0x188] ss:$16 sps:$4 sm:$0xff]   ;;  %v7764_v61 = vld [vmem:[#allocation20 + $0x1a4] ss:$16 sps:$4 sm:$0xff]  }
 0x6a6   : > { %4371 = vmatprep.subr.bf16.mxu1 %v7683_v28  ;;  %v7767_v28 = vld [vmem:[#allocation20 + $0x1ac] ss:$16 sps:$4 sm:$0xff]  }
 0x6a8   : > { %4290 = vmatpush1.bf16.msra.mxu0 %v7678_v7  ;;  %v7762_v7 = vld [vmem:[#allocation20 + $0x1a0] ss:$16 sps:$4 sm:$0xff]  }
 0x6a9   : > { %4372 = vmatpush1.bf16.msra.mxu1 %v7681_v49  ;;  %5184 = vmatprep.subr.bf16.mxu0 %v7686_v56  ;;  %v7765_v49 = vld [vmem:[#allocation20 + $0x1a8] ss:$16 sps:$4 sm:$0xff]   ;;  %v7770_v56 = vld [vmem:[#allocation20 + $0x1c4] ss:$16 sps:$4 sm:$0xff]  }
 0x6aa   : > { %5266 = vmatprep.subr.bf16.mxu1 %v7689_v29  ;;  %v7773_v29 = vld [vmem:[#allocation20 + $0x1cc] ss:$16 sps:$4 sm:$0xff]  }
 0x6ab   : > { %4292 = vmatmul.mubr.bf16.vlgmr.msra.gmra.mrb[0].mxu0 %v3426_v2 }
 0x6ac   : > { %4374 = vmatmul.mubr.bf16.vlgmr.msra.gmra.mrb[0].mxu1 %v3426_v2  ;;  %5185 = vmatpush1.bf16.msra.mxu0 %v7684_v43  ;;  %v7768_v43 = vld [vmem:[#allocation20 + $0x1c0] ss:$16 sps:$4 sm:$0xff]   ;;  %v7776_v2 = vld [vmem:[#allocation20 + $0x1e4] ss:$16 sps:$4 sm:$0xff]  }
 0x6ad   : > { %5267 = vmatpush1.bf16.msra.mxu1 %v7687_v51  ;;  %5186 = vmatprep.subr.bf16.mxu0 %v7692_v15  ;;  %v7771_v51 = vld [vmem:[#allocation20 + $0x1c8] ss:$16 sps:$4 sm:$0xff]   ;;  %v7779_v15 = vld [vmem:[#allocation20 + $0x1ec] ss:$16 sps:$4 sm:$0xff]  }
 0x6ae   : > { %5268 = vmatprep.subr.bf16.mxu1 %v7695_v42  ;;  %v7774_v42 = vld [vmem:[#allocation20 + $0x1e0] ss:$16 sps:$4 sm:$0xff]  }
 0x6b0   : > { %5187 = vmatpush1.bf16.msra.mxu0 %v7690_v48  ;;  %v7777_v48 = vld [vmem:[#allocation20 + $0x1e8] ss:$16 sps:$4 sm:$0xff]  }
 0x6b1   : > { %5269 = vmatpush1.bf16.msra.mxu1 %v7693_v50  ;;  %5188 = vmatprep.subr.bf16.mxu0 %v7698_v34  ;;  %v7782_v50 = vld [vmem:[#allocation20 + $0x204] ss:$16 sps:$4 sm:$0xff]   ;;  %v7785_v34 = vld [vmem:[#allocation20 + $0x20c] ss:$16 sps:$4 sm:$0xff]  }
 0x6b2   : > { %5270 = vmatprep.subr.bf16.mxu1 %v7701_v23  ;;  %v9369_v23 = vld [vmem:[%s9663_s4] sm:$0xf] }
 0x6b4   : > { %5189 = vmatpush1.bf16.msra.mxu0 %v7696_v35  ;;  %v3572_v35 = vsub.s32 3, %v9038_v59 }
 0x6b5   : > { %5271 = vmatpush1.bf16.msra.mxu1 %v7699_v4  ;;  %5190 = vmatprep.subr.bf16.mxu0 %v7704_v53  ;;  %v3561_v4 = vrot.slane %v9369_v23, %v9045_v1  ;;  %v3565_v53 = vrot.slane %v9369_v23, %v9051_v11 }
 0x6b6   : > { %5272 = vmatprep.subr.bf16.mxu1 %v7707_v60  ;;  %v3573_v60 = vrot.slane %v9369_v23, %v3572_v35 }
 0x6b8   : > { %5191 = vmatpush1.bf16.msra.mxu0 %v7702_v58 }
 0x6b9   : > { %5273 = vmatpush1.bf16.msra.mxu1 %v7705_v57  ;;  %5192 = vmatprep.subr.bf16.mxu0 %v7710_v24 }
 0x6ba   : > { %5274 = vmatprep.subr.bf16.mxu1 %v7713_v17 }
 0x6bc   : > { %5193 = vmatpush1.bf16.msra.mxu0 %v7708_v30 }
 0x6bd   : > { %5275 = vmatpush1.bf16.msra.mxu1 %v7711_v52  ;;  %5194 = vmatprep.subr.bf16.mxu0 %v7716_v13 }
 0x6be   : > { %5276 = vmatprep.subr.bf16.mxu1 %v7719_v9 }
 0x6c0   : > { %5195 = vmatpush1.bf16.msra.mxu0 %v7714_v32 }
 0x6c1   : > { %5277 = vmatpush1.bf16.msra.mxu1 %v7717_v6  ;;  %5196 = vmatprep.subr.bf16.mxu0 %v7722_v38 }
 0x6c2   : > { %5278 = vmatprep.subr.bf16.mxu1 %v7725_v55 }
 0x6c4   : > { %5197 = vmatpush1.bf16.msra.mxu0 %v7720_v3 }
 0x6c5   : > { %5279 = vmatpush1.bf16.msra.mxu1 %v7723_v31  ;;  %5198 = vmatprep.subr.bf16.mxu0 %v7728_v21  ;;  %v7912_v21 = vld.sshfl [vmem:[#allocation6] sm:$0x33 pattern:$0x76325410] }
 0x6c6   : > { %5280 = vmatprep.subr.bf16.mxu1 %v7731_v12 }
 0x6c8   : > { %5199 = vmatpush1.bf16.msra.mxu0 %v7726_v40 }
 0x6c9   : > { %5281 = vmatpush1.bf16.msra.mxu1 %v7729_v47  ;;  %5200 = vmatprep.subr.bf16.mxu0 %v7734_v14 }
 0x6ca   : > { %5282 = vmatprep.subr.bf16.mxu1 %v7737_v46  ;;  %v7780_v46 = vld [vmem:[#allocation20 + $0x200] ss:$16 sps:$4 sm:$0xff]  }
 0x6cc   : > { %5201 = vmatpush1.bf16.msra.mxu0 %v7732_v63  ;;  %v7783_v63 = vld [vmem:[#allocation20 + $0x208] ss:$16 sps:$4 sm:$0xff]  }
 0x6cd   : > { %5283 = vmatpush1.bf16.msra.mxu1 %v7735_v8  ;;  %5202 = vmatprep.subr.bf16.mxu0 %v7740_v39  ;;  %v7788_v39 = vld [vmem:[#allocation20 + $0x224] ss:$16 sps:$4 sm:$0xff]  }
 0x6ce   : > { %5284 = vmatprep.subr.bf16.mxu1 %v7743_v41  ;;  %v7791_v41 = vld [vmem:[#allocation20 + $0x22c] ss:$16 sps:$4 sm:$0xff]  }
 0x6d0   : > { %5203 = vmatpush1.bf16.msra.mxu0 %v7738_v45  ;;  %v7789_v45 = vld [vmem:[#allocation20 + $0x228] ss:$16 sps:$4 sm:$0xff]  }
 0x6d1   : > { %5285 = vmatpush1.bf16.msra.mxu1 %v7741_v62  ;;  %5204 = vmatprep.subr.bf16.mxu0 %v7746_v19  ;;  %v7794_v62 = vld [vmem:[#allocation20 + $0x244] ss:$16 sps:$4 sm:$0xff]   ;;  %v7797_v19 = vld [vmem:[#allocation20 + $0x24c] ss:$16 sps:$4 sm:$0xff]  }
 0x6d2   : > { %5286 = vmatprep.subr.bf16.mxu1 %v7749_v27  ;;  %v7792_v27 = vld [vmem:[#allocation20 + $0x240] ss:$16 sps:$4 sm:$0xff]  }
 0x6d4   : > { %5205 = vmatpush1.bf16.msra.mxu0 %v7744_v25  ;;  %v7795_v25 = vld [vmem:[#allocation20 + $0x248] ss:$16 sps:$4 sm:$0xff]  }
 0x6d5   : > { %5287 = vmatpush1.bf16.msra.mxu1 %v7747_v44  ;;  %5206 = vmatprep.subr.bf16.mxu0 %v7752_v16  ;;  %v7800_v44 = vld [vmem:[#allocation20 + $0x264] ss:$16 sps:$4 sm:$0xff]   ;;  %v7803_v16 = vld [vmem:[#allocation20 + $0x26c] ss:$16 sps:$4 sm:$0xff]  }
 0x6d6   : > { %5288 = vmatprep.subr.bf16.mxu1 %v7755_v5  ;;  %v7798_v5 = vld [vmem:[#allocation20 + $0x260] ss:$16 sps:$4 sm:$0xff]  }
 0x6d8   : > { %5207 = vmatpush1.bf16.msra.mxu0 %v7750_v22  ;;  %v7801_v22 = vld [vmem:[#allocation20 + $0x268] ss:$16 sps:$4 sm:$0xff]  }
 0x6d9   : > { %5289 = vmatpush1.bf16.msra.mxu1 %v7753_v36  ;;  %5208 = vmatprep.subr.bf16.mxu0 %v7758_v10  ;;  %v7806_v36 = vld [vmem:[#allocation20 + $0x284] ss:$16 sps:$4 sm:$0xff]   ;;  %v7809_v10 = vld [vmem:[#allocation20 + $0x28c] ss:$16 sps:$4 sm:$0xff]  }
 0x6da   : > { %5290 = vmatprep.subr.bf16.mxu1 %v7761_v20  ;;  %v7804_v20 = vld [vmem:[#allocation20 + $0x280] ss:$16 sps:$4 sm:$0xff]  }
 0x6dc   : > { %5209 = vmatpush1.bf16.msra.mxu0 %v7756_v33  ;;  %v7807_v33 = vld [vmem:[#allocation20 + $0x288] ss:$16 sps:$4 sm:$0xff]  }
 0x6dd   : > { %5291 = vmatpush1.bf16.msra.mxu1 %v7759_v26  ;;  %5210 = vmatprep.subr.bf16.mxu0 %v7764_v61  ;;  %v7812_v26 = vld [vmem:[#allocation20 + $0x2a4] ss:$16 sps:$4 sm:$0xff]   ;;  %v7815_v61 = vld [vmem:[#allocation20 + $0x2ac] ss:$16 sps:$4 sm:$0xff]  }
 0x6de   : > { %5292 = vmatprep.subr.bf16.mxu1 %v7767_v28  ;;  %v7810_v28 = vld [vmem:[#allocation20 + $0x2a0] ss:$16 sps:$4 sm:$0xff]  }
 0x6e0   : > { %5211 = vmatpush1.bf16.msra.mxu0 %v7762_v7  ;;  %v7813_v7 = vld [vmem:[#allocation20 + $0x2a8] ss:$16 sps:$4 sm:$0xff]  }
 0x6e1   : > { %5293 = vmatpush1.bf16.msra.mxu1 %v7765_v49  ;;  %5212 = vmatprep.subr.bf16.mxu0 %v7770_v56  ;;  %v7818_v49 = vld [vmem:[#allocation20 + $0x2c4] ss:$16 sps:$4 sm:$0xff]   ;;  %v7821_v56 = vld [vmem:[#allocation20 + $0x2cc] ss:$16 sps:$4 sm:$0xff]  }
 0x6e2   : > { %5294 = vmatprep.subr.bf16.mxu1 %v7773_v29  ;;  %v7816_v29 = vld [vmem:[#allocation20 + $0x2c0] ss:$16 sps:$4 sm:$0xff]  }
 0x6e4   : > { %5213 = vmatpush1.bf16.msra.mxu0 %v7768_v43  ;;  %v7819_v43 = vld [vmem:[#allocation20 + $0x2c8] ss:$16 sps:$4 sm:$0xff]  }
 0x6e5   : > { %5295 = vmatpush1.bf16.msra.mxu1 %v7771_v51  ;;  %5214 = vmatprep.subr.bf16.mxu0 %v7776_v2  ;;  %v7824_v51 = vld [vmem:[#allocation20 + $0x2e4] ss:$16 sps:$4 sm:$0xff]   ;;  %v7827_v2 = vld [vmem:[#allocation20 + $0x2ec] ss:$16 sps:$4 sm:$0xff]  }
 0x6e6   : > { %5296 = vmatprep.subr.bf16.mxu1 %v7779_v15  ;;  %v7822_v15 = vld [vmem:[#allocation20 + $0x2e0] ss:$16 sps:$4 sm:$0xff]  }
 0x6e8   : > { %5215 = vmatpush1.bf16.msra.mxu0 %v7774_v42  ;;  %v7825_v42 = vld [vmem:[#allocation20 + $0x2e8] ss:$16 sps:$4 sm:$0xff]  }
 0x6e9   : > { %5297 = vmatpush1.bf16.msra.mxu1 %v7777_v48  ;;  %5225 = vmatprep.subr.bf16.mxu0 %v7782_v50  ;;  %v7830_v48 = vld [vmem:[#allocation20 + $0x304] ss:$16 sps:$4 sm:$0xff]   ;;  %v7833_v50 = vld [vmem:[#allocation20 + $0x30c] ss:$16 sps:$4 sm:$0xff]  }
 0x6ea   : > { %5307 = vmatprep.subr.bf16.mxu1 %v7785_v34  ;;  %v7828_v34 = vld [vmem:[#allocation20 + $0x300] ss:$16 sps:$4 sm:$0xff]  }
 0x77e   : > { %v4293_v58 = vpop.f32.mrb[0].mxu0 }
 0x77f   : > { %v9379_v57 = vpop.f32.mrb[0].mxu1  ;;  %v7028_v24 = vadd.f32 %v4293_v58, %v3561_v4  ;;  %v4295_v17 = vpop.f32.mrb[1].mxu0  ;;  %v7831_v4 = vld [vmem:[#allocation20 + $0x308] ss:$16 sps:$4 sm:$0xff]   ;;  %v7834_v58 = vld [vmem:[#allocation20 + $0x320] ss:$16 sps:$4 sm:$0xff]  }
 0x780   : > { %v4377_v30 = vpop.f32.mrb[1].mxu1  ;;  %v7029_v52 = vadd.f32 %v4295_v17, %v3565_v53  ;;  %v4297_v9 = vpop.f32.mrb[2].mxu0  ;;  %v7836_v53 = vld [vmem:[#allocation20 + $0x324] ss:$16 sps:$4 sm:$0xff]  }
 0x781   : > { %v7031_v13 = vadd.f32 %v4377_v30, %v3573_v60  ;;  %v4379_v32 = vpop.f32.mrb[2].mxu1  ;;  %v4382_v6 = vmax.f32 %v7028_v24, 0.0  ;;  %v4298_v38 = vpop.f32.mrb[3].mxu0  ;;  %v7839_v60 = vld [vmem:[#allocation20 + $0x32c] ss:$16 sps:$4 sm:$0xff]  }
 0x782   : > { %v4380_v55 = vpop.f32.mrb[3].mxu1  ;;  %v4383_v3 = vmax.f32 %v7029_v52, 0.0  ;;  %v7837_v24 = vld [vmem:[#allocation20 + $0x328] ss:$16 sps:$4 sm:$0xff]   ;;  %v7842_v17 = vld [vmem:[#allocation20 + $0x344] ss:$16 sps:$4 sm:$0xff]  }
 0x783   : > { %v4385_v31 = vmax.f32 %v7031_v13, 0.0  ;;  %v9381_v12 = vadd.f32 %v7912_v21, %v4382_v6  ;;  %v7845_v30 = vld [vmem:[#allocation20 + $0x34c] ss:$16 sps:$4 sm:$0xff]   ;;  %v7840_v52 = vld [vmem:[#allocation20 + $0x340] ss:$16 sps:$4 sm:$0xff]  }
 0x784   : > { %v9384_v40 = vadd.f32 %v4383_v3, %v9351_v54  ;;  %v7843_v13 = vld [vmem:[#allocation20 + $0x348] ss:$16 sps:$4 sm:$0xff]   ;;  %v7848_v9 = vld [vmem:[#allocation20 + $0x364] ss:$16 sps:$4 sm:$0xff]   ;;  %v7851_v32 = vld [vmem:[#allocation20 + $0x36c] ss:$16 sps:$4 sm:$0xff]  }
 0x785   : > { %v9387_v47 = vadd.f32 %v4385_v31, %v9360_v37  ;;  %v4390_v8 = vpack.c.bf16 %v9381_v12, %v9381_v12  ;;  %v7786_v37 = vld [vmem:[#allocation20 + $0x220] ss:$16 sps:$4 sm:$0xff]   ;;  %v7849_v38 = vld [vmem:[#allocation20 + $0x368] ss:$16 sps:$4 sm:$0xff]   ;;  %v7854_v55 = vld [vmem:[#allocation20 + $0x384] ss:$16 sps:$4 sm:$0xff]  }
 0x786   : > { %v4391_v14 = vpack.c.bf16 %v9384_v40, %v9384_v40  ;;  %v7846_v6 = vld [vmem:[#allocation20 + $0x360] ss:$16 sps:$4 sm:$0xff]   ;;  %v7857_v3 = vld [vmem:[#allocation20 + $0x38c] ss:$16 sps:$4 sm:$0xff]   ;;  %v7855_v21 = vld [vmem:[#allocation20 + $0x388] ss:$16 sps:$4 sm:$0xff]  }
 0x787   : > { %v4393_v54 = vpack.c.bf16 %v9387_v47, %v9387_v47  ;;  %v7852_v31 = vld [vmem:[#allocation20 + $0x380] ss:$16 sps:$4 sm:$0xff]  }
 0x788   : > { %5216 = vmatprep.mubr.bf16.mxu0 %v4391_v14  ;;  %5298 = vmatprep.mubr.bf16.mxu1 %v4391_v14  ;;  %v3569_v14 = vrot.slane %v9369_v23, %v9064_v0  ;;  %v7872_v23 = vld [vmem:[#allocation20 + $0x3e4] ss:$16 sps:$4 sm:$0xff]  }
 0x789   : > { %5217 = vmatmul.mubr.bf16.vlgmr.msra.gmra.mrb[4].mxu0 %v4390_v8  ;;  %5299 = vmatmul.mubr.bf16.vlgmr.msra.gmra.mrb[4].mxu1 %v4390_v8  ;;  %v7858_v8 = vld [vmem:[#allocation20 + $0x3a0] ss:$16 sps:$4 sm:$0xff]  }
 0x78a   : > { %5226 = vmatpush1.bf16.msra.mxu0 %v7780_v46  ;;  %5308 = vmatpush1.bf16.msra.mxu1 %v7783_v63  ;;  %v7860_v46 = vld [vmem:[#allocation20 + $0x3a4] ss:$16 sps:$4 sm:$0xff]   ;;  %v7863_v63 = vld [vmem:[#allocation20 + $0x3ac] ss:$16 sps:$4 sm:$0xff]  }
 0x78b   : > { %5257 = vmatprep.mubr.bf16.mxu0 %v4393_v54  ;;  %5339 = vmatprep.mubr.bf16.mxu1 %v4393_v54  ;;  %v7866_v54 = vld [vmem:[#allocation20 + $0x3c4] ss:$16 sps:$4 sm:$0xff]  }
 0x78c   : > { %5227 = vmatprep.subr.bf16.mxu0 %v7788_v39  ;;  %5309 = vmatprep.subr.bf16.mxu1 %v7791_v41  ;;  %v7861_v39 = vld [vmem:[#allocation20 + $0x3a8] ss:$16 sps:$4 sm:$0xff]   ;;  %v7030_v41 = vadd.f32 %v9379_v57, %v3569_v14  ;;  %v7876_v57 = vld [vmem:[#allocation22 + $0x40] sm:$0xff]  }
 0x78e   : > { %5228 = vmatpush1.bf16.msra.mxu0 %v7786_v37  ;;  %5310 = vmatpush1.bf16.msra.mxu1 %v7789_v45  ;;  %v7869_v37 = vld [vmem:[#allocation20 + $0x3cc] ss:$16 sps:$4 sm:$0xff]   ;;  %v7864_v45 = vld [vmem:[#allocation20 + $0x3c0] ss:$16 sps:$4 sm:$0xff]  }
 0x78f   : > { %5229 = vmatprep.subr.bf16.mxu0 %v7794_v62  ;;  %5311 = vmatprep.subr.bf16.mxu1 %v7797_v19  ;;  %v7867_v62 = vld [vmem:[#allocation20 + $0x3c8] ss:$16 sps:$4 sm:$0xff]   ;;  %v4384_v19 = vmax.f32 %v7030_v41, 0.0 }
 0x792   : > { %5230 = vmatpush1.bf16.msra.mxu0 %v7792_v27  ;;  %5312 = vmatpush1.bf16.msra.mxu1 %v7795_v25  ;;  %v7875_v27 = vld [vmem:[#allocation20 + $0x3ec] ss:$16 sps:$4 sm:$0xff]   ;;  %v7870_v25 = vld [vmem:[#allocation20 + $0x3e0] ss:$16 sps:$4 sm:$0xff]  }
 0x793   : > { %5231 = vmatprep.subr.bf16.mxu0 %v7800_v44  ;;  %5313 = vmatprep.subr.bf16.mxu1 %v7803_v16  ;;  %v7873_v44 = vld [vmem:[#allocation20 + $0x3e8] ss:$16 sps:$4 sm:$0xff]   ;;  %v9399_v16 = vadd.f32 %v4384_v19, %v9356_v18 }
 0x794   : > { %v7882_v18 = vld [vmem:[#allocation22 + $0x8] sm:$0xff]  }
 0x796   : > { %5232 = vmatpush1.bf16.msra.mxu0 %v7798_v5  ;;  %5314 = vmatpush1.bf16.msra.mxu1 %v7801_v22  ;;  %v7877_v5 = vld [vmem:[#allocation22 + $0xc0] sm:$0xff]  }
 0x797   : > { %5233 = vmatprep.subr.bf16.mxu0 %v7806_v36  ;;  %5315 = vmatprep.subr.bf16.mxu1 %v7809_v10  ;;  %v7878_v22 = vld [vmem:[#allocation22] sm:$0xff]   ;;  %v4392_v10 = vpack.c.bf16 %v9399_v16, %v9399_v16 }
 0x798   : > { %v7879_v36 = vld [vmem:[#allocation22 + $0x80] sm:$0xff]  }
 0x79a   : > { %5234 = vmatpush1.bf16.msra.mxu0 %v7804_v20  ;;  %5316 = vmatpush1.bf16.msra.mxu1 %v7807_v33  ;;  %v7880_v20 = vld [vmem:[#allocation22 + $0x48] sm:$0xff]  }
 0x79b   : > { %5235 = vmatprep.subr.bf16.mxu0 %v7812_v26  ;;  %5317 = vmatprep.subr.bf16.mxu1 %v7815_v61  ;;  %v7881_v33 = vld [vmem:[#allocation22 + $0xc8] sm:$0xff]   ;;  %v7884_v61 = vld [vmem:[#allocation22 + $0x50] sm:$0xff]  }
 0x79c   : > { %v7883_v26 = vld [vmem:[#allocation22 + $0x88] sm:$0xff]  }
 0x79e   : > { %5236 = vmatpush1.bf16.msra.mxu0 %v7810_v28  ;;  %5318 = vmatpush1.bf16.msra.mxu1 %v7813_v7  ;;  %v7885_v28 = vld [vmem:[#allocation22 + $0xd0] sm:$0xff]  }
 0x79f   : > { %5237 = vmatprep.subr.bf16.mxu0 %v7818_v49  ;;  %5319 = vmatprep.subr.bf16.mxu1 %v7821_v56  ;;  %v7886_v7 = vld [vmem:[#allocation22 + $0x10] sm:$0xff]   ;;  %v7888_v56 = vld [vmem:[#allocation22 + $0x58] sm:$0xff]  }
 0x7a0   : > { %v7887_v49 = vld [vmem:[#allocation22 + $0x90] sm:$0xff]  }
 0x7a2   : > { %5238 = vmatpush1.bf16.msra.mxu0 %v7816_v29  ;;  %5320 = vmatpush1.bf16.msra.mxu1 %v7819_v43  ;;  %v7889_v29 = vld [vmem:[#allocation22 + $0xd8] sm:$0xff]  }
 0x7a3   : > { %5239 = vmatprep.subr.bf16.mxu0 %v7824_v51  ;;  %5321 = vmatprep.subr.bf16.mxu1 %v7827_v2  ;;  %v7890_v43 = vld [vmem:[#allocation22 + $0x18] sm:$0xff]   ;;  %v7892_v2 = vld [vmem:[#allocation22 + $0x60] sm:$0xff]  }
 0x7a4   : > { %v7891_v51 = vld [vmem:[#allocation22 + $0x98] sm:$0xff]  }
 0x7a6   : > { %5240 = vmatpush1.bf16.msra.mxu0 %v7822_v15  ;;  %5322 = vmatpush1.bf16.msra.mxu1 %v7825_v42  ;;  %v7893_v15 = vld [vmem:[#allocation22 + $0xe0] sm:$0xff]  }
 0x7a7   : > { %5241 = vmatprep.subr.bf16.mxu0 %v7830_v48  ;;  %5323 = vmatprep.subr.bf16.mxu1 %v7833_v50  ;;  %v7894_v42 = vld [vmem:[#allocation22 + $0x20] sm:$0xff]   ;;  %v7896_v50 = vld [vmem:[#allocation22 + $0x68] sm:$0xff]  }
 0x7a8   : > { %v7895_v48 = vld [vmem:[#allocation22 + $0xa0] sm:$0xff]  }
 0x7aa   : > { %5242 = vmatpush1.bf16.msra.mxu0 %v7828_v34  ;;  %5324 = vmatpush1.bf16.msra.mxu1 %v7831_v4  ;;  %v7897_v34 = vld [vmem:[#allocation22 + $0xe8] sm:$0xff]  }
 0x7ab   : > { %5243 = vmatprep.subr.bf16.mxu0 %v7836_v53  ;;  %5325 = vmatprep.subr.bf16.mxu1 %v7839_v60  ;;  %v7898_v4 = vld [vmem:[#allocation22 + $0x28] sm:$0xff]   ;;  %v7900_v60 = vld [vmem:[#allocation22 + $0x70] sm:$0xff]  }
 0x7ac   : > { %v7899_v53 = vld [vmem:[#allocation22 + $0xa8] sm:$0xff]  }
 0x7ae   : > { %5244 = vmatpush1.bf16.msra.mxu0 %v7834_v58  ;;  %5326 = vmatpush1.bf16.msra.mxu1 %v7837_v24  ;;  %v7901_v58 = vld [vmem:[#allocation22 + $0xf0] sm:$0xff]  }
 0x7af   : > { %5245 = vmatprep.subr.bf16.mxu0 %v7842_v17  ;;  %5327 = vmatprep.subr.bf16.mxu1 %v7845_v30  ;;  %v7902_v24 = vld [vmem:[#allocation22 + $0x30] sm:$0xff]   ;;  %v7904_v30 = vld [vmem:[#allocation22 + $0x78] sm:$0xff]  }
 0x7b0   : > { %v7903_v17 = vld [vmem:[#allocation22 + $0xb0] sm:$0xff]  }
 0x7b2   : > { %5246 = vmatpush1.bf16.msra.mxu0 %v7840_v52  ;;  %5328 = vmatpush1.bf16.msra.mxu1 %v7843_v13  ;;  %v7905_v52 = vld [vmem:[#allocation22 + $0xf8] sm:$0xff]  }
 0x7b3   : > { %5247 = vmatprep.subr.bf16.mxu0 %v7848_v9  ;;  %5329 = vmatprep.subr.bf16.mxu1 %v7851_v32  ;;  %v7906_v13 = vld [vmem:[#allocation22 + $0x38] sm:$0xff]   ;;  %v4522_v32 = vld [vmem:[%s9664_s17] sm:$0xf] }
 0x7b4   : > { %v7907_v9 = vld [vmem:[#allocation22 + $0xb8] sm:$0xff]  }
 0x7b6   : > { %5248 = vmatpush1.bf16.msra.mxu0 %v7846_v6  ;;  %5330 = vmatpush1.bf16.msra.mxu1 %v7849_v38  ;;  %v4527_v6 = vrot.slane %v4522_v32, %v9045_v1  ;;  %v4535_v38 = vrot.slane %v4522_v32, %v9064_v0 }
 0x7b7   : > { %5249 = vmatprep.subr.bf16.mxu0 %v7854_v55  ;;  %5331 = vmatprep.subr.bf16.mxu1 %v7857_v3  ;;  %v4531_v55 = vrot.slane %v4522_v32, %v9051_v11  ;;  %v4539_v3 = vrot.slane %v4522_v32, %v3572_v35 }
 0x7ba   : > { %5250 = vmatpush1.bf16.msra.mxu0 %v7852_v31  ;;  %5332 = vmatpush1.bf16.msra.mxu1 %v7855_v21 }
 0x7bb   : > { %5251 = vmatprep.subr.bf16.mxu0 %v7860_v46  ;;  %5333 = vmatprep.subr.bf16.mxu1 %v7863_v63 }
 0x7be   : > { %5252 = vmatpush1.bf16.msra.mxu0 %v7858_v8  ;;  %5334 = vmatpush1.bf16.msra.mxu1 %v7861_v39 }
 0x7bf   : > { %5253 = vmatprep.subr.bf16.mxu0 %v7866_v54  ;;  %5335 = vmatprep.subr.bf16.mxu1 %v7869_v37 }
 0x7c2   : > { %5254 = vmatpush1.bf16.msra.mxu0 %v7864_v45  ;;  %5336 = vmatpush1.bf16.msra.mxu1 %v7867_v62 }
 0x7c3   : > { %5255 = vmatprep.subr.bf16.mxu0 %v7872_v23  ;;  %5337 = vmatprep.subr.bf16.mxu1 %v7875_v27 }
 0x7c6   : > { %5256 = vmatpush1.bf16.msra.mxu0 %v7870_v25  ;;  %5338 = vmatpush1.bf16.msra.mxu1 %v7873_v44 }
 0x7c7   : > { %6416 = vmatprep.subr.bf16.mxu0 %v7876_v57  ;;  %6438 = vmatprep.subr.bf16.mxu1 %v7877_v5 }
 0x7c9   : > { %5258 = vmatmul.mubr.bf16.vlgmr.msra.gmra.mrb[4].mxu0 %v4392_v10  ;;  %5340 = vmatmul.mubr.bf16.vlgmr.msra.gmra.mrb[4].mxu1 %v4392_v10 }
 0x7ca   : > { %6417 = vmatpush3.bf16.msra.mxu0 %v7878_v22  ;;  %6439 = vmatpush3.bf16.msra.mxu1 %v7879_v36 }
 0x7cb   : > { %6418 = vmatprep.subr.bf16.mxu0 %v7880_v20  ;;  %6440 = vmatprep.subr.bf16.mxu1 %v7881_v33 }
 0x7ce   : > { %6419 = vmatpush3.bf16.msra.mxu0 %v7882_v18  ;;  %6441 = vmatpush3.bf16.msra.mxu1 %v7883_v26 }
 0x7cf   : > { %6420 = vmatprep.subr.bf16.mxu0 %v7884_v61  ;;  %6442 = vmatprep.subr.bf16.mxu1 %v7885_v28 }
 0x7d2   : > { %6421 = vmatpush3.bf16.msra.mxu0 %v7886_v7  ;;  %6443 = vmatpush3.bf16.msra.mxu1 %v7887_v49 }
 0x7d3   : > { %6422 = vmatprep.subr.bf16.mxu0 %v7888_v56  ;;  %6444 = vmatprep.subr.bf16.mxu1 %v7889_v29 }
 0x7d6   : > { %6423 = vmatpush3.bf16.msra.mxu0 %v7890_v43  ;;  %6445 = vmatpush3.bf16.msra.mxu1 %v7891_v51 }
 0x7d7   : > { %6424 = vmatprep.subr.bf16.mxu0 %v7892_v2  ;;  %6446 = vmatprep.subr.bf16.mxu1 %v7893_v15 }
 0x7da   : > { %6425 = vmatpush3.bf16.msra.mxu0 %v7894_v42  ;;  %6447 = vmatpush3.bf16.msra.mxu1 %v7895_v48 }
 0x7db   : > { %6426 = vmatprep.subr.bf16.mxu0 %v7896_v50  ;;  %6448 = vmatprep.subr.bf16.mxu1 %v7897_v34 }
 0x7de   : > { %6427 = vmatpush3.bf16.msra.mxu0 %v7898_v4  ;;  %6449 = vmatpush3.bf16.msra.mxu1 %v7899_v53 }
 0x7df   : > { %6428 = vmatprep.subr.bf16.mxu0 %v7900_v60  ;;  %6450 = vmatprep.subr.bf16.mxu1 %v7901_v58 }
 0x7e2   : > { %6429 = vmatpush3.bf16.msra.mxu0 %v7902_v24  ;;  %6451 = vmatpush3.bf16.msra.mxu1 %v7903_v17 }
 0x7e3   : > { %6430 = vmatprep.subr.bf16.mxu0 %v7904_v30  ;;  %6452 = vmatprep.subr.bf16.mxu1 %v7905_v52 }
 0x7e6   : > { %6431 = vmatpush3.bf16.msra.mxu0 %v7906_v13  ;;  %6453 = vmatpush3.bf16.msra.mxu1 %v7907_v9 }
 0x89c   : > { %v5259_v31 = vpop.f32.mrb[4].mxu0  ;;  %v5341_v21 = vpop.f32.mrb[4].mxu1 }
 0x89d   : > { %v7032_v14 = vadd.f32 %v5259_v31, %v4527_v6  ;;  %v7034_v46 = vadd.f32 %v5341_v21, %v4535_v38  ;;  %v5261_v63 = vpop.f32.mrb[5].mxu0  ;;  %v5343_v8 = vpop.f32.mrb[5].mxu1 }
 0x89e   : > { %v7033_v39 = vadd.f32 %v5261_v63, %v4531_v55  ;;  %v7035_v41 = vadd.f32 %v5343_v8, %v4539_v3  ;;  %v5263_v54 = vpop.f32.mrb[6].mxu0  ;;  %v5345_v37 = vpop.f32.mrb[6].mxu1 }
 0x89f   : > { %v5348_v45 = vmax.f32 %v7032_v14, 0.0  ;;  %v5350_v62 = vmax.f32 %v7034_v46, 0.0  ;;  %v5264_v1 = vpop.f32.mrb[7].mxu0  ;;  %v5346_v19 = vpop.f32.mrb[7].mxu1 }
 0x8a0   : > { %v5349_v0 = vmax.f32 %v7033_v39, 0.0  ;;  %v5351_v23 = vmax.f32 %v7035_v41, 0.0 }
 0x8a1   : > { %v5352_v11 = vadd.f32 %v5348_v45, %v9381_v12  ;;  %v5354_v59 = vadd.f32 %v5350_v62, %v9399_v16  ;;  %v6316_v12 = vld [vmem:[%s9665_s9] ss:$0 sm:$0xff] }
 0x8a2   : > { %v5353_v35 = vadd.f32 %v5349_v0, %v9384_v40  ;;  %v5355_v27 = vadd.f32 %v5351_v23, %v9387_v47 }
 0x8a3   : > { %v5356_v57 = vpack.c.bf16 %v5352_v11, %v5352_v11  ;;  %v5358_v5 = vpack.c.bf16 %v5354_v59, %v5354_v59 }
 0x8a4   : > { %v5357_v25 = vpack.c.bf16 %v5353_v35, %v5353_v35  ;;  %v5359_v44 = vpack.c.bf16 %v5355_v27, %v5355_v27 }
 0x8a6   : > { %5655 = vmatprep.mubr.bf16.mxu0 %v5357_v25  ;;  %5695 = vmatprep.mubr.bf16.mxu1 %v5359_v44 }
 0x8a7   : > { %5656 = vmatmul.mubr.bf16.vlgmr.msra.gmra.mrb[8].mxu0 %v5356_v57  ;;  %5696 = vmatmul.mubr.bf16.vlgmr.msra.gmra.mrb[8].mxu1 %v5358_v5 }
 0x97a   : > { %v6432_v22 = vpop.f32.mrb[8].mxu0  ;;  %v6454_v36 = vpop.f32.mrb[8].mxu1 }
 0x97b   : > { %v6433_v10 = vpop.f32.mrb[9].mxu0  ;;  %v6455_v16 = vpop.f32.mrb[9].mxu1 }
 0x97c   : > { %v6434_v20 = vadd.f32 %v6433_v10, %v6432_v22  ;;  %v6456_v40 = vadd.f32 %v6455_v16, %v6454_v36  ;;  %v6435_v33 = vpop.f32.mrb[10].mxu0  ;;  %v6457_v47 = vpop.f32.mrb[10].mxu1 }
 0x97d   : > { %v6436_v18 = vpop.f32.mrb[11].mxu0  ;;  %v6458_v26 = vpop.f32.mrb[11].mxu1 }
 0x97e   : > { %v5658_v61 = vadd.f32 %v6434_v20, %v6316_v12 }
 0x980   : > { %v5698_v28 = vadd.f32 %v6456_v40, %v5658_v61 }
 0x982   : > { %v6349_v7 = vmul.f32 -1.442695, %v5698_v28 }
 0x984   : > { %7908 = vpow2.f32 %v6349_v7 }
 0x98e   : > { %v7909_v49 = vpop.eup %7908 }
 0x98f   : > { %v5706_v56 = vadd.f32 1.0, %v7909_v49 }
 0x991   : > { %7910 = vrcp.f32 %v5706_v56 }
 0x99b   : > { %v7911_v29 = vpop.eup %7910 }
 0x99c   : > { %5709 = vst [vmem:[#allocation23] sm:$0x3] %v7911_v29 }
 0x99d PF: > { %p7139_p10 = scmp.eq.s32.totalorder %s8387_s0, 1  ;;  %s8275_s24 = smov [#allocation23]  }
 0x99e   : > { %s5717_s18 = sshll.u32 %s8275_s24, 4  ;;  %s5718_s18 = int_to_ptr.vmem [resolvable:$true] %s5717_s18 }
 0x99f   : > { %s8167_s27 = scalar_lea.vmem %s5718_s18, 32  ;;  %p8174_p3 = scmp.lt.s32.totalorder %s5718_s18, %s5718_s18 }
 0x9a0   : > { %p8168_p8 = scmp.ne.s32.totalorder %s5718_s18, %s8167_s27  ;;  %p8175_p6 = scmp.lt.s32.totalorder %s8167_s27, %s8167_s27 }
 0x9a2   : > { %p8169_p1 = pnand %p8168_p8, %p7139_p10  ;;  %p8176_p4 = por %p8175_p6, %p8174_p3 }
 0x9a4   : > { %p8170_p7 = pneg %p8169_p1 }
 0x9a6   : > { %p8177_p11 = pnand %p8176_p4, %p8170_p7 }
 0x9a8   : > { %8180 = shalt.err (!%p8177_p11)
}
 0x9a9   : > { %s9666_s29 = sld [smem:[#allocation86_spill]] }
 0x9af   : > { %s8181_s28 = scalar_lea.hbm %s9666_s29, 32 }
 0x9b0   : > { %p8182_p12 = scmp.ne.s32.totalorder %s9666_s29, %s8181_s28  ;;  %p8187_p0 = scmp.lt.u32.totalorder %s8181_s28, %s9666_s29 }
 0x9b2   : > { %p8183_p13 = pnand %p8182_p12, %p7139_p10 }
 0x9b4   : > { %p8184_p2 = pneg %p8183_p13 }
 0x9b6   : > { %p8189_p5 = pnand %p8187_p0, %p8184_p2 }
 0x9b8   : > { %8192 = shalt.err (!%p8189_p5)
}
 0x9b9   : > { %7090 = dma.vmem_to_hbm [thread:$0]  (%p7139_p10), %s5718_s18, 32, %s9666_s29, [#allocation10]  }
 0x9ba   : > { %8230 = dma.done.wait (%p7139_p10), [#allocation10], 32  }
 0x9bb   : > { %8232 = vsyncadd (%p7139_p10), [#allocation10], 4294967264 }
 0x9bc PF: > { %p32_p9 = scmp.ge.s32.totalorder %s8595_s5, 4   ;;  %s9667_s24 = smov %s8239_s25 }
 0x9bd   : > { %s9668_s25 = smov %s8243_s26  ;;  %s9669_s26 = smov %s8607_s22 }
 0x9be   : > { %s9670_s27 = smov %s8595_s5  ;;  %34 = sbr.rel (!%p32_p9) target bundleno = 20 (0x14), region = 173 }
 0x9c5   :  { %5730 = vsyncpa [#allocation9], 1 }
 0x9c6   :  { %5732 = vsyncpa [#allocation9 + $0x1], 1 }
 0x9c7   :  { %5733 = vsyncpa [#allocation12], 1 }
 0x9c8   :  { %5734 = vsyncpa [#allocation15], 1 }
 0x9c9   :  { %5735 = vsyncpa [#allocation18], 1 }
 0x9ca   :  { %5736 = vsyncpa [#allocation21], 1 }
 0x9cb   :  { %5737 = vsyncpa [#allocation10], 1 }
 0x9cc   :  { %5739 = vsyncpa [#allocation10 + $0x1], 1 }

</bundles_post_ra>
